<compile_context>
chip_gen: v7x
topology: tpu7x:2x2x1
jax: 0.10.0
libtpu: 0.0.40
codegen_flags: <defaults>
</compile_context>

<pallas_src>
import jax
import jax.numpy as jnp
from jax.experimental import pallas as pl
from jax.experimental.pallas import tpu as pltpu

INPUT_SIZE = 2700
HIDDEN1 = 512
HIDDEN2 = 128
NUM_CLASSES = 2

OUT_PAD = 128    # lane-dense output block; logits live in [:, :NUM_CLASSES]


def _round_up(n, m):
    return (n + m - 1) // m * m


def mlp_kernel(x_ref, w1_ref, b1_ref, w2_ref, b2_ref, w3_ref, b3_ref, o_ref):
    # fc1 + ReLU   (bf16 operands, f32 accumulate, f32 bias/ReLU)
    x = x_ref[...].astype(jnp.bfloat16)
    h1 = jnp.dot(x, w1_ref[...], preferred_element_type=jnp.float32)
    h1 = jnp.maximum(h1 + b1_ref[...], 0.0).astype(jnp.bfloat16)
    # fc2 + ReLU
    h2 = jnp.dot(h1, w2_ref[...], preferred_element_type=jnp.float32)
    h2 = jnp.maximum(h2 + b2_ref[...], 0.0).astype(jnp.bfloat16)
    # fc3 (logits, no activation) into the lane-padded output block
    out = jnp.dot(h2, w3_ref[...], preferred_element_type=jnp.float32) + b3_ref[...]
    o_ref[...] = out.astype(o_ref.dtype)


def prepare_params(params):
    """One-time weight prep: bf16 cast + fc3 lane-padding (do NOT redo per call)."""
    w1, b1, w2, b2, w3, b3 = params
    w1_p = w1.astype(jnp.bfloat16)                 # (2700, 512) bf16
    w2_p = w2.astype(jnp.bfloat16)                 # (512, 128)  bf16
    w3_p = jnp.pad(w3, ((0, 0), (0, OUT_PAD - NUM_CLASSES))).astype(jnp.bfloat16)
    b3_p = jnp.pad(b3, ((0, 0), (0, OUT_PAD - NUM_CLASSES)))  # f32
    # Biases stay f32 (added to the f32 accumulator).
    return (w1_p, b1, w2_p, b2, w3_p, b3_p)


def classifier_forward(x, prepared_params, *, batch_tile=512):
    """x: (B, INPUT_SIZE) float32.  Returns (B, NUM_CLASSES) float32."""
    w1, b1, w2, b2, w3, b3 = prepared_params
    B, D = x.shape
    assert D == INPUT_SIZE

    # Batch tile: multiple of 16 (bf16 sublane packing), no larger than the
    # padded batch.
    bt = _round_up(min(batch_tile, _round_up(B, 16)), 16)
    # v7x megacore: make sure the grid has >= 2 steps once the batch is big
    # enough, so both TensorCores get work (harmless on v5e/v6e).
    if B >= 32 and _round_up(B, bt) // bt < 2:
        bt = _round_up((B + 1) // 2, 16)
    B_pad = _round_up(B, bt)
    x_p = x if B_pad == B else jnp.pad(x, ((0, B_pad - B), (0, 0)))

    grid = (B_pad // bt,)

    # Weights/biases: constant index_map -> keep a single resident VMEM buffer.
    def resident(shape):
        return pl.BlockSpec(shape, lambda i: (0,) * len(shape),
                            pipeline_mode=pl.Buffered(1))

    out_p = pl.pallas_call(
        mlp_kernel,
        out_shape=jax.ShapeDtypeStruct((B_pad, OUT_PAD), jnp.bfloat16),
        grid_spec=pltpu.PrefetchScalarGridSpec(
            num_scalar_prefetch=0,
            grid=grid,
            in_specs=[
                # streamed f32 activation tile, double-buffered
                pl.BlockSpec((bt, INPUT_SIZE), lambda i: (i, 0),
                             pipeline_mode=pl.Buffered(2)),
                resident((INPUT_SIZE, HIDDEN1)),   # w1 (bf16)
                resident((1, HIDDEN1)),            # b1 (f32)
                resident((HIDDEN1, HIDDEN2)),      # w2 (bf16)
                resident((1, HIDDEN2)),            # b2 (f32)
                resident((HIDDEN2, OUT_PAD)),      # w3 (bf16, lane-padded)
                resident((1, OUT_PAD)),            # b3 (f32, lane-padded)
            ],
            out_specs=pl.BlockSpec((bt, OUT_PAD), lambda i: (i, 0)),
        ),
        compiler_params=pltpu.CompilerParams(
            dimension_semantics=("parallel",),
            vmem_limit_bytes=48 << 20,
        ),
    )(x_p, w1, b1, w2, b2, w3, b3)

    # Tiny slice + upcast back to f32 logits (original module returns f32).
    return out_p[:B, :NUM_CLASSES].astype(jnp.float32)


def init_params(key):
    """PyTorch nn.Linear default init: U(-1/sqrt(fan_in), 1/sqrt(fan_in))."""
    ks = jax.random.split(key, 6)

    def linear(kw, kb, fan_in, fan_out):
        bound = 1.0 / jnp.sqrt(fan_in)
        w = jax.random.uniform(kw, (fan_in, fan_out), jnp.float32, -bound, bound)
        b = jax.random.uniform(kb, (1, fan_out), jnp.float32, -bound, bound)
        return w, b

    w1, b1 = linear(ks[0], ks[1], INPUT_SIZE, HIDDEN1)
    w2, b2 = linear(ks[2], ks[3], HIDDEN1, HIDDEN2)
    w3, b3 = linear(ks[4], ks[5], HIDDEN2, NUM_CLASSES)
    return (w1, b1, w2, b2, w3, b3)


def reference_forward_f32(x, params):
    w1, b1, w2, b2, w3, b3 = params
    h1 = jnp.maximum(x @ w1 + b1, 0.0)
    h2 = jnp.maximum(h1 @ w2 + b2, 0.0)
    return h2 @ w3 + b3


def reference_forward_bf16(x, params):
    """Same bf16 operand / f32 accumulate recipe as the kernel."""
    w1, b1, w2, b2, w3, b3 = params
    bf = jnp.bfloat16
    h1 = jnp.dot(x.astype(bf), w1.astype(bf), preferred_element_type=jnp.float32)
    h1 = jnp.maximum(h1 + b1, 0.0).astype(bf)
    h2 = jnp.dot(h1, w2.astype(bf), preferred_element_type=jnp.float32)
    h2 = jnp.maximum(h2 + b2, 0.0).astype(bf)
    return jnp.dot(h2, w3.astype(bf), preferred_element_type=jnp.float32) + b3


if __name__ == "__main__":
    key = jax.random.PRNGKey(0)
    k_params, k_x = jax.random.split(key)

    params = init_params(k_params)
    prepared = jax.block_until_ready(prepare_params(params))  # one-time prep

    # Small, deterministic test batch (feature dim is fixed by the module).
    batch = 8
    x = jax.random.normal(k_x, (batch, INPUT_SIZE), jnp.float32)

    out = classifier_forward(x, prepared)
    out = jax.block_until_ready(out)
    assert out.shape == (batch, NUM_CLASSES)
    assert out.dtype == jnp.float32

    ref_bf16 = reference_forward_bf16(x, params)
    ref_f32 = reference_forward_f32(x, params)
    assert jnp.allclose(out, ref_bf16, atol=2e-2, rtol=2e-2), "mismatch vs bf16 reference"
    assert jnp.allclose(out, ref_f32, atol=5e-2, rtol=5e-2), "mismatch vs f32 reference"

    # Exercise the batch-padding path (B not a multiple of the tile).
    batch2 = 5
    x2 = jax.random.normal(jax.random.PRNGKey(1), (batch2, INPUT_SIZE), jnp.float32)
    out2 = jax.block_until_ready(classifier_forward(x2, prepared))
    assert out2.shape == (batch2, NUM_CLASSES)
    assert jnp.allclose(out2, reference_forward_bf16(x2, params), atol=2e-2, rtol=2e-2)

    # Exercise the 2-grid-step (megacore) path.
    batch3 = 48
    x3 = jax.random.normal(jax.random.PRNGKey(2), (batch3, INPUT_SIZE), jnp.float32)
    out3 = jax.block_until_ready(classifier_forward(x3, prepared))
    assert out3.shape == (batch3, NUM_CLASSES)
    assert jnp.allclose(out3, reference_forward_bf16(x3, params), atol=2e-2, rtol=2e-2)

    print("KERNEL_OK")
</pallas_src>

<mosaic_0001>
module attributes {stable_mosaic.version = 11 : i64} {
  func.func @mlp_kernel(%arg0: i32, %arg1: memref<16x2700xf32, #tpu.memory_space<vmem>>, %arg2: memref<2700x512xbf16, #tpu.memory_space<vmem>>, %arg3: memref<1x512xf32, #tpu.memory_space<vmem>>, %arg4: memref<512x128xbf16, #tpu.memory_space<vmem>>, %arg5: memref<1x128xf32, #tpu.memory_space<vmem>>, %arg6: memref<128x128xbf16, #tpu.memory_space<vmem>>, %arg7: memref<1x128xf32, #tpu.memory_space<vmem>>, %arg8: memref<16x128xbf16, #tpu.memory_space<vmem>>) attributes {dimension_semantics = [#tpu.dimension_semantics<parallel>], iteration_bounds = array<i64: 1>, scalar_prefetch = 0 : i64, scratch_operands = 0 : i64, tpu.core_type = #tpu.core_type<tc>, window_params = [{pipeline_mode = #tpu.pipeline_mode<double_buffered>, transform_indices = @transform_0, window_bounds = array<i64: 16, 2700>}, {pipeline_mode = #tpu.pipeline_mode<synchronous>, transform_indices = @transform_1, window_bounds = array<i64: 2700, 512>}, {pipeline_mode = #tpu.pipeline_mode<synchronous>, transform_indices = @transform_2, window_bounds = array<i64: 1, 512>}, {pipeline_mode = #tpu.pipeline_mode<synchronous>, transform_indices = @transform_3, window_bounds = array<i64: 512, 128>}, {pipeline_mode = #tpu.pipeline_mode<synchronous>, transform_indices = @transform_4, window_bounds = array<i64: 1, 128>}, {pipeline_mode = #tpu.pipeline_mode<synchronous>, transform_indices = @transform_5, window_bounds = array<i64: 128, 128>}, {pipeline_mode = #tpu.pipeline_mode<synchronous>, transform_indices = @transform_6, window_bounds = array<i64: 1, 128>}, {transform_indices = @transform_7, window_bounds = array<i64: 16, 128>}]} {
    %c0 = arith.constant 0 : index
    %c0_0 = arith.constant 0 : index
    %0 = vector.load %arg1[%c0, %c0_0] : memref<16x2700xf32, #tpu.memory_space<vmem>>, vector<16x2700xf32>
    %1 = arith.truncf %0 : vector<16x2700xf32> to vector<16x2700xbf16>
    %c0_1 = arith.constant 0 : index
    %c0_2 = arith.constant 0 : index
    %2 = vector.load %arg2[%c0_1, %c0_2] : memref<2700x512xbf16, #tpu.memory_space<vmem>>, vector<2700x512xbf16>
    %cst = arith.constant dense<0.000000e+00> : vector<16x512xf32>
    %3 = tpu.matmul %1, %2, %cst {dimension_numbers = #tpu.dot_dimension_numbers<[1], [0], [0], [1], [0, 0, 1, 1], [], []>} : vector<16x2700xbf16>, vector<2700x512xbf16>, vector<16x512xf32> -> vector<16x512xf32>
    %c0_3 = arith.constant 0 : index
    %c0_4 = arith.constant 0 : index
    %4 = vector.load %arg3[%c0_3, %c0_4] : memref<1x512xf32, #tpu.memory_space<vmem>>, vector<1x512xf32>
    %5 = vector.broadcast %4 : vector<1x512xf32> to vector<16x512xf32>
    %6 = arith.addf %3, %5 : vector<16x512xf32>
    %cst_5 = arith.constant 0.000000e+00 : f32
    %7 = vector.broadcast %cst_5 : f32 to vector<16x512xf32>
    %8 = arith.maximumf %6, %7 : vector<16x512xf32>
    %9 = arith.truncf %8 : vector<16x512xf32> to vector<16x512xbf16>
    %c0_6 = arith.constant 0 : index
    %c0_7 = arith.constant 0 : index
    %10 = vector.load %arg4[%c0_6, %c0_7] : memref<512x128xbf16, #tpu.memory_space<vmem>>, vector<512x128xbf16>
    %cst_8 = arith.constant dense<0.000000e+00> : vector<16x128xf32>
    %11 = tpu.matmul %9, %10, %cst_8 {dimension_numbers = #tpu.dot_dimension_numbers<[1], [0], [0], [1], [0, 0, 1, 1], [], []>} : vector<16x512xbf16>, vector<512x128xbf16>, vector<16x128xf32> -> vector<16x128xf32>
    %c0_9 = arith.constant 0 : index
    %c0_10 = arith.constant 0 : index
    %12 = vector.load %arg5[%c0_9, %c0_10] : memref<1x128xf32, #tpu.memory_space<vmem>>, vector<1x128xf32>
    %13 = vector.broadcast %12 : vector<1x128xf32> to vector<16x128xf32>
    %14 = arith.addf %11, %13 : vector<16x128xf32>
    %cst_11 = arith.constant 0.000000e+00 : f32
    %15 = vector.broadcast %cst_11 : f32 to vector<16x128xf32>
    %16 = arith.maximumf %14, %15 : vector<16x128xf32>
    %17 = arith.truncf %16 : vector<16x128xf32> to vector<16x128xbf16>
    %c0_12 = arith.constant 0 : index
    %c0_13 = arith.constant 0 : index
    %18 = vector.load %arg6[%c0_12, %c0_13] : memref<128x128xbf16, #tpu.memory_space<vmem>>, vector<128x128xbf16>
    %cst_14 = arith.constant dense<0.000000e+00> : vector<16x128xf32>
    %19 = tpu.matmul %17, %18, %cst_14 {dimension_numbers = #tpu.dot_dimension_numbers<[1], [0], [0], [1], [0, 0, 1, 1], [], []>} : vector<16x128xbf16>, vector<128x128xbf16>, vector<16x128xf32> -> vector<16x128xf32>
    %c0_15 = arith.constant 0 : index
    %c0_16 = arith.constant 0 : index
    %20 = vector.load %arg7[%c0_15, %c0_16] : memref<1x128xf32, #tpu.memory_space<vmem>>, vector<1x128xf32>
    %21 = vector.broadcast %20 : vector<1x128xf32> to vector<16x128xf32>
    %22 = arith.addf %19, %21 : vector<16x128xf32>
    %23 = arith.truncf %22 : vector<16x128xf32> to vector<16x128xbf16>
    %c0_17 = arith.constant 0 : index
    %c0_18 = arith.constant 0 : index
    %24 = vector.load %arg8[%c0_17, %c0_18] : memref<16x128xbf16, #tpu.memory_space<vmem>>, vector<16x128xbf16>
    tpu.vector_store %arg8[%c0_17, %c0_18], %23 {strides = array<i32>} : memref<16x128xbf16, #tpu.memory_space<vmem>>, vector<16x128xbf16>,
    return
  }
  func.func @transform_0(%arg0: i32) -> (i32, i32) {
    %c0_i32 = arith.constant 0 : i32
    %c0_i32_0 = arith.constant 0 : i32
    return %arg0, %c0_i32 : i32, i32
  }
  func.func @transform_1(%arg0: i32) -> (i32, i32) {
    %c0_i32 = arith.constant 0 : i32
    %c0_i32_0 = arith.constant 0 : i32
    %c0_i32_1 = arith.constant 0 : i32
    return %c0_i32, %c0_i32_0 : i32, i32
  }
  func.func @transform_2(%arg0: i32) -> (i32, i32) {
    %c0_i32 = arith.constant 0 : i32
    %c0_i32_0 = arith.constant 0 : i32
    %c0_i32_1 = arith.constant 0 : i32
    return %c0_i32, %c0_i32_0 : i32, i32
  }
  func.func @transform_3(%arg0: i32) -> (i32, i32) {
    %c0_i32 = arith.constant 0 : i32
    %c0_i32_0 = arith.constant 0 : i32
    %c0_i32_1 = arith.constant 0 : i32
    return %c0_i32, %c0_i32_0 : i32, i32
  }
  func.func @transform_4(%arg0: i32) -> (i32, i32) {
    %c0_i32 = arith.constant 0 : i32
    %c0_i32_0 = arith.constant 0 : i32
    %c0_i32_1 = arith.constant 0 : i32
    return %c0_i32, %c0_i32_0 : i32, i32
  }
  func.func @transform_5(%arg0: i32) -> (i32, i32) {
    %c0_i32 = arith.constant 0 : i32
    %c0_i32_0 = arith.constant 0 : i32
    %c0_i32_1 = arith.constant 0 : i32
    return %c0_i32, %c0_i32_0 : i32, i32
  }
  func.func @transform_6(%arg0: i32) -> (i32, i32) {
    %c0_i32 = arith.constant 0 : i32
    %c0_i32_0 = arith.constant 0 : i32
    %c0_i32_1 = arith.constant 0 : i32
    return %c0_i32, %c0_i32_0 : i32, i32
  }
  func.func @transform_7(%arg0: i32) -> (i32, i32) {
    %c0_i32 = arith.constant 0 : i32
    %c0_i32_0 = arith.constant 0 : i32
    return %arg0, %c0_i32 : i32, i32
  }
}

</mosaic_0001>

<bundles_post_ra>
// kernel: tpu_custom_call.1
= control target key start
LH: loop header
LB: loop body
LE: loop exit
PB: predicated region body
PF: predicated region fallthrough
CT: control target
= control target key end

     0   :  { %12 = vsyncpa [#allocation3], 0  ;;  %s8047_s0 = inlined_call_operand.hbm [shape: f32[16,2700], index: 0, kind: input, shape index: {}]   ;;  %s8048_s1 = inlined_call_operand.hbm [shape: bf16[2700,512], index: 1, kind: input, shape index: {}]   ;;  %s8049_s2 = inlined_call_operand.hbm [shape: f32[1,512], index: 2, kind: input, shape index: {}]   ;;  %s8050_s3 = inlined_call_operand.hbm [shape: bf16[512,128], index: 3, kind: input, shape index: {}]   ;;  %s8051_s4 = inlined_call_operand.hbm [shape: f32[1,128], index: 4, kind: input, shape index: {}]   ;;  %s8052_s5 = inlined_call_operand.hbm [shape: bf16[128,128], index: 5, kind: input, shape index: {}]   ;;  %s8053_s6 = inlined_call_operand.hbm [shape: f32[1,128], index: 6, kind: input, shape index: {}]   ;;  %s8054_s7 = inlined_call_operand.hbm [shape: bf16[16,128], index: 7, kind: output, shape index: {}]  }
   0x1   :  { %13 = vsyncpa [#allocation6], 0 }
   0x2   :  { %14 = vsyncpa [#allocation9], 0 }
   0x3   :  { %15 = vsyncpa [#allocation12], 0 }
   0x4   :  { %16 = vsyncpa [#allocation4], 0  ;;  %s7870_s24 = smov [#allocation5]   ;;  %s7684_s28 = scalar_lea.hbm %s8048_s1, 86528 }
   0x5   :  { %s34_s25 = sshll.u32 %s7870_s24, 4  ;;  %p7685_p0 = scmp.ne.s32.totalorder %s8048_s1, %s7684_s28  ;;  %s35_s25 = int_to_ptr.vmem [resolvable:$true] %s34_s25 }
   0x6   :  { %p7688_p1 = scmp.lt.u32.totalorder %s7684_s28, %s8048_s1 }
   0x8   :  { %p7690_p2 = pnand %p7688_p1, %p7685_p0 }
   0xa   :  { %7693 = shalt.err (!%p7690_p2)
}
   0xb   :  { %s7694_s10 = scalar_lea.vmem %s35_s25, 86528  ;;  %p7699_p4 = scmp.lt.s32.totalorder %s35_s25, %s35_s25 }
   0xc   :  { %p7695_p3 = scmp.ne.s32.totalorder %s35_s25, %s7694_s10  ;;  %p7700_p5 = scmp.lt.s32.totalorder %s7694_s10, %s7694_s10 }
   0xe   :  { %p7701_p6 = por %p7700_p5, %p7699_p4 }
  0x10   :  { %p7702_p7 = pnand %p7701_p6, %p7695_p3 }
  0x12   :  { %7705 = shalt.err (!%p7702_p7)
}
  0x13   :  { %s7871_s11 = smov 256   ;;  %s7872_s12 = smov 16  }
  0x14   :  { %40 = dma.hbm_to_vmem [thread:$0]  %s8048_s1, 86528, %s35_s25, [#allocation6], %s7871_s11, %s7871_s11, %s7872_s12  }
  0x15   :  { %s7873_s15 = smov [#allocation8]   ;;  %s7706_s19 = scalar_lea.hbm %s8050_s3, 4096 }
  0x16   :  { %s56_s16 = sshll.u32 %s7873_s15, 4  ;;  %p7707_p8 = scmp.ne.s32.totalorder %s8050_s3, %s7706_s19  ;;  %s57_s16 = int_to_ptr.vmem [resolvable:$true] %s56_s16 }
  0x17   :  { %p7710_p9 = scmp.lt.u32.totalorder %s7706_s19, %s8050_s3 }
  0x19   :  { %p7712_p10 = pnand %p7710_p9, %p7707_p8 }
  0x1b   :  { %7715 = shalt.err (!%p7712_p10)
}
  0x1c   :  { %s7716_s24 = scalar_lea.vmem %s57_s16, 4096  ;;  %p7721_p12 = scmp.lt.s32.totalorder %s57_s16, %s57_s16 }
  0x1d   :  { %p7717_p11 = scmp.ne.s32.totalorder %s57_s16, %s7716_s24  ;;  %p7722_p13 = scmp.lt.s32.totalorder %s7716_s24, %s7716_s24 }
  0x1f   :  { %p7723_p0 = por %p7722_p13, %p7721_p12 }
  0x21   :  { %p7724_p1 = pnand %p7723_p0, %p7717_p11 }
  0x23   :  { %7727 = shalt.err (!%p7724_p1)
}
  0x24   :  { %s7874_s1 = smov 64   ;;  %s7875_s25 = smov 4  }
  0x25   :  { %62 = dma.hbm_to_vmem [thread:$0]  %s8050_s3, 4096, %s57_s16, [#allocation9], %s7874_s1, %s7874_s1, %s7875_s25  }
  0x26   :  { %s7876_s28 = smov [#allocation11]   ;;  %s7877_s30 = smov [#allocation2]  }
  0x27   :  { %s78_s29 = sshll.u32 %s7876_s28, 4  ;;  %s22_s8 = sshll.u32 %s7877_s30, 4  ;;  %s79_s29 = int_to_ptr.vmem [resolvable:$true] %s78_s29  ;;  %s7953_s8 = int_to_ptr.vmem [resolvable:$true] %s22_s8 }
  0x28   :  { %s7728_s11 = scalar_lea.hbm %s8052_s5, 1024 }
  0x29   :  { %p7729_p2 = scmp.ne.s32.totalorder %s8052_s5, %s7728_s11  ;;  %p7732_p3 = scmp.lt.u32.totalorder %s7728_s11, %s8052_s5 }
  0x2b   :  { %p7734_p4 = pnand %p7732_p3, %p7729_p2 }
  0x2d   :  { %7737 = shalt.err (!%p7734_p4)
}
  0x2e   :  { %s7738_s3 = scalar_lea.vmem %s79_s29, 1024  ;;  %p7743_p6 = scmp.lt.s32.totalorder %s79_s29, %s79_s29 }
  0x2f   :  { %p7739_p5 = scmp.ne.s32.totalorder %s79_s29, %s7738_s3  ;;  %p7744_p7 = scmp.lt.s32.totalorder %s7738_s3, %s7738_s3 }
  0x31   :  { %p7745_p8 = por %p7744_p7, %p7743_p6 }
  0x33   :  { %p7746_p9 = pnand %p7745_p8, %p7739_p5 }
  0x35   :  { %7749 = shalt.err (!%p7746_p9)
}
  0x36   :  { %84 = dma.hbm_to_vmem [thread:$0]  %s8052_s5, 1024, %s79_s29, [#allocation12], %s7874_s1, %s7874_s1, %s7875_s25  }
  0x37   :  { %s7750_s20 = scalar_lea.hbm %s8047_s0, 5632 }
  0x38   :  { %p7751_p10 = scmp.ne.s32.totalorder %s8047_s0, %s7750_s20  ;;  %p7754_p11 = scmp.lt.u32.totalorder %s7750_s20, %s8047_s0 }
  0x3a   :  { %p7756_p12 = pnand %p7754_p11, %p7751_p10 }
  0x3c   :  { %7759 = shalt.err (!%p7756_p12)
}
  0x3d   :  { %s7760_s26 = scalar_lea.vmem %s7953_s8, 5632  ;;  %p7765_p0 = scmp.lt.s32.totalorder %s7953_s8, %s7953_s8 }
  0x3e   :  { %p7761_p13 = scmp.ne.s32.totalorder %s7953_s8, %s7760_s26  ;;  %p7766_p1 = scmp.lt.s32.totalorder %s7760_s26, %s7760_s26 }
  0x40   :  { %p7767_p2 = por %p7766_p1, %p7765_p0 }
  0x42   :  { %p7768_p3 = pnand %p7767_p2, %p7761_p13 }
  0x44   :  { %7771 = shalt.err (!%p7768_p3)
}
  0x45   :  { %s7878_s5 = smov 2816   ;;  %s7879_s27 = smov 176  }
  0x46   :  { %28 = dma.hbm_to_vmem [thread:$0]  %s8047_s0, 5632, %s7953_s8, [#allocation3], %s7878_s5, %s7878_s5, %s7879_s27  }
  0x47   :  { %s7880_s30 = smov [#allocation7]   ;;  %s7881_s10 = smov [#allocation10]  }
  0x48   :  { %s47_s9 = sshll.u32 %s7880_s30, 4  ;;  %s69_s11 = sshll.u32 %s7881_s10, 4  ;;  %s48_s9 = int_to_ptr.vmem [resolvable:$true] %s47_s9  ;;  %s70_s11 = int_to_ptr.vmem [resolvable:$true] %s69_s11 }
  0x49   :  { %s7772_s14 = scalar_lea.hbm %s8049_s2, 64 }
  0x4a   :  { %p7773_p4 = scmp.ne.s32.totalorder %s8049_s2, %s7772_s14  ;;  %p7776_p5 = scmp.lt.u32.totalorder %s7772_s14, %s8049_s2 }
  0x4c   :  { %p7778_p6 = pnand %p7776_p5, %p7773_p4 }
  0x4e   :  { %7781 = shalt.err (!%p7778_p6)
}
  0x4f   :  { %s7782_s0 = scalar_lea.vmem %s48_s9, 64  ;;  %p7787_p8 = scmp.lt.s32.totalorder %s48_s9, %s48_s9 }
  0x50   :  { %p7783_p7 = scmp.ne.s32.totalorder %s48_s9, %s7782_s0  ;;  %p7788_p9 = scmp.lt.s32.totalorder %s7782_s0, %s7782_s0 }
  0x52   :  { %p7789_p10 = por %p7788_p9, %p7787_p8 }
  0x54   :  { %p7790_p11 = pnand %p7789_p10, %p7783_p7 }
  0x56   :  { %7793 = shalt.err (!%p7790_p11)
}
  0x57   :  { %50 = dma.hbm_to_vmem [thread:$0]  %s8049_s2, 64, %s48_s9, [#allocation6]  }
  0x58   :  { %s7794_s21 = scalar_lea.hbm %s8051_s4, 16 }
  0x59   :  { %p7795_p12 = scmp.ne.s32.totalorder %s8051_s4, %s7794_s21  ;;  %p7798_p13 = scmp.lt.u32.totalorder %s7794_s21, %s8051_s4 }
  0x5b   :  { %p7800_p0 = pnand %p7798_p13, %p7795_p12 }
  0x5d   :  { %7803 = shalt.err (!%p7800_p0)
}
  0x5e   :  { %s7804_s5 = scalar_lea.vmem %s70_s11, 16  ;;  %s7808_s27 = scalar_lea.vmem %s70_s11, 32 }
  0x5f   :  { %p7805_p1 = scmp.ne.s32.totalorder %s70_s11, %s7804_s5  ;;  %p7809_p2 = scmp.lt.s32.totalorder %s70_s11, %s70_s11 }
  0x60   :  { %p7810_p3 = scmp.lt.s32.totalorder %s7808_s27, %s7804_s5 }
  0x62   :  { %p7811_p4 = por %p7810_p3, %p7809_p2 }
  0x64   :  { %p7812_p5 = pnand %p7811_p4, %p7805_p1 }
  0x66   :  { %7815 = shalt.err (!%p7812_p5)
}
  0x67   :  { %72 = dma.hbm_to_vmem [thread:$0]  %s8051_s4, 16, %s70_s11, [#allocation9]  }
  0x68   :  { %s7882_s29 = smov [#allocation13]   ;;  %s7816_s12 = scalar_lea.hbm %s8053_s6, 16 }
  0x69   :  { %s91_s30 = sshll.u32 %s7882_s29, 4  ;;  %p7817_p6 = scmp.ne.s32.totalorder %s8053_s6, %s7816_s12  ;;  %s92_s30 = int_to_ptr.vmem [resolvable:$true] %s91_s30 }
  0x6a   :  { %p7820_p7 = scmp.lt.u32.totalorder %s7816_s12, %s8053_s6 }
  0x6c   :  { %p7822_p8 = pnand %p7820_p7, %p7817_p6 }
  0x6e   :  { %7825 = shalt.err (!%p7822_p8)
}
  0x6f   :  { %s7826_s16 = scalar_lea.vmem %s92_s30, 16  ;;  %s7830_s4 = scalar_lea.vmem %s92_s30, 32 }
  0x70   :  { %p7827_p9 = scmp.ne.s32.totalorder %s92_s30, %s7826_s16  ;;  %p7831_p10 = scmp.lt.s32.totalorder %s92_s30, %s92_s30 }
  0x71   :  { %p7832_p11 = scmp.lt.s32.totalorder %s7830_s4, %s7826_s16 }
  0x73   :  { %p7833_p12 = por %p7832_p11, %p7831_p10 }
  0x75   :  { %p7834_p13 = pnand %p7833_p12, %p7827_p9 }
  0x77   :  { %7837 = shalt.err (!%p7834_p13)
}
  0x78   :  { %94 = dma.hbm_to_vmem [thread:$0]  %s8053_s6, 16, %s92_s30, [#allocation12]  }
  0x79   :  { %7860 = dma.done.wait [#allocation3], 5632  }
  0x7a   :  { %7861 = vsyncadd [#allocation3], 4294961664 }
  0x7b   :  { %7862 = dma.done.wait [#allocation6], 86592  }
  0x7c   :  { %7863 = vsyncadd [#allocation6], 4294880704 }
  0x7d   :  { %7864 = dma.done.wait [#allocation9], 4112  }
  0x7e   :  { %7865 = vsyncadd [#allocation9], 4294963184 }
  0x7f   :  { %7866 = dma.done.wait [#allocation12], 1040  }
  0x80   :  { %7867 = vsyncadd [#allocation12], 4294966256  ;;  %v6630_v0 = vld [vmem:[#allocation5 + $0x4] ss:$16 sps:$4 sm:$0xff]   ;;  %v6632_v1 = vld [vmem:[#allocation5 + $0xc] ss:$16 sps:$4 sm:$0xff]  }
  0x81   :  { %4274 = vmatprep.subr.bf16.mxu0 %v6630_v0  ;;  %v6634_v2 = vld [vmem:[#allocation5] ss:$16 sps:$4 sm:$0xff]   ;;  %v6635_v3 = vld [vmem:[#allocation5 + $0x8] ss:$16 sps:$4 sm:$0xff]   ;;  %4747 = vmatprep.subr.bf16.mxu1 %v6632_v1  ;;  %v6636_v4 = vld [vmem:[#allocation5 + $0x24] ss:$16 sps:$4 sm:$0xff]  }
  0x82   :  { %4275 = vmatpush1.bf16.msra.mxu0 %v6634_v2  ;;  %4748 = vmatpush1.bf16.msra.mxu1 %v6635_v3  ;;  %v6638_v5 = vld [vmem:[#allocation5 + $0x2c] ss:$16 sps:$4 sm:$0xff]   ;;  %v6640_v6 = vld [vmem:[#allocation5 + $0x20] ss:$16 sps:$4 sm:$0xff]   ;;  %v6641_v7 = vld [vmem:[#allocation5 + $0x28] ss:$16 sps:$4 sm:$0xff]  }
  0x83   :  { %4276 = vmatprep.subr.bf16.mxu0 %v6636_v4  ;;  %4749 = vmatprep.subr.bf16.mxu1 %v6638_v5  ;;  %v6642_v8 = vld [vmem:[#allocation5 + $0x44] ss:$16 sps:$4 sm:$0xff]   ;;  %v6644_v9 = vld [vmem:[#allocation5 + $0x4c] ss:$16 sps:$4 sm:$0xff]   ;;  %v6646_v10 = vld [vmem:[#allocation5 + $0x40] ss:$16 sps:$4 sm:$0xff]  }
  0x84   :  { %v6647_v11 = vld [vmem:[#allocation5 + $0x48] ss:$16 sps:$4 sm:$0xff]   ;;  %v6648_v12 = vld [vmem:[#allocation5 + $0x64] ss:$16 sps:$4 sm:$0xff]   ;;  %v6650_v13 = vld [vmem:[#allocation5 + $0x6c] ss:$16 sps:$4 sm:$0xff]  }
  0x85   :  { %v6652_v14 = vld [vmem:[#allocation5 + $0x60] ss:$16 sps:$4 sm:$0xff]   ;;  %v6653_v15 = vld [vmem:[#allocation5 + $0x68] ss:$16 sps:$4 sm:$0xff]   ;;  %v6654_v16 = vld [vmem:[#allocation5 + $0x84] ss:$16 sps:$4 sm:$0xff]  }
  0x86   :  { %4277 = vmatpush1.bf16.msra.mxu0 %v6640_v6  ;;  %4750 = vmatpush1.bf16.msra.mxu1 %v6641_v7  ;;  %v6656_v17 = vld [vmem:[#allocation5 + $0x8c] ss:$16 sps:$4 sm:$0xff]   ;;  %v6658_v18 = vld [vmem:[#allocation5 + $0x80] ss:$16 sps:$4 sm:$0xff]   ;;  %v6659_v19 = vld [vmem:[#allocation5 + $0x88] ss:$16 sps:$4 sm:$0xff]  }
  0x87   :  { %4278 = vmatprep.subr.bf16.mxu0 %v6642_v8  ;;  %4751 = vmatprep.subr.bf16.mxu1 %v6644_v9  ;;  %v6660_v20 = vld [vmem:[#allocation5 + $0xa4] ss:$16 sps:$4 sm:$0xff]   ;;  %v6662_v21 = vld [vmem:[#allocation5 + $0xac] ss:$16 sps:$4 sm:$0xff]   ;;  %v6664_v22 = vld [vmem:[#allocation5 + $0xa0] ss:$16 sps:$4 sm:$0xff]  }
  0x88   :  { %v6665_v23 = vld [vmem:[#allocation5 + $0xa8] ss:$16 sps:$4 sm:$0xff]   ;;  %v6666_v24 = vld [vmem:[#allocation5 + $0xc4] ss:$16 sps:$4 sm:$0xff]   ;;  %v6668_v25 = vld [vmem:[#allocation5 + $0xcc] ss:$16 sps:$4 sm:$0xff]  }
  0x89   :  { %v6670_v26 = vld [vmem:[#allocation5 + $0xc0] ss:$16 sps:$4 sm:$0xff]   ;;  %v6671_v27 = vld [vmem:[#allocation5 + $0xc8] ss:$16 sps:$4 sm:$0xff]   ;;  %v6672_v28 = vld [vmem:[#allocation5 + $0xe4] ss:$16 sps:$4 sm:$0xff]  }
  0x8a   :  { %4279 = vmatpush1.bf16.msra.mxu0 %v6646_v10  ;;  %4752 = vmatpush1.bf16.msra.mxu1 %v6647_v11  ;;  %v6674_v29 = vld [vmem:[#allocation5 + $0xec] ss:$16 sps:$4 sm:$0xff]   ;;  %v6676_v30 = vld [vmem:[#allocation5 + $0xe0] ss:$16 sps:$4 sm:$0xff]   ;;  %v6677_v31 = vld [vmem:[#allocation5 + $0xe8] ss:$16 sps:$4 sm:$0xff]  }
  0x8b   :  { %4280 = vmatprep.subr.bf16.mxu0 %v6648_v12  ;;  %4753 = vmatprep.subr.bf16.mxu1 %v6650_v13  ;;  %v6678_v32 = vld [vmem:[#allocation5 + $0x104] ss:$16 sps:$4 sm:$0xff]   ;;  %v6680_v33 = vld [vmem:[#allocation5 + $0x10c] ss:$16 sps:$4 sm:$0xff]   ;;  %v6682_v34 = vld [vmem:[#allocation5 + $0x100] ss:$16 sps:$4 sm:$0xff]  }
  0x8c   :  { %v6683_v35 = vld [vmem:[#allocation5 + $0x108] ss:$16 sps:$4 sm:$0xff]   ;;  %v6684_v36 = vld [vmem:[#allocation5 + $0x124] ss:$16 sps:$4 sm:$0xff]   ;;  %v6686_v37 = vld [vmem:[#allocation5 + $0x12c] ss:$16 sps:$4 sm:$0xff]  }
  0x8d   :  { %v6688_v38 = vld [vmem:[#allocation5 + $0x120] ss:$16 sps:$4 sm:$0xff]   ;;  %v6689_v39 = vld [vmem:[#allocation5 + $0x128] ss:$16 sps:$4 sm:$0xff]   ;;  %v6690_v40 = vld [vmem:[#allocation5 + $0x144] ss:$16 sps:$4 sm:$0xff]  }
  0x8e   :  { %4281 = vmatpush1.bf16.msra.mxu0 %v6652_v14  ;;  %4754 = vmatpush1.bf16.msra.mxu1 %v6653_v15  ;;  %v6692_v41 = vld [vmem:[#allocation5 + $0x14c] ss:$16 sps:$4 sm:$0xff]   ;;  %v6694_v42 = vld [vmem:[#allocation5 + $0x140] ss:$16 sps:$4 sm:$0xff]   ;;  %v6695_v43 = vld [vmem:[#allocation5 + $0x148] ss:$16 sps:$4 sm:$0xff]  }
  0x8f   :  { %4282 = vmatprep.subr.bf16.mxu0 %v6654_v16  ;;  %4755 = vmatprep.subr.bf16.mxu1 %v6656_v17  ;;  %v6696_v44 = vld [vmem:[#allocation5 + $0x164] ss:$16 sps:$4 sm:$0xff]   ;;  %v6698_v45 = vld [vmem:[#allocation5 + $0x16c] ss:$16 sps:$4 sm:$0xff]   ;;  %v6700_v48 = vld [vmem:[#allocation5 + $0x160] ss:$16 sps:$4 sm:$0xff]  }
  0x90   :  { %v118_v46 = vld [vmem:[#allocation2 + $0x8] sm:$0xff]  ;;  %v140_v47 = vld [vmem:[#allocation2 + $0xb8] sm:$0xff]  ;;  %v6702_v51 = vld [vmem:[#allocation5 + $0x184] ss:$16 sps:$4 sm:$0xff]   ;;  %vm4257_vm0 = vcmask 97280   ;;  %vm4261_vm1 = vcmask 1045504  }
  0x91   :  { %v6701_v49 = vld [vmem:[#allocation5 + $0x168] ss:$16 sps:$4 sm:$0xff]   ;;  %v162_v50 = vpack.c.bf16 %v140_v47, %v118_v46  ;;  %v6704_v52 = vld [vmem:[#allocation5 + $0x18c] ss:$16 sps:$4 sm:$0xff]   ;;  %v6706_v53 = vld [vmem:[#allocation5 + $0x180] ss:$16 sps:$4 sm:$0xff]  }
  0x92   :  { %4283 = vmatpush1.bf16.msra.mxu0 %v6658_v18  ;;  %4756 = vmatpush1.bf16.msra.mxu1 %v6659_v19  ;;  %v6707_v54 = vld [vmem:[#allocation5 + $0x188] ss:$16 sps:$4 sm:$0xff]   ;;  %v6708_v55 = vld [vmem:[#allocation5 + $0x1a4] ss:$16 sps:$4 sm:$0xff]   ;;  %v6710_v56 = vld [vmem:[#allocation5 + $0x1ac] ss:$16 sps:$4 sm:$0xff]  }
  0x93   :  { %4284 = vmatprep.subr.bf16.mxu0 %v6660_v20  ;;  %4757 = vmatprep.subr.bf16.mxu1 %v6662_v21  ;;  %v6712_v57 = vld [vmem:[#allocation5 + $0x1a0] ss:$16 sps:$4 sm:$0xff]   ;;  %v6713_v58 = vld [vmem:[#allocation5 + $0x1a8] ss:$16 sps:$4 sm:$0xff]   ;;  %v6714_v59 = vld [vmem:[#allocation5 + $0x1c4] ss:$16 sps:$4 sm:$0xff]  }
  0x94   :  { %4306 = vmatprep.mubr.bf16.mxu0 %v162_v50  ;;  %4779 = vmatprep.mubr.bf16.mxu1 %v162_v50  ;;  %v6716_v60 = vld [vmem:[#allocation5 + $0x1cc] ss:$16 sps:$4 sm:$0xff]   ;;  %v6718_v61 = vld [vmem:[#allocation5 + $0x1c0] ss:$16 sps:$4 sm:$0xff]   ;;  %v6719_v62 = vld [vmem:[#allocation5 + $0x1c8] ss:$16 sps:$4 sm:$0xff]  }
  0x95   :  { %v6720_v63 = vld [vmem:[#allocation5 + $0x1e4] ss:$16 sps:$4 sm:$0xff]   ;;  %v6722_v0 = vld [vmem:[#allocation5 + $0x1ec] ss:$16 sps:$4 sm:$0xff]   ;;  %v6724_v1 = vld [vmem:[#allocation5 + $0x1e0] ss:$16 sps:$4 sm:$0xff]  }
  0x96   :  { %4285 = vmatpush1.bf16.msra.mxu0 %v6664_v22  ;;  %4758 = vmatpush1.bf16.msra.mxu1 %v6665_v23  ;;  %v6725_v2 = vld [vmem:[#allocation5 + $0x1e8] ss:$16 sps:$4 sm:$0xff]   ;;  %v6728_v3 = vld [vmem:[#allocation5 + $0x204] ss:$16 sps:$4 sm:$0xff]   ;;  %v6731_v6 = vld [vmem:[#allocation5 + $0x20c] ss:$16 sps:$4 sm:$0xff]  }
  0x97   :  { %4286 = vmatprep.subr.bf16.mxu0 %v6666_v24  ;;  %4759 = vmatprep.subr.bf16.mxu1 %v6668_v25  ;;  %v117_v4 = vld [vmem:[#allocation2] sm:$0xff]  ;;  %v139_v5 = vld [vmem:[#allocation2 + $0xb0] sm:$0xff]  ;;  %v6729_v8 = vld [vmem:[#allocation5 + $0x208] ss:$16 sps:$4 sm:$0xff]   ;;  %vm7884_vm2 = vmmov 0   ;;  %s7885_s6 = smov [#allocation14]  }
  0x98   :  { %v6726_v7 = vld [vmem:[#allocation5 + $0x200] ss:$16 sps:$4 sm:$0xff]   ;;  %v161_v9 = vpack.c.bf16 %v139_v5, %v117_v4  ;;  %v6734_v10 = vld [vmem:[#allocation5 + $0x224] ss:$16 sps:$4 sm:$0xff]   ;;  %v6737_v11 = vld [vmem:[#allocation5 + $0x22c] ss:$16 sps:$4 sm:$0xff]  }
  0x99   :  { %v6732_v12 = vld [vmem:[#allocation5 + $0x220] ss:$16 sps:$4 sm:$0xff]   ;;  %v6735_v13 = vld [vmem:[#allocation5 + $0x228] ss:$16 sps:$4 sm:$0xff]   ;;  %v6740_v14 = vld [vmem:[#allocation5 + $0x244] ss:$16 sps:$4 sm:$0xff]  }
  0x9a   :  { %4287 = vmatpush1.bf16.msra.mxu0 %v6670_v26  ;;  %4760 = vmatpush1.bf16.msra.mxu1 %v6671_v27  ;;  %v6743_v15 = vld [vmem:[#allocation5 + $0x24c] ss:$16 sps:$4 sm:$0xff]   ;;  %v6738_v16 = vld [vmem:[#allocation5 + $0x240] ss:$16 sps:$4 sm:$0xff]   ;;  %v6741_v17 = vld [vmem:[#allocation5 + $0x248] ss:$16 sps:$4 sm:$0xff]  }
  0x9b   :  { %4288 = vmatprep.subr.bf16.mxu0 %v6672_v28  ;;  %4761 = vmatprep.subr.bf16.mxu1 %v6674_v29  ;;  %v6746_v18 = vld [vmem:[#allocation5 + $0x264] ss:$16 sps:$4 sm:$0xff]   ;;  %v6749_v19 = vld [vmem:[#allocation5 + $0x26c] ss:$16 sps:$4 sm:$0xff]   ;;  %v6744_v20 = vld [vmem:[#allocation5 + $0x260] ss:$16 sps:$4 sm:$0xff]  }
  0x9c   :  { %v6747_v21 = vld [vmem:[#allocation5 + $0x268] ss:$16 sps:$4 sm:$0xff]   ;;  %v6752_v22 = vld [vmem:[#allocation5 + $0x284] ss:$16 sps:$4 sm:$0xff]   ;;  %v6755_v23 = vld [vmem:[#allocation5 + $0x28c] ss:$16 sps:$4 sm:$0xff]  }
  0x9d   :  { %v6750_v24 = vld [vmem:[#allocation5 + $0x280] ss:$16 sps:$4 sm:$0xff]   ;;  %v6753_v25 = vld [vmem:[#allocation5 + $0x288] ss:$16 sps:$4 sm:$0xff]   ;;  %v6758_v26 = vld [vmem:[#allocation5 + $0x2a4] ss:$16 sps:$4 sm:$0xff]  }
  0x9e   :  { %4289 = vmatpush1.bf16.msra.mxu0 %v6676_v30  ;;  %4762 = vmatpush1.bf16.msra.mxu1 %v6677_v31  ;;  %v6761_v27 = vld [vmem:[#allocation5 + $0x2ac] ss:$16 sps:$4 sm:$0xff]   ;;  %v6756_v28 = vld [vmem:[#allocation5 + $0x2a0] ss:$16 sps:$4 sm:$0xff]   ;;  %v6759_v29 = vld [vmem:[#allocation5 + $0x2a8] ss:$16 sps:$4 sm:$0xff]  }
  0x9f   :  { %4290 = vmatprep.subr.bf16.mxu0 %v6678_v32  ;;  %4763 = vmatprep.subr.bf16.mxu1 %v6680_v33  ;;  %v6764_v30 = vld [vmem:[#allocation5 + $0x2c4] ss:$16 sps:$4 sm:$0xff]   ;;  %v6767_v31 = vld [vmem:[#allocation5 + $0x2cc] ss:$16 sps:$4 sm:$0xff]   ;;  %v6780_v47 = vld [vmem:[#allocation5 + $0x320] ss:$16 sps:$4 sm:$0xff]  }
  0xa0   :  { %v120_v32 = vld [vmem:[#allocation2 + $0x18] sm:$0xff]  ;;  %v142_v33 = vld [vmem:[#allocation2 + $0xc8] sm:$0xff]  ;;  %v6818_v5 = vld [vmem:[#allocation5 + $0x3e4] ss:$16 sps:$4 sm:$0xff]   ;;  %s5707_s0 = sshll.u32 %s7885_s6, 4  ;;  %s5708_s0 = int_to_ptr.vmem [resolvable:$true] %s5707_s0 }
  0xa1   :  { %v6785_v46 = vld [vmem:[#allocation5 + $0x32c] ss:$16 sps:$4 sm:$0xff]   ;;  %v6813_v4 = vld [vmem:[#allocation5 + $0x3c8] ss:$16 sps:$4 sm:$0xff]   ;;  %s7838_s8 = scalar_lea.vmem %s5708_s0, 128  ;;  %p7843_p1 = scmp.lt.s32.totalorder %s5708_s0, %s5708_s0 }
  0xa2   :  { %4291 = vmatpush1.bf16.msra.mxu0 %v6682_v34  ;;  %4764 = vmatpush1.bf16.msra.mxu1 %v6683_v35  ;;  %v6762_v34 = vld [vmem:[#allocation5 + $0x2c0] ss:$16 sps:$4 sm:$0xff]   ;;  %v6765_v35 = vld [vmem:[#allocation5 + $0x2c8] ss:$16 sps:$4 sm:$0xff]   ;;  %v6791_v50 = vld [vmem:[#allocation5 + $0x34c] ss:$16 sps:$4 sm:$0xff]   ;;  %p7839_p0 = scmp.ne.s32.totalorder %s5708_s0, %s7838_s8  ;;  %p7844_p2 = scmp.lt.s32.totalorder %s7838_s8, %s7838_s8 }
  0xa3   :  { %4292 = vmatprep.subr.bf16.mxu0 %v6684_v36  ;;  %4765 = vmatprep.subr.bf16.mxu1 %v6686_v37  ;;  %v164_v36 = vpack.c.bf16 %v142_v33, %v120_v32  ;;  %v6770_v37 = vld [vmem:[#allocation5 + $0x2e4] ss:$16 sps:$4 sm:$0xff]   ;;  %v6851_v32 = vld [vmem:[#allocation5 + $0x48c] ss:$16 sps:$4 sm:$0xff]   ;;  %v6846_v33 = vld [vmem:[#allocation5 + $0x480] ss:$16 sps:$4 sm:$0xff]  }
  0xa4   :  { %p7845_p3 = por %p7844_p2, %p7843_p1 }
  0xa6   :  { %4293 = vmatpush1.bf16.msra.mxu0 %v6688_v38  ;;  %4766 = vmatpush1.bf16.msra.mxu1 %v6689_v39  ;;  %v6773_v38 = vld [vmem:[#allocation5 + $0x2ec] ss:$16 sps:$4 sm:$0xff]   ;;  %v6768_v39 = vld [vmem:[#allocation5 + $0x2e0] ss:$16 sps:$4 sm:$0xff]   ;;  %p7846_p4 = pnand %p7845_p3, %p7839_p0 }
  0xa7   :  { %4294 = vmatprep.subr.bf16.mxu0 %v6690_v40  ;;  %4767 = vmatprep.subr.bf16.mxu1 %v6692_v41  ;;  %v6771_v40 = vld [vmem:[#allocation5 + $0x2e8] ss:$16 sps:$4 sm:$0xff]   ;;  %v6776_v41 = vld [vmem:[#allocation5 + $0x304] ss:$16 sps:$4 sm:$0xff]  }
  0xaa   :  { %4295 = vmatpush1.bf16.msra.mxu0 %v6694_v42  ;;  %4768 = vmatpush1.bf16.msra.mxu1 %v6695_v43  ;;  %v6779_v42 = vld [vmem:[#allocation5 + $0x30c] ss:$16 sps:$4 sm:$0xff]   ;;  %v6774_v43 = vld [vmem:[#allocation5 + $0x300] ss:$16 sps:$4 sm:$0xff]  }
  0xab   :  { %4296 = vmatprep.subr.bf16.mxu0 %v6696_v44  ;;  %4769 = vmatprep.subr.bf16.mxu1 %v6698_v45  ;;  %v6777_v44 = vld [vmem:[#allocation5 + $0x308] ss:$16 sps:$4 sm:$0xff]   ;;  %v6782_v45 = vld [vmem:[#allocation5 + $0x324] ss:$16 sps:$4 sm:$0xff]  }
  0xae   :  { %4297 = vmatpush1.bf16.msra.mxu0 %v6700_v48  ;;  %4770 = vmatpush1.bf16.msra.mxu1 %v6701_v49  ;;  %v6783_v48 = vld [vmem:[#allocation5 + $0x328] ss:$16 sps:$4 sm:$0xff]   ;;  %v6788_v49 = vld [vmem:[#allocation5 + $0x344] ss:$16 sps:$4 sm:$0xff]  }
  0xaf   :  { %4298 = vmatprep.subr.bf16.mxu0 %v6702_v51  ;;  %4771 = vmatprep.subr.bf16.mxu1 %v6704_v52  ;;  %v6786_v51 = vld [vmem:[#allocation5 + $0x340] ss:$16 sps:$4 sm:$0xff]   ;;  %v6789_v52 = vld [vmem:[#allocation5 + $0x348] ss:$16 sps:$4 sm:$0xff]  }
  0xb2   :  { %4299 = vmatpush1.bf16.msra.mxu0 %v6706_v53  ;;  %4772 = vmatpush1.bf16.msra.mxu1 %v6707_v54  ;;  %v6794_v53 = vld [vmem:[#allocation5 + $0x364] ss:$16 sps:$4 sm:$0xff]   ;;  %v6797_v54 = vld [vmem:[#allocation5 + $0x36c] ss:$16 sps:$4 sm:$0xff]  }
  0xb3   :  { %4300 = vmatprep.subr.bf16.mxu0 %v6708_v55  ;;  %4773 = vmatprep.subr.bf16.mxu1 %v6710_v56  ;;  %v6792_v55 = vld [vmem:[#allocation5 + $0x360] ss:$16 sps:$4 sm:$0xff]   ;;  %v6795_v56 = vld [vmem:[#allocation5 + $0x368] ss:$16 sps:$4 sm:$0xff]  }
  0xb6   :  { %4301 = vmatpush1.bf16.msra.mxu0 %v6712_v57  ;;  %4774 = vmatpush1.bf16.msra.mxu1 %v6713_v58  ;;  %v6800_v57 = vld [vmem:[#allocation5 + $0x384] ss:$16 sps:$4 sm:$0xff]   ;;  %v6803_v58 = vld [vmem:[#allocation5 + $0x38c] ss:$16 sps:$4 sm:$0xff]  }
  0xb7   :  { %4302 = vmatprep.subr.bf16.mxu0 %v6714_v59  ;;  %4775 = vmatprep.subr.bf16.mxu1 %v6716_v60  ;;  %v6798_v59 = vld [vmem:[#allocation5 + $0x380] ss:$16 sps:$4 sm:$0xff]   ;;  %v6801_v60 = vld [vmem:[#allocation5 + $0x388] ss:$16 sps:$4 sm:$0xff]  }
  0xba   :  { %4303 = vmatpush1.bf16.msra.mxu0 %v6718_v61  ;;  %4776 = vmatpush1.bf16.msra.mxu1 %v6719_v62  ;;  %v6806_v61 = vld [vmem:[#allocation5 + $0x3a4] ss:$16 sps:$4 sm:$0xff]   ;;  %v6809_v62 = vld [vmem:[#allocation5 + $0x3ac] ss:$16 sps:$4 sm:$0xff]  }
  0xbb   :  { %4304 = vmatprep.subr.bf16.mxu0 %v6720_v63  ;;  %4777 = vmatprep.subr.bf16.mxu1 %v6722_v0  ;;  %v6804_v63 = vld [vmem:[#allocation5 + $0x3a0] ss:$16 sps:$4 sm:$0xff]   ;;  %v6807_v0 = vld [vmem:[#allocation5 + $0x3a8] ss:$16 sps:$4 sm:$0xff]  }
  0xbe   :  { %4305 = vmatpush1.bf16.msra.mxu0 %v6724_v1  ;;  %4778 = vmatpush1.bf16.msra.mxu1 %v6725_v2  ;;  %v6812_v1 = vld [vmem:[#allocation5 + $0x3c4] ss:$16 sps:$4 sm:$0xff]   ;;  %v6815_v2 = vld [vmem:[#allocation5 + $0x3cc] ss:$16 sps:$4 sm:$0xff]  }
  0xbf   :  { %4317 = vmatprep.subr.bf16.mxu0 %v6728_v3  ;;  %4790 = vmatprep.subr.bf16.mxu1 %v6731_v6  ;;  %v6810_v3 = vld [vmem:[#allocation5 + $0x3c0] ss:$16 sps:$4 sm:$0xff]   ;;  %v6821_v6 = vld [vmem:[#allocation5 + $0x3ec] ss:$16 sps:$4 sm:$0xff]  }
  0xc1   :  { %4307 = vmatmul.mubr.bf16.vlgmr.msra.gmra.mrb[0].mxu0 %v161_v9  ;;  %4780 = vmatmul.mubr.bf16.vlgmr.msra.gmra.mrb[0].mxu1 %v161_v9  ;;  %v6824_v9 = vld [vmem:[#allocation5 + $0x404] ss:$16 sps:$4 sm:$0xff]  }
  0xc2   :  { %4318 = vmatpush1.bf16.msra.mxu0 %v6726_v7  ;;  %4791 = vmatpush1.bf16.msra.mxu1 %v6729_v8  ;;  %v6816_v7 = vld [vmem:[#allocation5 + $0x3e0] ss:$16 sps:$4 sm:$0xff]   ;;  %v6819_v8 = vld [vmem:[#allocation5 + $0x3e8] ss:$16 sps:$4 sm:$0xff]  }
  0xc3   :  { %4319 = vmatprep.subr.bf16.mxu0 %v6734_v10  ;;  %4792 = vmatprep.subr.bf16.mxu1 %v6737_v11  ;;  %v119_v10 = vld [vmem:[#allocation2 + $0x10] sm:$0xff]  ;;  %v141_v11 = vld [vmem:[#allocation2 + $0xc0] sm:$0xff] }
  0xc4   :  { %4349 = vmatprep.mubr.bf16.mxu0 %v164_v36  ;;  %4822 = vmatprep.mubr.bf16.mxu1 %v164_v36  ;;  %v6857_v36 = vld [vmem:[#allocation5 + $0x4ac] ss:$16 sps:$4 sm:$0xff]  }
  0xc6   :  { %4320 = vmatpush1.bf16.msra.mxu0 %v6732_v12  ;;  %4793 = vmatpush1.bf16.msra.mxu1 %v6735_v13  ;;  %v6827_v12 = vld [vmem:[#allocation5 + $0x40c] ss:$16 sps:$4 sm:$0xff]   ;;  %v6822_v13 = vld [vmem:[#allocation5 + $0x400] ss:$16 sps:$4 sm:$0xff]  }
  0xc7   :  { %4321 = vmatprep.subr.bf16.mxu0 %v6740_v14  ;;  %4794 = vmatprep.subr.bf16.mxu1 %v6743_v15  ;;  %v6825_v14 = vld [vmem:[#allocation5 + $0x408] ss:$16 sps:$4 sm:$0xff]   ;;  %v163_v15 = vpack.c.bf16 %v141_v11, %v119_v10  ;;  %v6914_v11 = vld [vmem:[#allocation5 + $0x5e4] ss:$16 sps:$4 sm:$0xff]  }
  0xc8   :  { %v6909_v10 = vld [vmem:[#allocation5 + $0x5c8] ss:$16 sps:$4 sm:$0xff]  }
  0xca   :  { %4322 = vmatpush1.bf16.msra.mxu0 %v6738_v16  ;;  %4795 = vmatpush1.bf16.msra.mxu1 %v6741_v17  ;;  %v6830_v16 = vld [vmem:[#allocation5 + $0x424] ss:$16 sps:$4 sm:$0xff]   ;;  %v6833_v17 = vld [vmem:[#allocation5 + $0x42c] ss:$16 sps:$4 sm:$0xff]  }
  0xcb   :  { %4323 = vmatprep.subr.bf16.mxu0 %v6746_v18  ;;  %4796 = vmatprep.subr.bf16.mxu1 %v6749_v19  ;;  %v122_v18 = vld [vmem:[#allocation2 + $0x28] sm:$0xff]  ;;  %v144_v19 = vld [vmem:[#allocation2 + $0xd8] sm:$0xff] }
  0xce   :  { %4324 = vmatpush1.bf16.msra.mxu0 %v6744_v20  ;;  %4797 = vmatpush1.bf16.msra.mxu1 %v6747_v21  ;;  %v6828_v20 = vld [vmem:[#allocation5 + $0x420] ss:$16 sps:$4 sm:$0xff]   ;;  %v6831_v21 = vld [vmem:[#allocation5 + $0x428] ss:$16 sps:$4 sm:$0xff]  }
  0xcf   :  { %4325 = vmatprep.subr.bf16.mxu0 %v6752_v22  ;;  %4798 = vmatprep.subr.bf16.mxu1 %v6755_v23  ;;  %v166_v22 = vpack.c.bf16 %v144_v19, %v122_v18  ;;  %v6836_v23 = vld [vmem:[#allocation5 + $0x444] ss:$16 sps:$4 sm:$0xff]   ;;  %v6923_v18 = vld [vmem:[#allocation5 + $0x60c] ss:$16 sps:$4 sm:$0xff]   ;;  %v6918_v19 = vld [vmem:[#allocation5 + $0x600] ss:$16 sps:$4 sm:$0xff]  }
  0xd2   :  { %4326 = vmatpush1.bf16.msra.mxu0 %v6750_v24  ;;  %4799 = vmatpush1.bf16.msra.mxu1 %v6753_v25  ;;  %v6839_v24 = vld [vmem:[#allocation5 + $0x44c] ss:$16 sps:$4 sm:$0xff]   ;;  %v6834_v25 = vld [vmem:[#allocation5 + $0x440] ss:$16 sps:$4 sm:$0xff]  }
  0xd3   :  { %4327 = vmatprep.subr.bf16.mxu0 %v6758_v26  ;;  %4800 = vmatprep.subr.bf16.mxu1 %v6761_v27  ;;  %v6837_v26 = vld [vmem:[#allocation5 + $0x448] ss:$16 sps:$4 sm:$0xff]   ;;  %v6842_v27 = vld [vmem:[#allocation5 + $0x464] ss:$16 sps:$4 sm:$0xff]  }
  0xd6   :  { %4328 = vmatpush1.bf16.msra.mxu0 %v6756_v28  ;;  %4801 = vmatpush1.bf16.msra.mxu1 %v6759_v29  ;;  %v6845_v28 = vld [vmem:[#allocation5 + $0x46c] ss:$16 sps:$4 sm:$0xff]   ;;  %v6840_v29 = vld [vmem:[#allocation5 + $0x460] ss:$16 sps:$4 sm:$0xff]  }
  0xd7   :  { %4329 = vmatprep.subr.bf16.mxu0 %v6764_v30  ;;  %4802 = vmatprep.subr.bf16.mxu1 %v6767_v31  ;;  %v6843_v30 = vld [vmem:[#allocation5 + $0x468] ss:$16 sps:$4 sm:$0xff]   ;;  %v6848_v31 = vld [vmem:[#allocation5 + $0x484] ss:$16 sps:$4 sm:$0xff]  }
  0xda   :  { %4330 = vmatpush1.bf16.msra.mxu0 %v6762_v34  ;;  %4803 = vmatpush1.bf16.msra.mxu1 %v6765_v35  ;;  %v6849_v34 = vld [vmem:[#allocation5 + $0x488] ss:$16 sps:$4 sm:$0xff]   ;;  %v6854_v35 = vld [vmem:[#allocation5 + $0x4a4] ss:$16 sps:$4 sm:$0xff]  }
  0xdb   :  { %4331 = vmatprep.subr.bf16.mxu0 %v6770_v37  ;;  %4804 = vmatprep.subr.bf16.mxu1 %v6773_v38  ;;  %v6852_v37 = vld [vmem:[#allocation5 + $0x4a0] ss:$16 sps:$4 sm:$0xff]   ;;  %v6855_v38 = vld [vmem:[#allocation5 + $0x4a8] ss:$16 sps:$4 sm:$0xff]  }
  0xde   :  { %4332 = vmatpush1.bf16.msra.mxu0 %v6768_v39  ;;  %4805 = vmatpush1.bf16.msra.mxu1 %v6771_v40  ;;  %v6860_v39 = vld [vmem:[#allocation5 + $0x4c4] ss:$16 sps:$4 sm:$0xff]   ;;  %v6863_v40 = vld [vmem:[#allocation5 + $0x4cc] ss:$16 sps:$4 sm:$0xff]  }
  0xdf   :  { %4333 = vmatprep.subr.bf16.mxu0 %v6776_v41  ;;  %4806 = vmatprep.subr.bf16.mxu1 %v6779_v42  ;;  %v6858_v41 = vld [vmem:[#allocation5 + $0x4c0] ss:$16 sps:$4 sm:$0xff]   ;;  %v6861_v42 = vld [vmem:[#allocation5 + $0x4c8] ss:$16 sps:$4 sm:$0xff]  }
  0xe2   :  { %4334 = vmatpush1.bf16.msra.mxu0 %v6774_v43  ;;  %4807 = vmatpush1.bf16.msra.mxu1 %v6777_v44  ;;  %v6866_v43 = vld [vmem:[#allocation5 + $0x4e4] ss:$16 sps:$4 sm:$0xff]   ;;  %v6869_v44 = vld [vmem:[#allocation5 + $0x4ec] ss:$16 sps:$4 sm:$0xff]  }
  0xe3   :  { %4335 = vmatprep.subr.bf16.mxu0 %v6782_v45  ;;  %4808 = vmatprep.subr.bf16.mxu1 %v6785_v46  ;;  %v6864_v45 = vld [vmem:[#allocation5 + $0x4e0] ss:$16 sps:$4 sm:$0xff]   ;;  %v6867_v46 = vld [vmem:[#allocation5 + $0x4e8] ss:$16 sps:$4 sm:$0xff]  }
  0xe6   :  { %4336 = vmatpush1.bf16.msra.mxu0 %v6780_v47  ;;  %4809 = vmatpush1.bf16.msra.mxu1 %v6783_v48  ;;  %v6872_v47 = vld [vmem:[#allocation5 + $0x504] ss:$16 sps:$4 sm:$0xff]   ;;  %v6875_v48 = vld [vmem:[#allocation5 + $0x50c] ss:$16 sps:$4 sm:$0xff]  }
  0xe7   :  { %4337 = vmatprep.subr.bf16.mxu0 %v6788_v49  ;;  %4810 = vmatprep.subr.bf16.mxu1 %v6791_v50  ;;  %v6870_v49 = vld [vmem:[#allocation5 + $0x500] ss:$16 sps:$4 sm:$0xff]   ;;  %v6873_v50 = vld [vmem:[#allocation5 + $0x508] ss:$16 sps:$4 sm:$0xff]  }
  0xea   :  { %4338 = vmatpush1.bf16.msra.mxu0 %v6786_v51  ;;  %4811 = vmatpush1.bf16.msra.mxu1 %v6789_v52  ;;  %v6878_v51 = vld [vmem:[#allocation5 + $0x524] ss:$16 sps:$4 sm:$0xff]   ;;  %v6881_v52 = vld [vmem:[#allocation5 + $0x52c] ss:$16 sps:$4 sm:$0xff]  }
  0xeb   :  { %4339 = vmatprep.subr.bf16.mxu0 %v6794_v53  ;;  %4812 = vmatprep.subr.bf16.mxu1 %v6797_v54  ;;  %v6876_v53 = vld [vmem:[#allocation5 + $0x520] ss:$16 sps:$4 sm:$0xff]   ;;  %v6879_v54 = vld [vmem:[#allocation5 + $0x528] ss:$16 sps:$4 sm:$0xff]  }
  0xee   :  { %4340 = vmatpush1.bf16.msra.mxu0 %v6792_v55  ;;  %4813 = vmatpush1.bf16.msra.mxu1 %v6795_v56  ;;  %v6884_v55 = vld [vmem:[#allocation5 + $0x544] ss:$16 sps:$4 sm:$0xff]   ;;  %v6887_v56 = vld [vmem:[#allocation5 + $0x54c] ss:$16 sps:$4 sm:$0xff]  }
  0xef   :  { %4341 = vmatprep.subr.bf16.mxu0 %v6800_v57  ;;  %4814 = vmatprep.subr.bf16.mxu1 %v6803_v58  ;;  %v6882_v57 = vld [vmem:[#allocation5 + $0x540] ss:$16 sps:$4 sm:$0xff]   ;;  %v6885_v58 = vld [vmem:[#allocation5 + $0x548] ss:$16 sps:$4 sm:$0xff]  }
  0xf2   :  { %4342 = vmatpush1.bf16.msra.mxu0 %v6798_v59  ;;  %4815 = vmatpush1.bf16.msra.mxu1 %v6801_v60  ;;  %v6890_v59 = vld [vmem:[#allocation5 + $0x564] ss:$16 sps:$4 sm:$0xff]   ;;  %v6893_v60 = vld [vmem:[#allocation5 + $0x56c] ss:$16 sps:$4 sm:$0xff]  }
  0xf3   :  { %4343 = vmatprep.subr.bf16.mxu0 %v6806_v61  ;;  %4816 = vmatprep.subr.bf16.mxu1 %v6809_v62  ;;  %v6888_v61 = vld [vmem:[#allocation5 + $0x560] ss:$16 sps:$4 sm:$0xff]   ;;  %v6891_v62 = vld [vmem:[#allocation5 + $0x568] ss:$16 sps:$4 sm:$0xff]  }
  0xf6   :  { %4344 = vmatpush1.bf16.msra.mxu0 %v6804_v63  ;;  %4817 = vmatpush1.bf16.msra.mxu1 %v6807_v0  ;;  %v6896_v63 = vld [vmem:[#allocation5 + $0x584] ss:$16 sps:$4 sm:$0xff]   ;;  %v6899_v0 = vld [vmem:[#allocation5 + $0x58c] ss:$16 sps:$4 sm:$0xff]  }
  0xf7   :  { %4345 = vmatprep.subr.bf16.mxu0 %v6812_v1  ;;  %4818 = vmatprep.subr.bf16.mxu1 %v6815_v2  ;;  %v6894_v1 = vld [vmem:[#allocation5 + $0x580] ss:$16 sps:$4 sm:$0xff]   ;;  %v6897_v2 = vld [vmem:[#allocation5 + $0x588] ss:$16 sps:$4 sm:$0xff]  }
  0xfa   :  { %4346 = vmatpush1.bf16.msra.mxu0 %v6810_v3  ;;  %4819 = vmatpush1.bf16.msra.mxu1 %v6813_v4  ;;  %v6902_v3 = vld [vmem:[#allocation5 + $0x5a4] ss:$16 sps:$4 sm:$0xff]   ;;  %v6905_v4 = vld [vmem:[#allocation5 + $0x5ac] ss:$16 sps:$4 sm:$0xff]  }
  0xfb   :  { %4347 = vmatprep.subr.bf16.mxu0 %v6818_v5  ;;  %4820 = vmatprep.subr.bf16.mxu1 %v6821_v6  ;;  %v6900_v5 = vld [vmem:[#allocation5 + $0x5a0] ss:$16 sps:$4 sm:$0xff]   ;;  %v6903_v6 = vld [vmem:[#allocation5 + $0x5a8] ss:$16 sps:$4 sm:$0xff]  }
  0xfe   :  { %4348 = vmatpush1.bf16.msra.mxu0 %v6816_v7  ;;  %4821 = vmatpush1.bf16.msra.mxu1 %v6819_v8  ;;  %v6908_v7 = vld [vmem:[#allocation5 + $0x5c4] ss:$16 sps:$4 sm:$0xff]   ;;  %v6911_v8 = vld [vmem:[#allocation5 + $0x5cc] ss:$16 sps:$4 sm:$0xff]  }
  0xff   :  { %4360 = vmatprep.subr.bf16.mxu0 %v6824_v9  ;;  %4833 = vmatprep.subr.bf16.mxu1 %v6827_v12  ;;  %v6906_v9 = vld [vmem:[#allocation5 + $0x5c0] ss:$16 sps:$4 sm:$0xff]   ;;  %v6917_v12 = vld [vmem:[#allocation5 + $0x5ec] ss:$16 sps:$4 sm:$0xff]  }
 0x101   :  { %4350 = vmatmul.mubr.bf16.vlgmr.msra.gmra.mrb[0].mxu0 %v163_v15  ;;  %4823 = vmatmul.mubr.bf16.vlgmr.msra.gmra.mrb[0].mxu1 %v163_v15  ;;  %v6920_v15 = vld [vmem:[#allocation5 + $0x604] ss:$16 sps:$4 sm:$0xff]  }
 0x102   :  { %4361 = vmatpush1.bf16.msra.mxu0 %v6822_v13  ;;  %4834 = vmatpush1.bf16.msra.mxu1 %v6825_v14  ;;  %v6912_v13 = vld [vmem:[#allocation5 + $0x5e0] ss:$16 sps:$4 sm:$0xff]   ;;  %v6915_v14 = vld [vmem:[#allocation5 + $0x5e8] ss:$16 sps:$4 sm:$0xff]  }
 0x103   :  { %4362 = vmatprep.subr.bf16.mxu0 %v6830_v16  ;;  %4835 = vmatprep.subr.bf16.mxu1 %v6833_v17  ;;  %v121_v16 = vld [vmem:[#allocation2 + $0x20] sm:$0xff]  ;;  %v143_v17 = vld [vmem:[#allocation2 + $0xd0] sm:$0xff] }
 0x104   :  { %4392 = vmatprep.mubr.bf16.mxu0 %v166_v22  ;;  %4865 = vmatprep.mubr.bf16.mxu1 %v166_v22  ;;  %v124_v22 = vld [vmem:[#allocation2 + $0x38] sm:$0xff] }
 0x106   :  { %4363 = vmatpush1.bf16.msra.mxu0 %v6828_v20  ;;  %4836 = vmatpush1.bf16.msra.mxu1 %v6831_v21  ;;  %v6921_v20 = vld [vmem:[#allocation5 + $0x608] ss:$16 sps:$4 sm:$0xff]   ;;  %v165_v21 = vpack.c.bf16 %v143_v17, %v121_v16  ;;  %v7010_v17 = vld [vmem:[#allocation5 + $0x7e4] ss:$16 sps:$4 sm:$0xff]  }
 0x107   :  { %4364 = vmatprep.subr.bf16.mxu0 %v6836_v23  ;;  %4837 = vmatprep.subr.bf16.mxu1 %v6839_v24  ;;  %v146_v23 = vld [vmem:[#allocation2 + $0xe8] sm:$0xff]  ;;  %v6926_v24 = vld [vmem:[#allocation5 + $0x624] ss:$16 sps:$4 sm:$0xff]  }
 0x108   :  { %v7005_v16 = vld [vmem:[#allocation5 + $0x7c8] ss:$16 sps:$4 sm:$0xff]  }
 0x10a   :  { %4365 = vmatpush1.bf16.msra.mxu0 %v6834_v25  ;;  %4838 = vmatpush1.bf16.msra.mxu1 %v6837_v26  ;;  %v6929_v25 = vld [vmem:[#allocation5 + $0x62c] ss:$16 sps:$4 sm:$0xff]   ;;  %v168_v26 = vpack.c.bf16 %v146_v23, %v124_v22  ;;  %v123_v22 = vld [vmem:[#allocation2 + $0x30] sm:$0xff]  ;;  %v145_v23 = vld [vmem:[#allocation2 + $0xe0] sm:$0xff] }
 0x10b   :  { %4366 = vmatprep.subr.bf16.mxu0 %v6842_v27  ;;  %4839 = vmatprep.subr.bf16.mxu1 %v6845_v28  ;;  %v6924_v27 = vld [vmem:[#allocation5 + $0x620] ss:$16 sps:$4 sm:$0xff]   ;;  %v6927_v28 = vld [vmem:[#allocation5 + $0x628] ss:$16 sps:$4 sm:$0xff]  }
 0x10e   :  { %4367 = vmatpush1.bf16.msra.mxu0 %v6840_v29  ;;  %4840 = vmatpush1.bf16.msra.mxu1 %v6843_v30  ;;  %v6932_v29 = vld [vmem:[#allocation5 + $0x644] ss:$16 sps:$4 sm:$0xff]   ;;  %v6935_v30 = vld [vmem:[#allocation5 + $0x64c] ss:$16 sps:$4 sm:$0xff]  }
 0x10f   :  { %4368 = vmatprep.subr.bf16.mxu0 %v6848_v31  ;;  %4841 = vmatprep.subr.bf16.mxu1 %v6851_v32  ;;  %v6930_v31 = vld [vmem:[#allocation5 + $0x640] ss:$16 sps:$4 sm:$0xff]   ;;  %v6933_v32 = vld [vmem:[#allocation5 + $0x648] ss:$16 sps:$4 sm:$0xff]  }
 0x112   :  { %4369 = vmatpush1.bf16.msra.mxu0 %v6846_v33  ;;  %4842 = vmatpush1.bf16.msra.mxu1 %v6849_v34  ;;  %v6938_v33 = vld [vmem:[#allocation5 + $0x664] ss:$16 sps:$4 sm:$0xff]   ;;  %v6941_v34 = vld [vmem:[#allocation5 + $0x66c] ss:$16 sps:$4 sm:$0xff]  }
 0x113   :  { %4370 = vmatprep.subr.bf16.mxu0 %v6854_v35  ;;  %4843 = vmatprep.subr.bf16.mxu1 %v6857_v36  ;;  %v6936_v35 = vld [vmem:[#allocation5 + $0x660] ss:$16 sps:$4 sm:$0xff]   ;;  %v6939_v36 = vld [vmem:[#allocation5 + $0x668] ss:$16 sps:$4 sm:$0xff]  }
 0x116   :  { %4371 = vmatpush1.bf16.msra.mxu0 %v6852_v37  ;;  %4844 = vmatpush1.bf16.msra.mxu1 %v6855_v38  ;;  %v6944_v37 = vld [vmem:[#allocation5 + $0x684] ss:$16 sps:$4 sm:$0xff]   ;;  %v6947_v38 = vld [vmem:[#allocation5 + $0x68c] ss:$16 sps:$4 sm:$0xff]  }
 0x117   :  { %4372 = vmatprep.subr.bf16.mxu0 %v6860_v39  ;;  %4845 = vmatprep.subr.bf16.mxu1 %v6863_v40  ;;  %v6942_v39 = vld [vmem:[#allocation5 + $0x680] ss:$16 sps:$4 sm:$0xff]   ;;  %v6945_v40 = vld [vmem:[#allocation5 + $0x688] ss:$16 sps:$4 sm:$0xff]  }
 0x11a   :  { %4373 = vmatpush1.bf16.msra.mxu0 %v6858_v41  ;;  %4846 = vmatpush1.bf16.msra.mxu1 %v6861_v42  ;;  %v6950_v41 = vld [vmem:[#allocation5 + $0x6a4] ss:$16 sps:$4 sm:$0xff]   ;;  %v6953_v42 = vld [vmem:[#allocation5 + $0x6ac] ss:$16 sps:$4 sm:$0xff]  }
 0x11b   :  { %4374 = vmatprep.subr.bf16.mxu0 %v6866_v43  ;;  %4847 = vmatprep.subr.bf16.mxu1 %v6869_v44  ;;  %v6948_v43 = vld [vmem:[#allocation5 + $0x6a0] ss:$16 sps:$4 sm:$0xff]   ;;  %v6951_v44 = vld [vmem:[#allocation5 + $0x6a8] ss:$16 sps:$4 sm:$0xff]  }
 0x11e   :  { %4375 = vmatpush1.bf16.msra.mxu0 %v6864_v45  ;;  %4848 = vmatpush1.bf16.msra.mxu1 %v6867_v46  ;;  %v6956_v45 = vld [vmem:[#allocation5 + $0x6c4] ss:$16 sps:$4 sm:$0xff]   ;;  %v6959_v46 = vld [vmem:[#allocation5 + $0x6cc] ss:$16 sps:$4 sm:$0xff]  }
 0x11f   :  { %4376 = vmatprep.subr.bf16.mxu0 %v6872_v47  ;;  %4849 = vmatprep.subr.bf16.mxu1 %v6875_v48  ;;  %v6954_v47 = vld [vmem:[#allocation5 + $0x6c0] ss:$16 sps:$4 sm:$0xff]   ;;  %v6957_v48 = vld [vmem:[#allocation5 + $0x6c8] ss:$16 sps:$4 sm:$0xff]  }
 0x122   :  { %4377 = vmatpush1.bf16.msra.mxu0 %v6870_v49  ;;  %4850 = vmatpush1.bf16.msra.mxu1 %v6873_v50  ;;  %v6962_v49 = vld [vmem:[#allocation5 + $0x6e4] ss:$16 sps:$4 sm:$0xff]   ;;  %v6965_v50 = vld [vmem:[#allocation5 + $0x6ec] ss:$16 sps:$4 sm:$0xff]  }
 0x123   :  { %4378 = vmatprep.subr.bf16.mxu0 %v6878_v51  ;;  %4851 = vmatprep.subr.bf16.mxu1 %v6881_v52  ;;  %v6960_v51 = vld [vmem:[#allocation5 + $0x6e0] ss:$16 sps:$4 sm:$0xff]   ;;  %v6963_v52 = vld [vmem:[#allocation5 + $0x6e8] ss:$16 sps:$4 sm:$0xff]  }
 0x126   :  { %4379 = vmatpush1.bf16.msra.mxu0 %v6876_v53  ;;  %4852 = vmatpush1.bf16.msra.mxu1 %v6879_v54  ;;  %v6968_v53 = vld [vmem:[#allocation5 + $0x704] ss:$16 sps:$4 sm:$0xff]   ;;  %v6971_v54 = vld [vmem:[#allocation5 + $0x70c] ss:$16 sps:$4 sm:$0xff]  }
 0x127   :  { %4380 = vmatprep.subr.bf16.mxu0 %v6884_v55  ;;  %4853 = vmatprep.subr.bf16.mxu1 %v6887_v56  ;;  %v6966_v55 = vld [vmem:[#allocation5 + $0x700] ss:$16 sps:$4 sm:$0xff]   ;;  %v6969_v56 = vld [vmem:[#allocation5 + $0x708] ss:$16 sps:$4 sm:$0xff]  }
 0x12a   :  { %4381 = vmatpush1.bf16.msra.mxu0 %v6882_v57  ;;  %4854 = vmatpush1.bf16.msra.mxu1 %v6885_v58  ;;  %v6974_v57 = vld [vmem:[#allocation5 + $0x724] ss:$16 sps:$4 sm:$0xff]   ;;  %v6977_v58 = vld [vmem:[#allocation5 + $0x72c] ss:$16 sps:$4 sm:$0xff]  }
 0x12b   :  { %4382 = vmatprep.subr.bf16.mxu0 %v6890_v59  ;;  %4855 = vmatprep.subr.bf16.mxu1 %v6893_v60  ;;  %v6972_v59 = vld [vmem:[#allocation5 + $0x720] ss:$16 sps:$4 sm:$0xff]   ;;  %v6975_v60 = vld [vmem:[#allocation5 + $0x728] ss:$16 sps:$4 sm:$0xff]  }
 0x12e   :  { %4383 = vmatpush1.bf16.msra.mxu0 %v6888_v61  ;;  %4856 = vmatpush1.bf16.msra.mxu1 %v6891_v62  ;;  %v6980_v61 = vld [vmem:[#allocation5 + $0x744] ss:$16 sps:$4 sm:$0xff]   ;;  %v6983_v62 = vld [vmem:[#allocation5 + $0x74c] ss:$16 sps:$4 sm:$0xff]  }
 0x12f   :  { %4384 = vmatprep.subr.bf16.mxu0 %v6896_v63  ;;  %4857 = vmatprep.subr.bf16.mxu1 %v6899_v0  ;;  %v6978_v63 = vld [vmem:[#allocation5 + $0x740] ss:$16 sps:$4 sm:$0xff]   ;;  %v6981_v0 = vld [vmem:[#allocation5 + $0x748] ss:$16 sps:$4 sm:$0xff]  }
 0x132   :  { %4385 = vmatpush1.bf16.msra.mxu0 %v6894_v1  ;;  %4858 = vmatpush1.bf16.msra.mxu1 %v6897_v2  ;;  %v6986_v1 = vld [vmem:[#allocation5 + $0x764] ss:$16 sps:$4 sm:$0xff]   ;;  %v6989_v2 = vld [vmem:[#allocation5 + $0x76c] ss:$16 sps:$4 sm:$0xff]  }
 0x133   :  { %4386 = vmatprep.subr.bf16.mxu0 %v6902_v3  ;;  %4859 = vmatprep.subr.bf16.mxu1 %v6905_v4  ;;  %v6984_v3 = vld [vmem:[#allocation5 + $0x760] ss:$16 sps:$4 sm:$0xff]   ;;  %v6987_v4 = vld [vmem:[#allocation5 + $0x768] ss:$16 sps:$4 sm:$0xff]  }
 0x136   :  { %4387 = vmatpush1.bf16.msra.mxu0 %v6900_v5  ;;  %4860 = vmatpush1.bf16.msra.mxu1 %v6903_v6  ;;  %v6992_v5 = vld [vmem:[#allocation5 + $0x784] ss:$16 sps:$4 sm:$0xff]   ;;  %v6995_v6 = vld [vmem:[#allocation5 + $0x78c] ss:$16 sps:$4 sm:$0xff]  }
 0x137   :  { %4388 = vmatprep.subr.bf16.mxu0 %v6908_v7  ;;  %4861 = vmatprep.subr.bf16.mxu1 %v6911_v8  ;;  %v6990_v7 = vld [vmem:[#allocation5 + $0x780] ss:$16 sps:$4 sm:$0xff]   ;;  %v6993_v8 = vld [vmem:[#allocation5 + $0x788] ss:$16 sps:$4 sm:$0xff]  }
 0x13a   :  { %4389 = vmatpush1.bf16.msra.mxu0 %v6906_v9  ;;  %4862 = vmatpush1.bf16.msra.mxu1 %v6909_v10  ;;  %v6998_v9 = vld [vmem:[#allocation5 + $0x7a4] ss:$16 sps:$4 sm:$0xff]   ;;  %v7001_v10 = vld [vmem:[#allocation5 + $0x7ac] ss:$16 sps:$4 sm:$0xff]  }
 0x13b   :  { %4390 = vmatprep.subr.bf16.mxu0 %v6914_v11  ;;  %4863 = vmatprep.subr.bf16.mxu1 %v6917_v12  ;;  %v6996_v11 = vld [vmem:[#allocation5 + $0x7a0] ss:$16 sps:$4 sm:$0xff]   ;;  %v6999_v12 = vld [vmem:[#allocation5 + $0x7a8] ss:$16 sps:$4 sm:$0xff]  }
 0x13e   :  { %4391 = vmatpush1.bf16.msra.mxu0 %v6912_v13  ;;  %4864 = vmatpush1.bf16.msra.mxu1 %v6915_v14  ;;  %v7004_v13 = vld [vmem:[#allocation5 + $0x7c4] ss:$16 sps:$4 sm:$0xff]   ;;  %v7007_v14 = vld [vmem:[#allocation5 + $0x7cc] ss:$16 sps:$4 sm:$0xff]  }
 0x13f   :  { %4403 = vmatprep.subr.bf16.mxu0 %v6920_v15  ;;  %4876 = vmatprep.subr.bf16.mxu1 %v6923_v18  ;;  %v7002_v15 = vld [vmem:[#allocation5 + $0x7c0] ss:$16 sps:$4 sm:$0xff]   ;;  %v7013_v18 = vld [vmem:[#allocation5 + $0x7ec] ss:$16 sps:$4 sm:$0xff]  }
 0x141   :  { %4393 = vmatmul.mubr.bf16.vlgmr.msra.gmra.mrb[0].mxu0 %v165_v21  ;;  %4866 = vmatmul.mubr.bf16.vlgmr.msra.gmra.mrb[0].mxu1 %v165_v21  ;;  %v7016_v21 = vld [vmem:[#allocation5 + $0x804] ss:$16 sps:$4 sm:$0xff]  }
 0x142   :  { %4404 = vmatpush1.bf16.msra.mxu0 %v6918_v19  ;;  %4877 = vmatpush1.bf16.msra.mxu1 %v6921_v20  ;;  %v7008_v19 = vld [vmem:[#allocation5 + $0x7e0] ss:$16 sps:$4 sm:$0xff]   ;;  %v7011_v20 = vld [vmem:[#allocation5 + $0x7e8] ss:$16 sps:$4 sm:$0xff]  }
 0x143   :  { %4405 = vmatprep.subr.bf16.mxu0 %v6926_v24  ;;  %4878 = vmatprep.subr.bf16.mxu1 %v6929_v25  ;;  %v7019_v24 = vld [vmem:[#allocation5 + $0x80c] ss:$16 sps:$4 sm:$0xff]   ;;  %v7014_v25 = vld [vmem:[#allocation5 + $0x800] ss:$16 sps:$4 sm:$0xff]  }
 0x144   :  { %4435 = vmatprep.mubr.bf16.mxu0 %v168_v26  ;;  %4908 = vmatprep.mubr.bf16.mxu1 %v168_v26  ;;  %v7017_v26 = vld [vmem:[#allocation5 + $0x808] ss:$16 sps:$4 sm:$0xff]  }
 0x146   :  { %4406 = vmatpush1.bf16.msra.mxu0 %v6924_v27  ;;  %4879 = vmatpush1.bf16.msra.mxu1 %v6927_v28  ;;  %v167_v27 = vpack.c.bf16 %v145_v23, %v123_v22  ;;  %v126_v28 = vld [vmem:[#allocation2 + $0x48] sm:$0xff]  ;;  %v7106_v23 = vld [vmem:[#allocation5 + $0x9e4] ss:$16 sps:$4 sm:$0xff]  }
 0x147   :  { %4407 = vmatprep.subr.bf16.mxu0 %v6932_v29  ;;  %4880 = vmatprep.subr.bf16.mxu1 %v6935_v30  ;;  %v148_v29 = vld [vmem:[#allocation2 + $0xf8] sm:$0xff]  ;;  %v7022_v30 = vld [vmem:[#allocation5 + $0x824] ss:$16 sps:$4 sm:$0xff]  }
 0x148   :  { %v7101_v22 = vld [vmem:[#allocation5 + $0x9c8] ss:$16 sps:$4 sm:$0xff]  }
 0x14a   :  { %4408 = vmatpush1.bf16.msra.mxu0 %v6930_v31  ;;  %4881 = vmatpush1.bf16.msra.mxu1 %v6933_v32  ;;  %v7025_v31 = vld [vmem:[#allocation5 + $0x82c] ss:$16 sps:$4 sm:$0xff]   ;;  %v170_v32 = vpack.c.bf16 %v148_v29, %v126_v28  ;;  %v125_v29 = vld [vmem:[#allocation2 + $0x40] sm:$0xff] }
 0x14b   :  { %4409 = vmatprep.subr.bf16.mxu0 %v6938_v33  ;;  %4882 = vmatprep.subr.bf16.mxu1 %v6941_v34  ;;  %v7020_v33 = vld [vmem:[#allocation5 + $0x820] ss:$16 sps:$4 sm:$0xff]   ;;  %v7023_v34 = vld [vmem:[#allocation5 + $0x828] ss:$16 sps:$4 sm:$0xff]   ;;  %v7115_v28 = vld [vmem:[#allocation5 + $0xa0c] ss:$16 sps:$4 sm:$0xff]  }
 0x14e   :  { %4410 = vmatpush1.bf16.msra.mxu0 %v6936_v35  ;;  %4883 = vmatpush1.bf16.msra.mxu1 %v6939_v36  ;;  %v7028_v35 = vld [vmem:[#allocation5 + $0x844] ss:$16 sps:$4 sm:$0xff]   ;;  %v7031_v36 = vld [vmem:[#allocation5 + $0x84c] ss:$16 sps:$4 sm:$0xff]  }
 0x14f   :  { %4411 = vmatprep.subr.bf16.mxu0 %v6944_v37  ;;  %4884 = vmatprep.subr.bf16.mxu1 %v6947_v38  ;;  %v7026_v37 = vld [vmem:[#allocation5 + $0x840] ss:$16 sps:$4 sm:$0xff]   ;;  %v7029_v38 = vld [vmem:[#allocation5 + $0x848] ss:$16 sps:$4 sm:$0xff]  }
 0x152   :  { %4412 = vmatpush1.bf16.msra.mxu0 %v6942_v39  ;;  %4885 = vmatpush1.bf16.msra.mxu1 %v6945_v40  ;;  %v7034_v39 = vld [vmem:[#allocation5 + $0x864] ss:$16 sps:$4 sm:$0xff]   ;;  %v7037_v40 = vld [vmem:[#allocation5 + $0x86c] ss:$16 sps:$4 sm:$0xff]  }
 0x153   :  { %4413 = vmatprep.subr.bf16.mxu0 %v6950_v41  ;;  %4886 = vmatprep.subr.bf16.mxu1 %v6953_v42  ;;  %v7032_v41 = vld [vmem:[#allocation5 + $0x860] ss:$16 sps:$4 sm:$0xff]   ;;  %v7035_v42 = vld [vmem:[#allocation5 + $0x868] ss:$16 sps:$4 sm:$0xff]  }
 0x156   :  { %4414 = vmatpush1.bf16.msra.mxu0 %v6948_v43  ;;  %4887 = vmatpush1.bf16.msra.mxu1 %v6951_v44  ;;  %v7040_v43 = vld [vmem:[#allocation5 + $0x884] ss:$16 sps:$4 sm:$0xff]   ;;  %v7043_v44 = vld [vmem:[#allocation5 + $0x88c] ss:$16 sps:$4 sm:$0xff]  }
 0x157   :  { %4415 = vmatprep.subr.bf16.mxu0 %v6956_v45  ;;  %4888 = vmatprep.subr.bf16.mxu1 %v6959_v46  ;;  %v7038_v45 = vld [vmem:[#allocation5 + $0x880] ss:$16 sps:$4 sm:$0xff]   ;;  %v7041_v46 = vld [vmem:[#allocation5 + $0x888] ss:$16 sps:$4 sm:$0xff]  }
 0x15a   :  { %4416 = vmatpush1.bf16.msra.mxu0 %v6954_v47  ;;  %4889 = vmatpush1.bf16.msra.mxu1 %v6957_v48  ;;  %v7046_v47 = vld [vmem:[#allocation5 + $0x8a4] ss:$16 sps:$4 sm:$0xff]   ;;  %v7049_v48 = vld [vmem:[#allocation5 + $0x8ac] ss:$16 sps:$4 sm:$0xff]  }
 0x15b   :  { %4417 = vmatprep.subr.bf16.mxu0 %v6962_v49  ;;  %4890 = vmatprep.subr.bf16.mxu1 %v6965_v50  ;;  %v7044_v49 = vld [vmem:[#allocation5 + $0x8a0] ss:$16 sps:$4 sm:$0xff]   ;;  %v7047_v50 = vld [vmem:[#allocation5 + $0x8a8] ss:$16 sps:$4 sm:$0xff]  }
 0x15e   :  { %4418 = vmatpush1.bf16.msra.mxu0 %v6960_v51  ;;  %4891 = vmatpush1.bf16.msra.mxu1 %v6963_v52  ;;  %v7052_v51 = vld [vmem:[#allocation5 + $0x8c4] ss:$16 sps:$4 sm:$0xff]   ;;  %v7055_v52 = vld [vmem:[#allocation5 + $0x8cc] ss:$16 sps:$4 sm:$0xff]  }
 0x15f   :  { %4419 = vmatprep.subr.bf16.mxu0 %v6968_v53  ;;  %4892 = vmatprep.subr.bf16.mxu1 %v6971_v54  ;;  %v7050_v53 = vld [vmem:[#allocation5 + $0x8c0] ss:$16 sps:$4 sm:$0xff]   ;;  %v7053_v54 = vld [vmem:[#allocation5 + $0x8c8] ss:$16 sps:$4 sm:$0xff]  }
 0x162   :  { %4420 = vmatpush1.bf16.msra.mxu0 %v6966_v55  ;;  %4893 = vmatpush1.bf16.msra.mxu1 %v6969_v56  ;;  %v7058_v55 = vld [vmem:[#allocation5 + $0x8e4] ss:$16 sps:$4 sm:$0xff]   ;;  %v7061_v56 = vld [vmem:[#allocation5 + $0x8ec] ss:$16 sps:$4 sm:$0xff]  }
 0x163   :  { %4421 = vmatprep.subr.bf16.mxu0 %v6974_v57  ;;  %4894 = vmatprep.subr.bf16.mxu1 %v6977_v58  ;;  %v7056_v57 = vld [vmem:[#allocation5 + $0x8e0] ss:$16 sps:$4 sm:$0xff]   ;;  %v7059_v58 = vld [vmem:[#allocation5 + $0x8e8] ss:$16 sps:$4 sm:$0xff]  }
 0x166   :  { %4422 = vmatpush1.bf16.msra.mxu0 %v6972_v59  ;;  %4895 = vmatpush1.bf16.msra.mxu1 %v6975_v60  ;;  %v7064_v59 = vld [vmem:[#allocation5 + $0x904] ss:$16 sps:$4 sm:$0xff]   ;;  %v7067_v60 = vld [vmem:[#allocation5 + $0x90c] ss:$16 sps:$4 sm:$0xff]  }
 0x167   :  { %4423 = vmatprep.subr.bf16.mxu0 %v6980_v61  ;;  %4896 = vmatprep.subr.bf16.mxu1 %v6983_v62  ;;  %v7062_v61 = vld [vmem:[#allocation5 + $0x900] ss:$16 sps:$4 sm:$0xff]   ;;  %v7065_v62 = vld [vmem:[#allocation5 + $0x908] ss:$16 sps:$4 sm:$0xff]  }
 0x16a   :  { %4424 = vmatpush1.bf16.msra.mxu0 %v6978_v63  ;;  %4897 = vmatpush1.bf16.msra.mxu1 %v6981_v0  ;;  %v7070_v63 = vld [vmem:[#allocation5 + $0x924] ss:$16 sps:$4 sm:$0xff]   ;;  %v7073_v0 = vld [vmem:[#allocation5 + $0x92c] ss:$16 sps:$4 sm:$0xff]  }
 0x16b   :  { %4425 = vmatprep.subr.bf16.mxu0 %v6986_v1  ;;  %4898 = vmatprep.subr.bf16.mxu1 %v6989_v2  ;;  %v7068_v1 = vld [vmem:[#allocation5 + $0x920] ss:$16 sps:$4 sm:$0xff]   ;;  %v7071_v2 = vld [vmem:[#allocation5 + $0x928] ss:$16 sps:$4 sm:$0xff]  }
 0x16e   :  { %4426 = vmatpush1.bf16.msra.mxu0 %v6984_v3  ;;  %4899 = vmatpush1.bf16.msra.mxu1 %v6987_v4  ;;  %v7076_v3 = vld [vmem:[#allocation5 + $0x944] ss:$16 sps:$4 sm:$0xff]   ;;  %v7079_v4 = vld [vmem:[#allocation5 + $0x94c] ss:$16 sps:$4 sm:$0xff]  }
 0x16f   :  { %4427 = vmatprep.subr.bf16.mxu0 %v6992_v5  ;;  %4900 = vmatprep.subr.bf16.mxu1 %v6995_v6  ;;  %v7074_v5 = vld [vmem:[#allocation5 + $0x940] ss:$16 sps:$4 sm:$0xff]   ;;  %v7077_v6 = vld [vmem:[#allocation5 + $0x948] ss:$16 sps:$4 sm:$0xff]  }
 0x172   :  { %4428 = vmatpush1.bf16.msra.mxu0 %v6990_v7  ;;  %4901 = vmatpush1.bf16.msra.mxu1 %v6993_v8  ;;  %v7082_v7 = vld [vmem:[#allocation5 + $0x964] ss:$16 sps:$4 sm:$0xff]   ;;  %v7085_v8 = vld [vmem:[#allocation5 + $0x96c] ss:$16 sps:$4 sm:$0xff]  }
 0x173   :  { %4429 = vmatprep.subr.bf16.mxu0 %v6998_v9  ;;  %4902 = vmatprep.subr.bf16.mxu1 %v7001_v10  ;;  %v7080_v9 = vld [vmem:[#allocation5 + $0x960] ss:$16 sps:$4 sm:$0xff]   ;;  %v7083_v10 = vld [vmem:[#allocation5 + $0x968] ss:$16 sps:$4 sm:$0xff]  }
 0x176   :  { %4430 = vmatpush1.bf16.msra.mxu0 %v6996_v11  ;;  %4903 = vmatpush1.bf16.msra.mxu1 %v6999_v12  ;;  %v7088_v11 = vld [vmem:[#allocation5 + $0x984] ss:$16 sps:$4 sm:$0xff]   ;;  %v7091_v12 = vld [vmem:[#allocation5 + $0x98c] ss:$16 sps:$4 sm:$0xff]  }
 0x177   :  { %4431 = vmatprep.subr.bf16.mxu0 %v7004_v13  ;;  %4904 = vmatprep.subr.bf16.mxu1 %v7007_v14  ;;  %v7086_v13 = vld [vmem:[#allocation5 + $0x980] ss:$16 sps:$4 sm:$0xff]   ;;  %v7089_v14 = vld [vmem:[#allocation5 + $0x988] ss:$16 sps:$4 sm:$0xff]  }
 0x17a   :  { %4432 = vmatpush1.bf16.msra.mxu0 %v7002_v15  ;;  %4905 = vmatpush1.bf16.msra.mxu1 %v7005_v16  ;;  %v7094_v15 = vld [vmem:[#allocation5 + $0x9a4] ss:$16 sps:$4 sm:$0xff]   ;;  %v7097_v16 = vld [vmem:[#allocation5 + $0x9ac] ss:$16 sps:$4 sm:$0xff]  }
 0x17b   :  { %4433 = vmatprep.subr.bf16.mxu0 %v7010_v17  ;;  %4906 = vmatprep.subr.bf16.mxu1 %v7013_v18  ;;  %v7092_v17 = vld [vmem:[#allocation5 + $0x9a0] ss:$16 sps:$4 sm:$0xff]   ;;  %v7095_v18 = vld [vmem:[#allocation5 + $0x9a8] ss:$16 sps:$4 sm:$0xff]  }
 0x17e   :  { %4434 = vmatpush1.bf16.msra.mxu0 %v7008_v19  ;;  %4907 = vmatpush1.bf16.msra.mxu1 %v7011_v20  ;;  %v7100_v19 = vld [vmem:[#allocation5 + $0x9c4] ss:$16 sps:$4 sm:$0xff]   ;;  %v7103_v20 = vld [vmem:[#allocation5 + $0x9cc] ss:$16 sps:$4 sm:$0xff]  }
 0x17f   :  { %4446 = vmatprep.subr.bf16.mxu0 %v7016_v21  ;;  %4919 = vmatprep.subr.bf16.mxu1 %v7019_v24  ;;  %v7098_v21 = vld [vmem:[#allocation5 + $0x9c0] ss:$16 sps:$4 sm:$0xff]   ;;  %v7109_v24 = vld [vmem:[#allocation5 + $0x9ec] ss:$16 sps:$4 sm:$0xff]  }
 0x181   :  { %4436 = vmatmul.mubr.bf16.vlgmr.msra.gmra.mrb[0].mxu0 %v167_v27  ;;  %4909 = vmatmul.mubr.bf16.vlgmr.msra.gmra.mrb[0].mxu1 %v167_v27  ;;  %v7112_v27 = vld [vmem:[#allocation5 + $0xa04] ss:$16 sps:$4 sm:$0xff]  }
 0x182   :  { %4447 = vmatpush1.bf16.msra.mxu0 %v7014_v25  ;;  %4920 = vmatpush1.bf16.msra.mxu1 %v7017_v26  ;;  %v7104_v25 = vld [vmem:[#allocation5 + $0x9e0] ss:$16 sps:$4 sm:$0xff]   ;;  %v7107_v26 = vld [vmem:[#allocation5 + $0x9e8] ss:$16 sps:$4 sm:$0xff]  }
 0x183   :  { %4448 = vmatprep.subr.bf16.mxu0 %v7022_v30  ;;  %4921 = vmatprep.subr.bf16.mxu1 %v7025_v31  ;;  %v147_v30 = vld [vmem:[#allocation2 + $0xf0] sm:$0xff]  ;;  %v128_v31 = vld [vmem:[#allocation2 + $0x58] sm:$0xff] }
 0x184   :  { %4478 = vmatprep.mubr.bf16.mxu0 %v170_v32  ;;  %4951 = vmatprep.mubr.bf16.mxu1 %v170_v32  ;;  %v150_v32 = vld [vmem:[#allocation2 + $0x108] sm:$0xff] }
 0x186   :  { %4449 = vmatpush1.bf16.msra.mxu0 %v7020_v33  ;;  %4922 = vmatpush1.bf16.msra.mxu1 %v7023_v34  ;;  %v169_v33 = vpack.c.bf16 %v147_v30, %v125_v29  ;;  %v7110_v34 = vld [vmem:[#allocation5 + $0xa00] ss:$16 sps:$4 sm:$0xff]   ;;  %v7202_v29 = vld [vmem:[#allocation5 + $0xbe4] ss:$16 sps:$4 sm:$0xff]   ;;  %v7205_v30 = vld [vmem:[#allocation5 + $0xbec] ss:$16 sps:$4 sm:$0xff]  }
 0x187   :  { %4450 = vmatprep.subr.bf16.mxu0 %v7028_v35  ;;  %4923 = vmatprep.subr.bf16.mxu1 %v7031_v36  ;;  %v7113_v35 = vld [vmem:[#allocation5 + $0xa08] ss:$16 sps:$4 sm:$0xff]   ;;  %v7118_v36 = vld [vmem:[#allocation5 + $0xa24] ss:$16 sps:$4 sm:$0xff]  }
 0x18a   :  { %4451 = vmatpush1.bf16.msra.mxu0 %v7026_v37  ;;  %4924 = vmatpush1.bf16.msra.mxu1 %v7029_v38  ;;  %v7121_v37 = vld [vmem:[#allocation5 + $0xa2c] ss:$16 sps:$4 sm:$0xff]   ;;  %v172_v38 = vpack.c.bf16 %v150_v32, %v128_v31  ;;  %v7200_v31 = vld [vmem:[#allocation5 + $0xbe0] ss:$16 sps:$4 sm:$0xff]   ;;  %v7203_v32 = vld [vmem:[#allocation5 + $0xbe8] ss:$16 sps:$4 sm:$0xff]  }
 0x18b   :  { %4452 = vmatprep.subr.bf16.mxu0 %v7034_v39  ;;  %4925 = vmatprep.subr.bf16.mxu1 %v7037_v40  ;;  %v7116_v39 = vld [vmem:[#allocation5 + $0xa20] ss:$16 sps:$4 sm:$0xff]   ;;  %v7119_v40 = vld [vmem:[#allocation5 + $0xa28] ss:$16 sps:$4 sm:$0xff]  }
 0x18e   :  { %4453 = vmatpush1.bf16.msra.mxu0 %v7032_v41  ;;  %4926 = vmatpush1.bf16.msra.mxu1 %v7035_v42  ;;  %v7124_v41 = vld [vmem:[#allocation5 + $0xa44] ss:$16 sps:$4 sm:$0xff]   ;;  %v7127_v42 = vld [vmem:[#allocation5 + $0xa4c] ss:$16 sps:$4 sm:$0xff]  }
 0x18f   :  { %4454 = vmatprep.subr.bf16.mxu0 %v7040_v43  ;;  %4927 = vmatprep.subr.bf16.mxu1 %v7043_v44  ;;  %v7122_v43 = vld [vmem:[#allocation5 + $0xa40] ss:$16 sps:$4 sm:$0xff]   ;;  %v7125_v44 = vld [vmem:[#allocation5 + $0xa48] ss:$16 sps:$4 sm:$0xff]  }
 0x192   :  { %4455 = vmatpush1.bf16.msra.mxu0 %v7038_v45  ;;  %4928 = vmatpush1.bf16.msra.mxu1 %v7041_v46  ;;  %v7130_v45 = vld [vmem:[#allocation5 + $0xa64] ss:$16 sps:$4 sm:$0xff]   ;;  %v7133_v46 = vld [vmem:[#allocation5 + $0xa6c] ss:$16 sps:$4 sm:$0xff]  }
 0x193   :  { %4456 = vmatprep.subr.bf16.mxu0 %v7046_v47  ;;  %4929 = vmatprep.subr.bf16.mxu1 %v7049_v48  ;;  %v7128_v47 = vld [vmem:[#allocation5 + $0xa60] ss:$16 sps:$4 sm:$0xff]   ;;  %v7131_v48 = vld [vmem:[#allocation5 + $0xa68] ss:$16 sps:$4 sm:$0xff]  }
 0x196   :  { %4457 = vmatpush1.bf16.msra.mxu0 %v7044_v49  ;;  %4930 = vmatpush1.bf16.msra.mxu1 %v7047_v50  ;;  %v7136_v49 = vld [vmem:[#allocation5 + $0xa84] ss:$16 sps:$4 sm:$0xff]   ;;  %v7139_v50 = vld [vmem:[#allocation5 + $0xa8c] ss:$16 sps:$4 sm:$0xff]  }
 0x197   :  { %4458 = vmatprep.subr.bf16.mxu0 %v7052_v51  ;;  %4931 = vmatprep.subr.bf16.mxu1 %v7055_v52  ;;  %v7134_v51 = vld [vmem:[#allocation5 + $0xa80] ss:$16 sps:$4 sm:$0xff]   ;;  %v7137_v52 = vld [vmem:[#allocation5 + $0xa88] ss:$16 sps:$4 sm:$0xff]  }
 0x19a   :  { %4459 = vmatpush1.bf16.msra.mxu0 %v7050_v53  ;;  %4932 = vmatpush1.bf16.msra.mxu1 %v7053_v54  ;;  %v7142_v53 = vld [vmem:[#allocation5 + $0xaa4] ss:$16 sps:$4 sm:$0xff]   ;;  %v7145_v54 = vld [vmem:[#allocation5 + $0xaac] ss:$16 sps:$4 sm:$0xff]  }
 0x19b   :  { %4460 = vmatprep.subr.bf16.mxu0 %v7058_v55  ;;  %4933 = vmatprep.subr.bf16.mxu1 %v7061_v56  ;;  %v7140_v55 = vld [vmem:[#allocation5 + $0xaa0] ss:$16 sps:$4 sm:$0xff]   ;;  %v7143_v56 = vld [vmem:[#allocation5 + $0xaa8] ss:$16 sps:$4 sm:$0xff]  }
 0x19e   :  { %4461 = vmatpush1.bf16.msra.mxu0 %v7056_v57  ;;  %4934 = vmatpush1.bf16.msra.mxu1 %v7059_v58  ;;  %v7148_v57 = vld [vmem:[#allocation5 + $0xac4] ss:$16 sps:$4 sm:$0xff]   ;;  %v7151_v58 = vld [vmem:[#allocation5 + $0xacc] ss:$16 sps:$4 sm:$0xff]  }
 0x19f   :  { %4462 = vmatprep.subr.bf16.mxu0 %v7064_v59  ;;  %4935 = vmatprep.subr.bf16.mxu1 %v7067_v60  ;;  %v7146_v59 = vld [vmem:[#allocation5 + $0xac0] ss:$16 sps:$4 sm:$0xff]   ;;  %v7149_v60 = vld [vmem:[#allocation5 + $0xac8] ss:$16 sps:$4 sm:$0xff]  }
 0x1a2   :  { %4463 = vmatpush1.bf16.msra.mxu0 %v7062_v61  ;;  %4936 = vmatpush1.bf16.msra.mxu1 %v7065_v62  ;;  %v7154_v61 = vld [vmem:[#allocation5 + $0xae4] ss:$16 sps:$4 sm:$0xff]   ;;  %v7157_v62 = vld [vmem:[#allocation5 + $0xaec] ss:$16 sps:$4 sm:$0xff]  }
 0x1a3   :  { %4464 = vmatprep.subr.bf16.mxu0 %v7070_v63  ;;  %4937 = vmatprep.subr.bf16.mxu1 %v7073_v0  ;;  %v7152_v63 = vld [vmem:[#allocation5 + $0xae0] ss:$16 sps:$4 sm:$0xff]   ;;  %v7155_v0 = vld [vmem:[#allocation5 + $0xae8] ss:$16 sps:$4 sm:$0xff]  }
 0x1a6   :  { %4465 = vmatpush1.bf16.msra.mxu0 %v7068_v1  ;;  %4938 = vmatpush1.bf16.msra.mxu1 %v7071_v2  ;;  %v7160_v1 = vld [vmem:[#allocation5 + $0xb04] ss:$16 sps:$4 sm:$0xff]   ;;  %v7163_v2 = vld [vmem:[#allocation5 + $0xb0c] ss:$16 sps:$4 sm:$0xff]  }
 0x1a7   :  { %4466 = vmatprep.subr.bf16.mxu0 %v7076_v3  ;;  %4939 = vmatprep.subr.bf16.mxu1 %v7079_v4  ;;  %v7158_v3 = vld [vmem:[#allocation5 + $0xb00] ss:$16 sps:$4 sm:$0xff]   ;;  %v7161_v4 = vld [vmem:[#allocation5 + $0xb08] ss:$16 sps:$4 sm:$0xff]  }
 0x1aa   :  { %4467 = vmatpush1.bf16.msra.mxu0 %v7074_v5  ;;  %4940 = vmatpush1.bf16.msra.mxu1 %v7077_v6  ;;  %v7166_v5 = vld [vmem:[#allocation5 + $0xb24] ss:$16 sps:$4 sm:$0xff]   ;;  %v7169_v6 = vld [vmem:[#allocation5 + $0xb2c] ss:$16 sps:$4 sm:$0xff]  }
 0x1ab   :  { %4468 = vmatprep.subr.bf16.mxu0 %v7082_v7  ;;  %4941 = vmatprep.subr.bf16.mxu1 %v7085_v8  ;;  %v7164_v7 = vld [vmem:[#allocation5 + $0xb20] ss:$16 sps:$4 sm:$0xff]   ;;  %v7167_v8 = vld [vmem:[#allocation5 + $0xb28] ss:$16 sps:$4 sm:$0xff]  }
 0x1ae   :  { %4469 = vmatpush1.bf16.msra.mxu0 %v7080_v9  ;;  %4942 = vmatpush1.bf16.msra.mxu1 %v7083_v10  ;;  %v7172_v9 = vld [vmem:[#allocation5 + $0xb44] ss:$16 sps:$4 sm:$0xff]   ;;  %v7175_v10 = vld [vmem:[#allocation5 + $0xb4c] ss:$16 sps:$4 sm:$0xff]  }
 0x1af   :  { %4470 = vmatprep.subr.bf16.mxu0 %v7088_v11  ;;  %4943 = vmatprep.subr.bf16.mxu1 %v7091_v12  ;;  %v7170_v11 = vld [vmem:[#allocation5 + $0xb40] ss:$16 sps:$4 sm:$0xff]   ;;  %v7173_v12 = vld [vmem:[#allocation5 + $0xb48] ss:$16 sps:$4 sm:$0xff]  }
 0x1b2   :  { %4471 = vmatpush1.bf16.msra.mxu0 %v7086_v13  ;;  %4944 = vmatpush1.bf16.msra.mxu1 %v7089_v14  ;;  %v7178_v13 = vld [vmem:[#allocation5 + $0xb64] ss:$16 sps:$4 sm:$0xff]   ;;  %v7181_v14 = vld [vmem:[#allocation5 + $0xb6c] ss:$16 sps:$4 sm:$0xff]  }
 0x1b3   :  { %4472 = vmatprep.subr.bf16.mxu0 %v7094_v15  ;;  %4945 = vmatprep.subr.bf16.mxu1 %v7097_v16  ;;  %v7176_v15 = vld [vmem:[#allocation5 + $0xb60] ss:$16 sps:$4 sm:$0xff]   ;;  %v7179_v16 = vld [vmem:[#allocation5 + $0xb68] ss:$16 sps:$4 sm:$0xff]  }
 0x1b6   :  { %4473 = vmatpush1.bf16.msra.mxu0 %v7092_v17  ;;  %4946 = vmatpush1.bf16.msra.mxu1 %v7095_v18  ;;  %v7184_v17 = vld [vmem:[#allocation5 + $0xb84] ss:$16 sps:$4 sm:$0xff]   ;;  %v7187_v18 = vld [vmem:[#allocation5 + $0xb8c] ss:$16 sps:$4 sm:$0xff]  }
 0x1b7   :  { %4474 = vmatprep.subr.bf16.mxu0 %v7100_v19  ;;  %4947 = vmatprep.subr.bf16.mxu1 %v7103_v20  ;;  %v7182_v19 = vld [vmem:[#allocation5 + $0xb80] ss:$16 sps:$4 sm:$0xff]   ;;  %v7185_v20 = vld [vmem:[#allocation5 + $0xb88] ss:$16 sps:$4 sm:$0xff]  }
 0x1ba   :  { %4475 = vmatpush1.bf16.msra.mxu0 %v7098_v21  ;;  %4948 = vmatpush1.bf16.msra.mxu1 %v7101_v22  ;;  %v7190_v21 = vld [vmem:[#allocation5 + $0xba4] ss:$16 sps:$4 sm:$0xff]   ;;  %v7193_v22 = vld [vmem:[#allocation5 + $0xbac] ss:$16 sps:$4 sm:$0xff]  }
 0x1bb   :  { %4476 = vmatprep.subr.bf16.mxu0 %v7106_v23  ;;  %4949 = vmatprep.subr.bf16.mxu1 %v7109_v24  ;;  %v7188_v23 = vld [vmem:[#allocation5 + $0xba0] ss:$16 sps:$4 sm:$0xff]   ;;  %v7191_v24 = vld [vmem:[#allocation5 + $0xba8] ss:$16 sps:$4 sm:$0xff]  }
 0x1be   :  { %4477 = vmatpush1.bf16.msra.mxu0 %v7104_v25  ;;  %4950 = vmatpush1.bf16.msra.mxu1 %v7107_v26  ;;  %v7196_v25 = vld [vmem:[#allocation5 + $0xbc4] ss:$16 sps:$4 sm:$0xff]   ;;  %v7199_v26 = vld [vmem:[#allocation5 + $0xbcc] ss:$16 sps:$4 sm:$0xff]  }
 0x1bf   :  { %4489 = vmatprep.subr.bf16.mxu0 %v7112_v27  ;;  %4962 = vmatprep.subr.bf16.mxu1 %v7115_v28  ;;  %v7194_v27 = vld [vmem:[#allocation5 + $0xbc0] ss:$16 sps:$4 sm:$0xff]   ;;  %v7197_v28 = vld [vmem:[#allocation5 + $0xbc8] ss:$16 sps:$4 sm:$0xff]  }
 0x1c1   :  { %4479 = vmatmul.mubr.bf16.vlgmr.msra.gmra.mrb[0].mxu0 %v169_v33  ;;  %4952 = vmatmul.mubr.bf16.vlgmr.msra.gmra.mrb[0].mxu1 %v169_v33  ;;  %v7208_v33 = vld [vmem:[#allocation5 + $0xc04] ss:$16 sps:$4 sm:$0xff]  }
 0x1c2   :  { %4490 = vmatpush1.bf16.msra.mxu0 %v7110_v34  ;;  %4963 = vmatpush1.bf16.msra.mxu1 %v7113_v35  ;;  %v7211_v34 = vld [vmem:[#allocation5 + $0xc0c] ss:$16 sps:$4 sm:$0xff]   ;;  %v127_v35 = vld [vmem:[#allocation2 + $0x50] sm:$0xff] }
 0x1c3   :  { %4491 = vmatprep.subr.bf16.mxu0 %v7118_v36  ;;  %4964 = vmatprep.subr.bf16.mxu1 %v7121_v37  ;;  %v149_v36 = vld [vmem:[#allocation2 + $0x100] sm:$0xff]  ;;  %v130_v37 = vld [vmem:[#allocation2 + $0x68] sm:$0xff] }
 0x1c4   :  { %4521 = vmatprep.mubr.bf16.mxu0 %v172_v38  ;;  %4994 = vmatprep.mubr.bf16.mxu1 %v172_v38  ;;  %v152_v38 = vld [vmem:[#allocation2 + $0x118] sm:$0xff] }
 0x1c6   :  { %4492 = vmatpush1.bf16.msra.mxu0 %v7116_v39  ;;  %4965 = vmatpush1.bf16.msra.mxu1 %v7119_v40  ;;  %v171_v39 = vpack.c.bf16 %v149_v36, %v127_v35  ;;  %v7206_v40 = vld [vmem:[#allocation5 + $0xc00] ss:$16 sps:$4 sm:$0xff]   ;;  %v7298_v35 = vld [vmem:[#allocation5 + $0xde4] ss:$16 sps:$4 sm:$0xff]   ;;  %v7301_v36 = vld [vmem:[#allocation5 + $0xdec] ss:$16 sps:$4 sm:$0xff]  }
 0x1c7   :  { %4493 = vmatprep.subr.bf16.mxu0 %v7124_v41  ;;  %4966 = vmatprep.subr.bf16.mxu1 %v7127_v42  ;;  %v7209_v41 = vld [vmem:[#allocation5 + $0xc08] ss:$16 sps:$4 sm:$0xff]   ;;  %v7214_v42 = vld [vmem:[#allocation5 + $0xc24] ss:$16 sps:$4 sm:$0xff]  }
 0x1ca   :  { %4494 = vmatpush1.bf16.msra.mxu0 %v7122_v43  ;;  %4967 = vmatpush1.bf16.msra.mxu1 %v7125_v44  ;;  %v7217_v43 = vld [vmem:[#allocation5 + $0xc2c] ss:$16 sps:$4 sm:$0xff]   ;;  %v174_v44 = vpack.c.bf16 %v152_v38, %v130_v37  ;;  %v7296_v37 = vld [vmem:[#allocation5 + $0xde0] ss:$16 sps:$4 sm:$0xff]   ;;  %v7299_v38 = vld [vmem:[#allocation5 + $0xde8] ss:$16 sps:$4 sm:$0xff]  }
 0x1cb   :  { %4495 = vmatprep.subr.bf16.mxu0 %v7130_v45  ;;  %4968 = vmatprep.subr.bf16.mxu1 %v7133_v46  ;;  %v7212_v45 = vld [vmem:[#allocation5 + $0xc20] ss:$16 sps:$4 sm:$0xff]   ;;  %v7215_v46 = vld [vmem:[#allocation5 + $0xc28] ss:$16 sps:$4 sm:$0xff]  }
 0x1ce   :  { %4496 = vmatpush1.bf16.msra.mxu0 %v7128_v47  ;;  %4969 = vmatpush1.bf16.msra.mxu1 %v7131_v48  ;;  %v7220_v47 = vld [vmem:[#allocation5 + $0xc44] ss:$16 sps:$4 sm:$0xff]   ;;  %v7223_v48 = vld [vmem:[#allocation5 + $0xc4c] ss:$16 sps:$4 sm:$0xff]  }
 0x1cf   :  { %4497 = vmatprep.subr.bf16.mxu0 %v7136_v49  ;;  %4970 = vmatprep.subr.bf16.mxu1 %v7139_v50  ;;  %v7218_v49 = vld [vmem:[#allocation5 + $0xc40] ss:$16 sps:$4 sm:$0xff]   ;;  %v7221_v50 = vld [vmem:[#allocation5 + $0xc48] ss:$16 sps:$4 sm:$0xff]  }
 0x1d2   :  { %4498 = vmatpush1.bf16.msra.mxu0 %v7134_v51  ;;  %4971 = vmatpush1.bf16.msra.mxu1 %v7137_v52  ;;  %v7226_v51 = vld [vmem:[#allocation5 + $0xc64] ss:$16 sps:$4 sm:$0xff]   ;;  %v7229_v52 = vld [vmem:[#allocation5 + $0xc6c] ss:$16 sps:$4 sm:$0xff]  }
 0x1d3   :  { %4499 = vmatprep.subr.bf16.mxu0 %v7142_v53  ;;  %4972 = vmatprep.subr.bf16.mxu1 %v7145_v54  ;;  %v7224_v53 = vld [vmem:[#allocation5 + $0xc60] ss:$16 sps:$4 sm:$0xff]   ;;  %v7227_v54 = vld [vmem:[#allocation5 + $0xc68] ss:$16 sps:$4 sm:$0xff]  }
 0x1d6   :  { %4500 = vmatpush1.bf16.msra.mxu0 %v7140_v55  ;;  %4973 = vmatpush1.bf16.msra.mxu1 %v7143_v56  ;;  %v7232_v55 = vld [vmem:[#allocation5 + $0xc84] ss:$16 sps:$4 sm:$0xff]   ;;  %v7235_v56 = vld [vmem:[#allocation5 + $0xc8c] ss:$16 sps:$4 sm:$0xff]  }
 0x1d7   :  { %4501 = vmatprep.subr.bf16.mxu0 %v7148_v57  ;;  %4974 = vmatprep.subr.bf16.mxu1 %v7151_v58  ;;  %v7230_v57 = vld [vmem:[#allocation5 + $0xc80] ss:$16 sps:$4 sm:$0xff]   ;;  %v7233_v58 = vld [vmem:[#allocation5 + $0xc88] ss:$16 sps:$4 sm:$0xff]  }
 0x1da   :  { %4502 = vmatpush1.bf16.msra.mxu0 %v7146_v59  ;;  %4975 = vmatpush1.bf16.msra.mxu1 %v7149_v60  ;;  %v7238_v59 = vld [vmem:[#allocation5 + $0xca4] ss:$16 sps:$4 sm:$0xff]   ;;  %v7241_v60 = vld [vmem:[#allocation5 + $0xcac] ss:$16 sps:$4 sm:$0xff]  }
 0x1db   :  { %4503 = vmatprep.subr.bf16.mxu0 %v7154_v61  ;;  %4976 = vmatprep.subr.bf16.mxu1 %v7157_v62  ;;  %v7236_v61 = vld [vmem:[#allocation5 + $0xca0] ss:$16 sps:$4 sm:$0xff]   ;;  %v7239_v62 = vld [vmem:[#allocation5 + $0xca8] ss:$16 sps:$4 sm:$0xff]  }
 0x1de   :  { %4504 = vmatpush1.bf16.msra.mxu0 %v7152_v63  ;;  %4977 = vmatpush1.bf16.msra.mxu1 %v7155_v0  ;;  %v7244_v63 = vld [vmem:[#allocation5 + $0xcc4] ss:$16 sps:$4 sm:$0xff]   ;;  %v7247_v0 = vld [vmem:[#allocation5 + $0xccc] ss:$16 sps:$4 sm:$0xff]  }
 0x1df   :  { %4505 = vmatprep.subr.bf16.mxu0 %v7160_v1  ;;  %4978 = vmatprep.subr.bf16.mxu1 %v7163_v2  ;;  %v7242_v1 = vld [vmem:[#allocation5 + $0xcc0] ss:$16 sps:$4 sm:$0xff]   ;;  %v7245_v2 = vld [vmem:[#allocation5 + $0xcc8] ss:$16 sps:$4 sm:$0xff]  }
 0x1e2   :  { %4506 = vmatpush1.bf16.msra.mxu0 %v7158_v3  ;;  %4979 = vmatpush1.bf16.msra.mxu1 %v7161_v4  ;;  %v7250_v3 = vld [vmem:[#allocation5 + $0xce4] ss:$16 sps:$4 sm:$0xff]   ;;  %v7253_v4 = vld [vmem:[#allocation5 + $0xcec] ss:$16 sps:$4 sm:$0xff]  }
 0x1e3   :  { %4507 = vmatprep.subr.bf16.mxu0 %v7166_v5  ;;  %4980 = vmatprep.subr.bf16.mxu1 %v7169_v6  ;;  %v7248_v5 = vld [vmem:[#allocation5 + $0xce0] ss:$16 sps:$4 sm:$0xff]   ;;  %v7251_v6 = vld [vmem:[#allocation5 + $0xce8] ss:$16 sps:$4 sm:$0xff]  }
 0x1e6   :  { %4508 = vmatpush1.bf16.msra.mxu0 %v7164_v7  ;;  %4981 = vmatpush1.bf16.msra.mxu1 %v7167_v8  ;;  %v7256_v7 = vld [vmem:[#allocation5 + $0xd04] ss:$16 sps:$4 sm:$0xff]   ;;  %v7259_v8 = vld [vmem:[#allocation5 + $0xd0c] ss:$16 sps:$4 sm:$0xff]  }
 0x1e7   :  { %4509 = vmatprep.subr.bf16.mxu0 %v7172_v9  ;;  %4982 = vmatprep.subr.bf16.mxu1 %v7175_v10  ;;  %v7254_v9 = vld [vmem:[#allocation5 + $0xd00] ss:$16 sps:$4 sm:$0xff]   ;;  %v7257_v10 = vld [vmem:[#allocation5 + $0xd08] ss:$16 sps:$4 sm:$0xff]  }
 0x1ea   :  { %4510 = vmatpush1.bf16.msra.mxu0 %v7170_v11  ;;  %4983 = vmatpush1.bf16.msra.mxu1 %v7173_v12  ;;  %v7262_v11 = vld [vmem:[#allocation5 + $0xd24] ss:$16 sps:$4 sm:$0xff]   ;;  %v7265_v12 = vld [vmem:[#allocation5 + $0xd2c] ss:$16 sps:$4 sm:$0xff]  }
 0x1eb   :  { %4511 = vmatprep.subr.bf16.mxu0 %v7178_v13  ;;  %4984 = vmatprep.subr.bf16.mxu1 %v7181_v14  ;;  %v7260_v13 = vld [vmem:[#allocation5 + $0xd20] ss:$16 sps:$4 sm:$0xff]   ;;  %v7263_v14 = vld [vmem:[#allocation5 + $0xd28] ss:$16 sps:$4 sm:$0xff]  }
 0x1ee   :  { %4512 = vmatpush1.bf16.msra.mxu0 %v7176_v15  ;;  %4985 = vmatpush1.bf16.msra.mxu1 %v7179_v16  ;;  %v7268_v15 = vld [vmem:[#allocation5 + $0xd44] ss:$16 sps:$4 sm:$0xff]   ;;  %v7271_v16 = vld [vmem:[#allocation5 + $0xd4c] ss:$16 sps:$4 sm:$0xff]  }
 0x1ef   :  { %4513 = vmatprep.subr.bf16.mxu0 %v7184_v17  ;;  %4986 = vmatprep.subr.bf16.mxu1 %v7187_v18  ;;  %v7266_v17 = vld [vmem:[#allocation5 + $0xd40] ss:$16 sps:$4 sm:$0xff]   ;;  %v7269_v18 = vld [vmem:[#allocation5 + $0xd48] ss:$16 sps:$4 sm:$0xff]  }
 0x1f2   :  { %4514 = vmatpush1.bf16.msra.mxu0 %v7182_v19  ;;  %4987 = vmatpush1.bf16.msra.mxu1 %v7185_v20  ;;  %v7274_v19 = vld [vmem:[#allocation5 + $0xd64] ss:$16 sps:$4 sm:$0xff]   ;;  %v7277_v20 = vld [vmem:[#allocation5 + $0xd6c] ss:$16 sps:$4 sm:$0xff]  }
 0x1f3   :  { %4515 = vmatprep.subr.bf16.mxu0 %v7190_v21  ;;  %4988 = vmatprep.subr.bf16.mxu1 %v7193_v22  ;;  %v7272_v21 = vld [vmem:[#allocation5 + $0xd60] ss:$16 sps:$4 sm:$0xff]   ;;  %v7275_v22 = vld [vmem:[#allocation5 + $0xd68] ss:$16 sps:$4 sm:$0xff]  }
 0x1f6   :  { %4516 = vmatpush1.bf16.msra.mxu0 %v7188_v23  ;;  %4989 = vmatpush1.bf16.msra.mxu1 %v7191_v24  ;;  %v7280_v23 = vld [vmem:[#allocation5 + $0xd84] ss:$16 sps:$4 sm:$0xff]   ;;  %v7283_v24 = vld [vmem:[#allocation5 + $0xd8c] ss:$16 sps:$4 sm:$0xff]  }
 0x1f7   :  { %4517 = vmatprep.subr.bf16.mxu0 %v7196_v25  ;;  %4990 = vmatprep.subr.bf16.mxu1 %v7199_v26  ;;  %v7278_v25 = vld [vmem:[#allocation5 + $0xd80] ss:$16 sps:$4 sm:$0xff]   ;;  %v7281_v26 = vld [vmem:[#allocation5 + $0xd88] ss:$16 sps:$4 sm:$0xff]  }
 0x1fa   :  { %4518 = vmatpush1.bf16.msra.mxu0 %v7194_v27  ;;  %4991 = vmatpush1.bf16.msra.mxu1 %v7197_v28  ;;  %v7286_v27 = vld [vmem:[#allocation5 + $0xda4] ss:$16 sps:$4 sm:$0xff]   ;;  %v7289_v28 = vld [vmem:[#allocation5 + $0xdac] ss:$16 sps:$4 sm:$0xff]  }
 0x1fb   :  { %4519 = vmatprep.subr.bf16.mxu0 %v7202_v29  ;;  %4992 = vmatprep.subr.bf16.mxu1 %v7205_v30  ;;  %v7284_v29 = vld [vmem:[#allocation5 + $0xda0] ss:$16 sps:$4 sm:$0xff]   ;;  %v7287_v30 = vld [vmem:[#allocation5 + $0xda8] ss:$16 sps:$4 sm:$0xff]  }
 0x1fe   :  { %4520 = vmatpush1.bf16.msra.mxu0 %v7200_v31  ;;  %4993 = vmatpush1.bf16.msra.mxu1 %v7203_v32  ;;  %v7292_v31 = vld [vmem:[#allocation5 + $0xdc4] ss:$16 sps:$4 sm:$0xff]   ;;  %v7295_v32 = vld [vmem:[#allocation5 + $0xdcc] ss:$16 sps:$4 sm:$0xff]  }
 0x1ff   :  { %4532 = vmatprep.subr.bf16.mxu0 %v7208_v33  ;;  %5005 = vmatprep.subr.bf16.mxu1 %v7211_v34  ;;  %v7290_v33 = vld [vmem:[#allocation5 + $0xdc0] ss:$16 sps:$4 sm:$0xff]   ;;  %v7293_v34 = vld [vmem:[#allocation5 + $0xdc8] ss:$16 sps:$4 sm:$0xff]  }
 0x201   :  { %4522 = vmatmul.mubr.bf16.vlgmr.msra.gmra.mrb[0].mxu0 %v171_v39  ;;  %4995 = vmatmul.mubr.bf16.vlgmr.msra.gmra.mrb[0].mxu1 %v171_v39  ;;  %v7304_v39 = vld [vmem:[#allocation5 + $0xe04] ss:$16 sps:$4 sm:$0xff]  }
 0x202   :  { %4533 = vmatpush1.bf16.msra.mxu0 %v7206_v40  ;;  %5006 = vmatpush1.bf16.msra.mxu1 %v7209_v41  ;;  %v7307_v40 = vld [vmem:[#allocation5 + $0xe0c] ss:$16 sps:$4 sm:$0xff]   ;;  %v129_v41 = vld [vmem:[#allocation2 + $0x60] sm:$0xff] }
 0x203   :  { %4534 = vmatprep.subr.bf16.mxu0 %v7214_v42  ;;  %5007 = vmatprep.subr.bf16.mxu1 %v7217_v43  ;;  %v151_v42 = vld [vmem:[#allocation2 + $0x110] sm:$0xff]  ;;  %v132_v43 = vld [vmem:[#allocation2 + $0x78] sm:$0xff] }
 0x204   :  { %4564 = vmatprep.mubr.bf16.mxu0 %v174_v44  ;;  %5037 = vmatprep.mubr.bf16.mxu1 %v174_v44  ;;  %v154_v44 = vld [vmem:[#allocation2 + $0x128] sm:$0xff] }
 0x206   :  { %4535 = vmatpush1.bf16.msra.mxu0 %v7212_v45  ;;  %5008 = vmatpush1.bf16.msra.mxu1 %v7215_v46  ;;  %v173_v45 = vpack.c.bf16 %v151_v42, %v129_v41  ;;  %v7302_v46 = vld [vmem:[#allocation5 + $0xe00] ss:$16 sps:$4 sm:$0xff]   ;;  %v7394_v41 = vld [vmem:[#allocation5 + $0xfe4] ss:$16 sps:$4 sm:$0xff]   ;;  %v7397_v42 = vld [vmem:[#allocation5 + $0xfec] ss:$16 sps:$4 sm:$0xff]  }
 0x207   :  { %4536 = vmatprep.subr.bf16.mxu0 %v7220_v47  ;;  %5009 = vmatprep.subr.bf16.mxu1 %v7223_v48  ;;  %v7305_v47 = vld [vmem:[#allocation5 + $0xe08] ss:$16 sps:$4 sm:$0xff]   ;;  %v7310_v48 = vld [vmem:[#allocation5 + $0xe24] ss:$16 sps:$4 sm:$0xff]  }
 0x20a   :  { %4537 = vmatpush1.bf16.msra.mxu0 %v7218_v49  ;;  %5010 = vmatpush1.bf16.msra.mxu1 %v7221_v50  ;;  %v7313_v49 = vld [vmem:[#allocation5 + $0xe2c] ss:$16 sps:$4 sm:$0xff]   ;;  %v176_v50 = vpack.c.bf16 %v154_v44, %v132_v43  ;;  %v7392_v43 = vld [vmem:[#allocation5 + $0xfe0] ss:$16 sps:$4 sm:$0xff]   ;;  %v7395_v44 = vld [vmem:[#allocation5 + $0xfe8] ss:$16 sps:$4 sm:$0xff]  }
 0x20b   :  { %4538 = vmatprep.subr.bf16.mxu0 %v7226_v51  ;;  %5011 = vmatprep.subr.bf16.mxu1 %v7229_v52  ;;  %v7308_v51 = vld [vmem:[#allocation5 + $0xe20] ss:$16 sps:$4 sm:$0xff]   ;;  %v7311_v52 = vld [vmem:[#allocation5 + $0xe28] ss:$16 sps:$4 sm:$0xff]  }
 0x20e   :  { %4539 = vmatpush1.bf16.msra.mxu0 %v7224_v53  ;;  %5012 = vmatpush1.bf16.msra.mxu1 %v7227_v54  ;;  %v7316_v53 = vld [vmem:[#allocation5 + $0xe44] ss:$16 sps:$4 sm:$0xff]   ;;  %v7319_v54 = vld [vmem:[#allocation5 + $0xe4c] ss:$16 sps:$4 sm:$0xff]  }
 0x20f   :  { %4540 = vmatprep.subr.bf16.mxu0 %v7232_v55  ;;  %5013 = vmatprep.subr.bf16.mxu1 %v7235_v56  ;;  %v7314_v55 = vld [vmem:[#allocation5 + $0xe40] ss:$16 sps:$4 sm:$0xff]   ;;  %v7317_v56 = vld [vmem:[#allocation5 + $0xe48] ss:$16 sps:$4 sm:$0xff]  }
 0x212   :  { %4541 = vmatpush1.bf16.msra.mxu0 %v7230_v57  ;;  %5014 = vmatpush1.bf16.msra.mxu1 %v7233_v58  ;;  %v7322_v57 = vld [vmem:[#allocation5 + $0xe64] ss:$16 sps:$4 sm:$0xff]   ;;  %v7325_v58 = vld [vmem:[#allocation5 + $0xe6c] ss:$16 sps:$4 sm:$0xff]  }
 0x213   :  { %4542 = vmatprep.subr.bf16.mxu0 %v7238_v59  ;;  %5015 = vmatprep.subr.bf16.mxu1 %v7241_v60  ;;  %v7320_v59 = vld [vmem:[#allocation5 + $0xe60] ss:$16 sps:$4 sm:$0xff]   ;;  %v7323_v60 = vld [vmem:[#allocation5 + $0xe68] ss:$16 sps:$4 sm:$0xff]  }
 0x216   :  { %4543 = vmatpush1.bf16.msra.mxu0 %v7236_v61  ;;  %5016 = vmatpush1.bf16.msra.mxu1 %v7239_v62  ;;  %v7328_v61 = vld [vmem:[#allocation5 + $0xe84] ss:$16 sps:$4 sm:$0xff]   ;;  %v7331_v62 = vld [vmem:[#allocation5 + $0xe8c] ss:$16 sps:$4 sm:$0xff]  }
 0x217   :  { %4544 = vmatprep.subr.bf16.mxu0 %v7244_v63  ;;  %5017 = vmatprep.subr.bf16.mxu1 %v7247_v0  ;;  %v7326_v63 = vld [vmem:[#allocation5 + $0xe80] ss:$16 sps:$4 sm:$0xff]   ;;  %v7329_v0 = vld [vmem:[#allocation5 + $0xe88] ss:$16 sps:$4 sm:$0xff]  }
 0x21a   :  { %4545 = vmatpush1.bf16.msra.mxu0 %v7242_v1  ;;  %5018 = vmatpush1.bf16.msra.mxu1 %v7245_v2  ;;  %v7334_v1 = vld [vmem:[#allocation5 + $0xea4] ss:$16 sps:$4 sm:$0xff]   ;;  %v7337_v2 = vld [vmem:[#allocation5 + $0xeac] ss:$16 sps:$4 sm:$0xff]  }
 0x21b   :  { %4546 = vmatprep.subr.bf16.mxu0 %v7250_v3  ;;  %5019 = vmatprep.subr.bf16.mxu1 %v7253_v4  ;;  %v7332_v3 = vld [vmem:[#allocation5 + $0xea0] ss:$16 sps:$4 sm:$0xff]   ;;  %v7335_v4 = vld [vmem:[#allocation5 + $0xea8] ss:$16 sps:$4 sm:$0xff]  }
 0x21e   :  { %4547 = vmatpush1.bf16.msra.mxu0 %v7248_v5  ;;  %5020 = vmatpush1.bf16.msra.mxu1 %v7251_v6  ;;  %v7340_v5 = vld [vmem:[#allocation5 + $0xec4] ss:$16 sps:$4 sm:$0xff]   ;;  %v7343_v6 = vld [vmem:[#allocation5 + $0xecc] ss:$16 sps:$4 sm:$0xff]  }
 0x21f   :  { %4548 = vmatprep.subr.bf16.mxu0 %v7256_v7  ;;  %5021 = vmatprep.subr.bf16.mxu1 %v7259_v8  ;;  %v7338_v7 = vld [vmem:[#allocation5 + $0xec0] ss:$16 sps:$4 sm:$0xff]   ;;  %v7341_v8 = vld [vmem:[#allocation5 + $0xec8] ss:$16 sps:$4 sm:$0xff]  }
 0x222   :  { %4549 = vmatpush1.bf16.msra.mxu0 %v7254_v9  ;;  %5022 = vmatpush1.bf16.msra.mxu1 %v7257_v10  ;;  %v7346_v9 = vld [vmem:[#allocation5 + $0xee4] ss:$16 sps:$4 sm:$0xff]   ;;  %v7349_v10 = vld [vmem:[#allocation5 + $0xeec] ss:$16 sps:$4 sm:$0xff]  }
 0x223   :  { %4550 = vmatprep.subr.bf16.mxu0 %v7262_v11  ;;  %5023 = vmatprep.subr.bf16.mxu1 %v7265_v12  ;;  %v7344_v11 = vld [vmem:[#allocation5 + $0xee0] ss:$16 sps:$4 sm:$0xff]   ;;  %v7347_v12 = vld [vmem:[#allocation5 + $0xee8] ss:$16 sps:$4 sm:$0xff]  }
 0x226   :  { %4551 = vmatpush1.bf16.msra.mxu0 %v7260_v13  ;;  %5024 = vmatpush1.bf16.msra.mxu1 %v7263_v14  ;;  %v7352_v13 = vld [vmem:[#allocation5 + $0xf04] ss:$16 sps:$4 sm:$0xff]   ;;  %v7355_v14 = vld [vmem:[#allocation5 + $0xf0c] ss:$16 sps:$4 sm:$0xff]  }
 0x227   :  { %4552 = vmatprep.subr.bf16.mxu0 %v7268_v15  ;;  %5025 = vmatprep.subr.bf16.mxu1 %v7271_v16  ;;  %v7350_v15 = vld [vmem:[#allocation5 + $0xf00] ss:$16 sps:$4 sm:$0xff]   ;;  %v7353_v16 = vld [vmem:[#allocation5 + $0xf08] ss:$16 sps:$4 sm:$0xff]  }
 0x22a   :  { %4553 = vmatpush1.bf16.msra.mxu0 %v7266_v17  ;;  %5026 = vmatpush1.bf16.msra.mxu1 %v7269_v18  ;;  %v7358_v17 = vld [vmem:[#allocation5 + $0xf24] ss:$16 sps:$4 sm:$0xff]   ;;  %v7361_v18 = vld [vmem:[#allocation5 + $0xf2c] ss:$16 sps:$4 sm:$0xff]  }
 0x22b   :  { %4554 = vmatprep.subr.bf16.mxu0 %v7274_v19  ;;  %5027 = vmatprep.subr.bf16.mxu1 %v7277_v20  ;;  %v7356_v19 = vld [vmem:[#allocation5 + $0xf20] ss:$16 sps:$4 sm:$0xff]   ;;  %v7359_v20 = vld [vmem:[#allocation5 + $0xf28] ss:$16 sps:$4 sm:$0xff]  }
 0x22e   :  { %4555 = vmatpush1.bf16.msra.mxu0 %v7272_v21  ;;  %5028 = vmatpush1.bf16.msra.mxu1 %v7275_v22  ;;  %v7364_v21 = vld [vmem:[#allocation5 + $0xf44] ss:$16 sps:$4 sm:$0xff]   ;;  %v7367_v22 = vld [vmem:[#allocation5 + $0xf4c] ss:$16 sps:$4 sm:$0xff]  }
 0x22f   :  { %4556 = vmatprep.subr.bf16.mxu0 %v7280_v23  ;;  %5029 = vmatprep.subr.bf16.mxu1 %v7283_v24  ;;  %v7362_v23 = vld [vmem:[#allocation5 + $0xf40] ss:$16 sps:$4 sm:$0xff]   ;;  %v7365_v24 = vld [vmem:[#allocation5 + $0xf48] ss:$16 sps:$4 sm:$0xff]  }
 0x232   :  { %4557 = vmatpush1.bf16.msra.mxu0 %v7278_v25  ;;  %5030 = vmatpush1.bf16.msra.mxu1 %v7281_v26  ;;  %v7370_v25 = vld [vmem:[#allocation5 + $0xf64] ss:$16 sps:$4 sm:$0xff]   ;;  %v7373_v26 = vld [vmem:[#allocation5 + $0xf6c] ss:$16 sps:$4 sm:$0xff]  }
 0x233   :  { %4558 = vmatprep.subr.bf16.mxu0 %v7286_v27  ;;  %5031 = vmatprep.subr.bf16.mxu1 %v7289_v28  ;;  %v7368_v27 = vld [vmem:[#allocation5 + $0xf60] ss:$16 sps:$4 sm:$0xff]   ;;  %v7371_v28 = vld [vmem:[#allocation5 + $0xf68] ss:$16 sps:$4 sm:$0xff]  }
 0x236   :  { %4559 = vmatpush1.bf16.msra.mxu0 %v7284_v29  ;;  %5032 = vmatpush1.bf16.msra.mxu1 %v7287_v30  ;;  %v7376_v29 = vld [vmem:[#allocation5 + $0xf84] ss:$16 sps:$4 sm:$0xff]   ;;  %v7379_v30 = vld [vmem:[#allocation5 + $0xf8c] ss:$16 sps:$4 sm:$0xff]  }
 0x237   :  { %4560 = vmatprep.subr.bf16.mxu0 %v7292_v31  ;;  %5033 = vmatprep.subr.bf16.mxu1 %v7295_v32  ;;  %v7374_v31 = vld [vmem:[#allocation5 + $0xf80] ss:$16 sps:$4 sm:$0xff]   ;;  %v7377_v32 = vld [vmem:[#allocation5 + $0xf88] ss:$16 sps:$4 sm:$0xff]  }
 0x23a   :  { %4561 = vmatpush1.bf16.msra.mxu0 %v7290_v33  ;;  %5034 = vmatpush1.bf16.msra.mxu1 %v7293_v34  ;;  %v7382_v33 = vld [vmem:[#allocation5 + $0xfa4] ss:$16 sps:$4 sm:$0xff]   ;;  %v7385_v34 = vld [vmem:[#allocation5 + $0xfac] ss:$16 sps:$4 sm:$0xff]  }
 0x23b   :  { %4562 = vmatprep.subr.bf16.mxu0 %v7298_v35  ;;  %5035 = vmatprep.subr.bf16.mxu1 %v7301_v36  ;;  %v7380_v35 = vld [vmem:[#allocation5 + $0xfa0] ss:$16 sps:$4 sm:$0xff]   ;;  %v7383_v36 = vld [vmem:[#allocation5 + $0xfa8] ss:$16 sps:$4 sm:$0xff]  }
 0x23e   :  { %4563 = vmatpush1.bf16.msra.mxu0 %v7296_v37  ;;  %5036 = vmatpush1.bf16.msra.mxu1 %v7299_v38  ;;  %v7388_v37 = vld [vmem:[#allocation5 + $0xfc4] ss:$16 sps:$4 sm:$0xff]   ;;  %v7391_v38 = vld [vmem:[#allocation5 + $0xfcc] ss:$16 sps:$4 sm:$0xff]  }
 0x23f   :  { %4575 = vmatprep.subr.bf16.mxu0 %v7304_v39  ;;  %5048 = vmatprep.subr.bf16.mxu1 %v7307_v40  ;;  %v7386_v39 = vld [vmem:[#allocation5 + $0xfc0] ss:$16 sps:$4 sm:$0xff]   ;;  %v7389_v40 = vld [vmem:[#allocation5 + $0xfc8] ss:$16 sps:$4 sm:$0xff]  }
 0x241   :  { %4565 = vmatmul.mubr.bf16.vlgmr.msra.gmra.mrb[0].mxu0 %v173_v45  ;;  %5038 = vmatmul.mubr.bf16.vlgmr.msra.gmra.mrb[0].mxu1 %v173_v45  ;;  %v131_v45 = vld [vmem:[#allocation2 + $0x70] sm:$0xff] }
 0x242   :  { %4576 = vmatpush1.bf16.msra.mxu0 %v7302_v46  ;;  %5049 = vmatpush1.bf16.msra.mxu1 %v7305_v47  ;;  %v153_v46 = vld [vmem:[#allocation2 + $0x120] sm:$0xff] }
 0x243   :  { %4577 = vmatprep.subr.bf16.mxu0 %v7310_v48  ;;  %5050 = vmatprep.subr.bf16.mxu1 %v7313_v49  ;;  %v7400_v47 = vld [vmem:[#allocation5 + $0x1004] ss:$16 sps:$4 sm:$0xff]   ;;  %v7403_v48 = vld [vmem:[#allocation5 + $0x100c] ss:$16 sps:$4 sm:$0xff]   ;;  %v175_v49 = vpack.c.bf16 %v153_v46, %v131_v45  ;;  %v7482_v45 = vld [vmem:[#allocation5 + $0x11c0] ss:$16 sps:$4 sm:$0xff]  }
 0x244   :  { %4607 = vmatprep.mubr.bf16.mxu0 %v176_v50  ;;  %5080 = vmatprep.mubr.bf16.mxu1 %v176_v50  ;;  %v134_v50 = vld [vmem:[#allocation2 + $0x88] sm:$0xff] }
 0x245   :  { %v7485_v46 = vld [vmem:[#allocation5 + $0x11c8] ss:$16 sps:$4 sm:$0xff]  }
 0x246   :  { %4578 = vmatpush1.bf16.msra.mxu0 %v7308_v51  ;;  %5051 = vmatpush1.bf16.msra.mxu1 %v7311_v52  ;;  %v156_v51 = vld [vmem:[#allocation2 + $0x138] sm:$0xff]  ;;  %v7398_v52 = vld [vmem:[#allocation5 + $0x1000] ss:$16 sps:$4 sm:$0xff]  }
 0x247   :  { %4579 = vmatprep.subr.bf16.mxu0 %v7316_v53  ;;  %5052 = vmatprep.subr.bf16.mxu1 %v7319_v54  ;;  %v7401_v53 = vld [vmem:[#allocation5 + $0x1008] ss:$16 sps:$4 sm:$0xff]   ;;  %v7406_v54 = vld [vmem:[#allocation5 + $0x1024] ss:$16 sps:$4 sm:$0xff]  }
 0x24a   :  { %4580 = vmatpush1.bf16.msra.mxu0 %v7314_v55  ;;  %5053 = vmatpush1.bf16.msra.mxu1 %v7317_v56  ;;  %v7409_v55 = vld [vmem:[#allocation5 + $0x102c] ss:$16 sps:$4 sm:$0xff]   ;;  %v178_v56 = vpack.c.bf16 %v156_v51, %v134_v50  ;;  %v7491_v50 = vld [vmem:[#allocation5 + $0x11e8] ss:$16 sps:$4 sm:$0xff]   ;;  %v133_v51 = vld [vmem:[#allocation2 + $0x80] sm:$0xff] }
 0x24b   :  { %4581 = vmatprep.subr.bf16.mxu0 %v7322_v57  ;;  %5054 = vmatprep.subr.bf16.mxu1 %v7325_v58  ;;  %v7404_v57 = vld [vmem:[#allocation5 + $0x1020] ss:$16 sps:$4 sm:$0xff]   ;;  %v7407_v58 = vld [vmem:[#allocation5 + $0x1028] ss:$16 sps:$4 sm:$0xff]  }
 0x24e   :  { %4582 = vmatpush1.bf16.msra.mxu0 %v7320_v59  ;;  %5055 = vmatpush1.bf16.msra.mxu1 %v7323_v60  ;;  %v7412_v59 = vld [vmem:[#allocation5 + $0x1044] ss:$16 sps:$4 sm:$0xff]   ;;  %v7415_v60 = vld [vmem:[#allocation5 + $0x104c] ss:$16 sps:$4 sm:$0xff]  }
 0x24f   :  { %4583 = vmatprep.subr.bf16.mxu0 %v7328_v61  ;;  %5056 = vmatprep.subr.bf16.mxu1 %v7331_v62  ;;  %v7410_v61 = vld [vmem:[#allocation5 + $0x1040] ss:$16 sps:$4 sm:$0xff]   ;;  %v7413_v62 = vld [vmem:[#allocation5 + $0x1048] ss:$16 sps:$4 sm:$0xff]  }
 0x252   :  { %4584 = vmatpush1.bf16.msra.mxu0 %v7326_v63  ;;  %5057 = vmatpush1.bf16.msra.mxu1 %v7329_v0  ;;  %v7418_v63 = vld [vmem:[#allocation5 + $0x1064] ss:$16 sps:$4 sm:$0xff]   ;;  %v7421_v0 = vld [vmem:[#allocation5 + $0x106c] ss:$16 sps:$4 sm:$0xff]  }
 0x253   :  { %4585 = vmatprep.subr.bf16.mxu0 %v7334_v1  ;;  %5058 = vmatprep.subr.bf16.mxu1 %v7337_v2  ;;  %v7416_v1 = vld [vmem:[#allocation5 + $0x1060] ss:$16 sps:$4 sm:$0xff]   ;;  %v7419_v2 = vld [vmem:[#allocation5 + $0x1068] ss:$16 sps:$4 sm:$0xff]  }
 0x256   :  { %4586 = vmatpush1.bf16.msra.mxu0 %v7332_v3  ;;  %5059 = vmatpush1.bf16.msra.mxu1 %v7335_v4  ;;  %v7424_v3 = vld [vmem:[#allocation5 + $0x1084] ss:$16 sps:$4 sm:$0xff]   ;;  %v7427_v4 = vld [vmem:[#allocation5 + $0x108c] ss:$16 sps:$4 sm:$0xff]  }
 0x257   :  { %4587 = vmatprep.subr.bf16.mxu0 %v7340_v5  ;;  %5060 = vmatprep.subr.bf16.mxu1 %v7343_v6  ;;  %v7422_v5 = vld [vmem:[#allocation5 + $0x1080] ss:$16 sps:$4 sm:$0xff]   ;;  %v7425_v6 = vld [vmem:[#allocation5 + $0x1088] ss:$16 sps:$4 sm:$0xff]  }
 0x25a   :  { %4588 = vmatpush1.bf16.msra.mxu0 %v7338_v7  ;;  %5061 = vmatpush1.bf16.msra.mxu1 %v7341_v8  ;;  %v7430_v7 = vld [vmem:[#allocation5 + $0x10a4] ss:$16 sps:$4 sm:$0xff]   ;;  %v7433_v8 = vld [vmem:[#allocation5 + $0x10ac] ss:$16 sps:$4 sm:$0xff]  }
 0x25b   :  { %4589 = vmatprep.subr.bf16.mxu0 %v7346_v9  ;;  %5062 = vmatprep.subr.bf16.mxu1 %v7349_v10  ;;  %v7428_v9 = vld [vmem:[#allocation5 + $0x10a0] ss:$16 sps:$4 sm:$0xff]   ;;  %v7431_v10 = vld [vmem:[#allocation5 + $0x10a8] ss:$16 sps:$4 sm:$0xff]  }
 0x25e   :  { %4590 = vmatpush1.bf16.msra.mxu0 %v7344_v11  ;;  %5063 = vmatpush1.bf16.msra.mxu1 %v7347_v12  ;;  %v7436_v11 = vld [vmem:[#allocation5 + $0x10c4] ss:$16 sps:$4 sm:$0xff]   ;;  %v7439_v12 = vld [vmem:[#allocation5 + $0x10cc] ss:$16 sps:$4 sm:$0xff]  }
 0x25f   :  { %4591 = vmatprep.subr.bf16.mxu0 %v7352_v13  ;;  %5064 = vmatprep.subr.bf16.mxu1 %v7355_v14  ;;  %v7434_v13 = vld [vmem:[#allocation5 + $0x10c0] ss:$16 sps:$4 sm:$0xff]   ;;  %v7437_v14 = vld [vmem:[#allocation5 + $0x10c8] ss:$16 sps:$4 sm:$0xff]  }
 0x262   :  { %4592 = vmatpush1.bf16.msra.mxu0 %v7350_v15  ;;  %5065 = vmatpush1.bf16.msra.mxu1 %v7353_v16  ;;  %v7442_v15 = vld [vmem:[#allocation5 + $0x10e4] ss:$16 sps:$4 sm:$0xff]   ;;  %v7445_v16 = vld [vmem:[#allocation5 + $0x10ec] ss:$16 sps:$4 sm:$0xff]  }
 0x263   :  { %4593 = vmatprep.subr.bf16.mxu0 %v7358_v17  ;;  %5066 = vmatprep.subr.bf16.mxu1 %v7361_v18  ;;  %v7440_v17 = vld [vmem:[#allocation5 + $0x10e0] ss:$16 sps:$4 sm:$0xff]   ;;  %v7443_v18 = vld [vmem:[#allocation5 + $0x10e8] ss:$16 sps:$4 sm:$0xff]  }
 0x266   :  { %4594 = vmatpush1.bf16.msra.mxu0 %v7356_v19  ;;  %5067 = vmatpush1.bf16.msra.mxu1 %v7359_v20  ;;  %v7448_v19 = vld [vmem:[#allocation5 + $0x1104] ss:$16 sps:$4 sm:$0xff]   ;;  %v7451_v20 = vld [vmem:[#allocation5 + $0x110c] ss:$16 sps:$4 sm:$0xff]  }
 0x267   :  { %4595 = vmatprep.subr.bf16.mxu0 %v7364_v21  ;;  %5068 = vmatprep.subr.bf16.mxu1 %v7367_v22  ;;  %v7446_v21 = vld [vmem:[#allocation5 + $0x1100] ss:$16 sps:$4 sm:$0xff]   ;;  %v7449_v22 = vld [vmem:[#allocation5 + $0x1108] ss:$16 sps:$4 sm:$0xff]  }
 0x26a   :  { %4596 = vmatpush1.bf16.msra.mxu0 %v7362_v23  ;;  %5069 = vmatpush1.bf16.msra.mxu1 %v7365_v24  ;;  %v7454_v23 = vld [vmem:[#allocation5 + $0x1124] ss:$16 sps:$4 sm:$0xff]   ;;  %v7457_v24 = vld [vmem:[#allocation5 + $0x112c] ss:$16 sps:$4 sm:$0xff]  }
 0x26b   :  { %4597 = vmatprep.subr.bf16.mxu0 %v7370_v25  ;;  %5070 = vmatprep.subr.bf16.mxu1 %v7373_v26  ;;  %v7452_v25 = vld [vmem:[#allocation5 + $0x1120] ss:$16 sps:$4 sm:$0xff]   ;;  %v7455_v26 = vld [vmem:[#allocation5 + $0x1128] ss:$16 sps:$4 sm:$0xff]  }
 0x26e   :  { %4598 = vmatpush1.bf16.msra.mxu0 %v7368_v27  ;;  %5071 = vmatpush1.bf16.msra.mxu1 %v7371_v28  ;;  %v7460_v27 = vld [vmem:[#allocation5 + $0x1144] ss:$16 sps:$4 sm:$0xff]   ;;  %v7463_v28 = vld [vmem:[#allocation5 + $0x114c] ss:$16 sps:$4 sm:$0xff]  }
 0x26f   :  { %4599 = vmatprep.subr.bf16.mxu0 %v7376_v29  ;;  %5072 = vmatprep.subr.bf16.mxu1 %v7379_v30  ;;  %v7458_v29 = vld [vmem:[#allocation5 + $0x1140] ss:$16 sps:$4 sm:$0xff]   ;;  %v7461_v30 = vld [vmem:[#allocation5 + $0x1148] ss:$16 sps:$4 sm:$0xff]  }
 0x272   :  { %4600 = vmatpush1.bf16.msra.mxu0 %v7374_v31  ;;  %5073 = vmatpush1.bf16.msra.mxu1 %v7377_v32  ;;  %v7466_v31 = vld [vmem:[#allocation5 + $0x1164] ss:$16 sps:$4 sm:$0xff]   ;;  %v7469_v32 = vld [vmem:[#allocation5 + $0x116c] ss:$16 sps:$4 sm:$0xff]  }
 0x273   :  { %4601 = vmatprep.subr.bf16.mxu0 %v7382_v33  ;;  %5074 = vmatprep.subr.bf16.mxu1 %v7385_v34  ;;  %v7464_v33 = vld [vmem:[#allocation5 + $0x1160] ss:$16 sps:$4 sm:$0xff]   ;;  %v7467_v34 = vld [vmem:[#allocation5 + $0x1168] ss:$16 sps:$4 sm:$0xff]  }
 0x276   :  { %4602 = vmatpush1.bf16.msra.mxu0 %v7380_v35  ;;  %5075 = vmatpush1.bf16.msra.mxu1 %v7383_v36  ;;  %v7472_v35 = vld [vmem:[#allocation5 + $0x1184] ss:$16 sps:$4 sm:$0xff]   ;;  %v7475_v36 = vld [vmem:[#allocation5 + $0x118c] ss:$16 sps:$4 sm:$0xff]  }
 0x277   :  { %4603 = vmatprep.subr.bf16.mxu0 %v7388_v37  ;;  %5076 = vmatprep.subr.bf16.mxu1 %v7391_v38  ;;  %v7470_v37 = vld [vmem:[#allocation5 + $0x1180] ss:$16 sps:$4 sm:$0xff]   ;;  %v7473_v38 = vld [vmem:[#allocation5 + $0x1188] ss:$16 sps:$4 sm:$0xff]  }
 0x27a   :  { %4604 = vmatpush1.bf16.msra.mxu0 %v7386_v39  ;;  %5077 = vmatpush1.bf16.msra.mxu1 %v7389_v40  ;;  %v7478_v39 = vld [vmem:[#allocation5 + $0x11a4] ss:$16 sps:$4 sm:$0xff]   ;;  %v7481_v40 = vld [vmem:[#allocation5 + $0x11ac] ss:$16 sps:$4 sm:$0xff]  }
 0x27b   :  { %4605 = vmatprep.subr.bf16.mxu0 %v7394_v41  ;;  %5078 = vmatprep.subr.bf16.mxu1 %v7397_v42  ;;  %v7476_v41 = vld [vmem:[#allocation5 + $0x11a0] ss:$16 sps:$4 sm:$0xff]   ;;  %v7479_v42 = vld [vmem:[#allocation5 + $0x11a8] ss:$16 sps:$4 sm:$0xff]  }
 0x27e   :  { %4606 = vmatpush1.bf16.msra.mxu0 %v7392_v43  ;;  %5079 = vmatpush1.bf16.msra.mxu1 %v7395_v44  ;;  %v7484_v43 = vld [vmem:[#allocation5 + $0x11c4] ss:$16 sps:$4 sm:$0xff]   ;;  %v7487_v44 = vld [vmem:[#allocation5 + $0x11cc] ss:$16 sps:$4 sm:$0xff]  }
 0x27f   :  { %4618 = vmatprep.subr.bf16.mxu0 %v7400_v47  ;;  %5091 = vmatprep.subr.bf16.mxu1 %v7403_v48  ;;  %v7490_v47 = vld [vmem:[#allocation5 + $0x11e4] ss:$16 sps:$4 sm:$0xff]   ;;  %v7493_v48 = vld [vmem:[#allocation5 + $0x11ec] ss:$16 sps:$4 sm:$0xff]  }
 0x281   :  { %4608 = vmatmul.mubr.bf16.vlgmr.msra.gmra.mrb[0].mxu0 %v175_v49  ;;  %5081 = vmatmul.mubr.bf16.vlgmr.msra.gmra.mrb[0].mxu1 %v175_v49  ;;  %v7488_v49 = vld [vmem:[#allocation5 + $0x11e0] ss:$16 sps:$4 sm:$0xff]  }
 0x282   :  { %4619 = vmatpush1.bf16.msra.mxu0 %v7398_v52  ;;  %5092 = vmatpush1.bf16.msra.mxu1 %v7401_v53  ;;  %v155_v52 = vld [vmem:[#allocation2 + $0x130] sm:$0xff] }
 0x283   :  { %4620 = vmatprep.subr.bf16.mxu0 %v7406_v54  ;;  %5093 = vmatprep.subr.bf16.mxu1 %v7409_v55  ;;  %v7496_v53 = vld [vmem:[#allocation5 + $0x1204] ss:$16 sps:$4 sm:$0xff]   ;;  %v7499_v54 = vld [vmem:[#allocation5 + $0x120c] ss:$16 sps:$4 sm:$0xff]   ;;  %v177_v55 = vpack.c.bf16 %v155_v52, %v133_v51  ;;  %v7578_v51 = vld [vmem:[#allocation5 + $0x13c0] ss:$16 sps:$4 sm:$0xff]  }
 0x284   :  { %4650 = vmatprep.mubr.bf16.mxu0 %v178_v56  ;;  %5123 = vmatprep.mubr.bf16.mxu1 %v178_v56  ;;  %v136_v56 = vld [vmem:[#allocation2 + $0x98] sm:$0xff] }
 0x285   :  { %v7581_v52 = vld [vmem:[#allocation5 + $0x13c8] ss:$16 sps:$4 sm:$0xff]  }
 0x286   :  { %4621 = vmatpush1.bf16.msra.mxu0 %v7404_v57  ;;  %5094 = vmatpush1.bf16.msra.mxu1 %v7407_v58  ;;  %v158_v57 = vld [vmem:[#allocation2 + $0x148] sm:$0xff]  ;;  %v7494_v58 = vld [vmem:[#allocation5 + $0x1200] ss:$16 sps:$4 sm:$0xff]  }
 0x287   :  { %4622 = vmatprep.subr.bf16.mxu0 %v7412_v59  ;;  %5095 = vmatprep.subr.bf16.mxu1 %v7415_v60  ;;  %v7497_v59 = vld [vmem:[#allocation5 + $0x1208] ss:$16 sps:$4 sm:$0xff]   ;;  %v7502_v60 = vld [vmem:[#allocation5 + $0x1224] ss:$16 sps:$4 sm:$0xff]  }
 0x28a   :  { %4623 = vmatpush1.bf16.msra.mxu0 %v7410_v61  ;;  %5096 = vmatpush1.bf16.msra.mxu1 %v7413_v62  ;;  %v7505_v61 = vld [vmem:[#allocation5 + $0x122c] ss:$16 sps:$4 sm:$0xff]   ;;  %v180_v62 = vpack.c.bf16 %v158_v57, %v136_v56  ;;  %v7587_v56 = vld [vmem:[#allocation5 + $0x13e8] ss:$16 sps:$4 sm:$0xff]   ;;  %v135_v57 = vld [vmem:[#allocation2 + $0x90] sm:$0xff] }
 0x28b   :  { %4624 = vmatprep.subr.bf16.mxu0 %v7418_v63  ;;  %5097 = vmatprep.subr.bf16.mxu1 %v7421_v0  ;;  %v7500_v63 = vld [vmem:[#allocation5 + $0x1220] ss:$16 sps:$4 sm:$0xff]   ;;  %v7503_v0 = vld [vmem:[#allocation5 + $0x1228] ss:$16 sps:$4 sm:$0xff]  }
 0x28e   :  { %4625 = vmatpush1.bf16.msra.mxu0 %v7416_v1  ;;  %5098 = vmatpush1.bf16.msra.mxu1 %v7419_v2  ;;  %v7508_v1 = vld [vmem:[#allocation5 + $0x1244] ss:$16 sps:$4 sm:$0xff]   ;;  %v7511_v2 = vld [vmem:[#allocation5 + $0x124c] ss:$16 sps:$4 sm:$0xff]  }
 0x28f   :  { %4626 = vmatprep.subr.bf16.mxu0 %v7424_v3  ;;  %5099 = vmatprep.subr.bf16.mxu1 %v7427_v4  ;;  %v7506_v3 = vld [vmem:[#allocation5 + $0x1240] ss:$16 sps:$4 sm:$0xff]   ;;  %v7509_v4 = vld [vmem:[#allocation5 + $0x1248] ss:$16 sps:$4 sm:$0xff]  }
 0x292   :  { %4627 = vmatpush1.bf16.msra.mxu0 %v7422_v5  ;;  %5100 = vmatpush1.bf16.msra.mxu1 %v7425_v6  ;;  %v7514_v5 = vld [vmem:[#allocation5 + $0x1264] ss:$16 sps:$4 sm:$0xff]   ;;  %v7517_v6 = vld [vmem:[#allocation5 + $0x126c] ss:$16 sps:$4 sm:$0xff]  }
 0x293   :  { %4628 = vmatprep.subr.bf16.mxu0 %v7430_v7  ;;  %5101 = vmatprep.subr.bf16.mxu1 %v7433_v8  ;;  %v7512_v7 = vld [vmem:[#allocation5 + $0x1260] ss:$16 sps:$4 sm:$0xff]   ;;  %v7515_v8 = vld [vmem:[#allocation5 + $0x1268] ss:$16 sps:$4 sm:$0xff]  }
 0x296   :  { %4629 = vmatpush1.bf16.msra.mxu0 %v7428_v9  ;;  %5102 = vmatpush1.bf16.msra.mxu1 %v7431_v10  ;;  %v7520_v9 = vld [vmem:[#allocation5 + $0x1284] ss:$16 sps:$4 sm:$0xff]   ;;  %v7523_v10 = vld [vmem:[#allocation5 + $0x128c] ss:$16 sps:$4 sm:$0xff]  }
 0x297   :  { %4630 = vmatprep.subr.bf16.mxu0 %v7436_v11  ;;  %5103 = vmatprep.subr.bf16.mxu1 %v7439_v12  ;;  %v7518_v11 = vld [vmem:[#allocation5 + $0x1280] ss:$16 sps:$4 sm:$0xff]   ;;  %v7521_v12 = vld [vmem:[#allocation5 + $0x1288] ss:$16 sps:$4 sm:$0xff]  }
 0x29a   :  { %4631 = vmatpush1.bf16.msra.mxu0 %v7434_v13  ;;  %5104 = vmatpush1.bf16.msra.mxu1 %v7437_v14  ;;  %v7526_v13 = vld [vmem:[#allocation5 + $0x12a4] ss:$16 sps:$4 sm:$0xff]   ;;  %v7529_v14 = vld [vmem:[#allocation5 + $0x12ac] ss:$16 sps:$4 sm:$0xff]  }
 0x29b   :  { %4632 = vmatprep.subr.bf16.mxu0 %v7442_v15  ;;  %5105 = vmatprep.subr.bf16.mxu1 %v7445_v16  ;;  %v7524_v15 = vld [vmem:[#allocation5 + $0x12a0] ss:$16 sps:$4 sm:$0xff]   ;;  %v7527_v16 = vld [vmem:[#allocation5 + $0x12a8] ss:$16 sps:$4 sm:$0xff]  }
 0x29e   :  { %4633 = vmatpush1.bf16.msra.mxu0 %v7440_v17  ;;  %5106 = vmatpush1.bf16.msra.mxu1 %v7443_v18  ;;  %v7532_v17 = vld [vmem:[#allocation5 + $0x12c4] ss:$16 sps:$4 sm:$0xff]   ;;  %v7535_v18 = vld [vmem:[#allocation5 + $0x12cc] ss:$16 sps:$4 sm:$0xff]  }
 0x29f   :  { %4634 = vmatprep.subr.bf16.mxu0 %v7448_v19  ;;  %5107 = vmatprep.subr.bf16.mxu1 %v7451_v20  ;;  %v7530_v19 = vld [vmem:[#allocation5 + $0x12c0] ss:$16 sps:$4 sm:$0xff]   ;;  %v7533_v20 = vld [vmem:[#allocation5 + $0x12c8] ss:$16 sps:$4 sm:$0xff]  }
 0x2a2   :  { %4635 = vmatpush1.bf16.msra.mxu0 %v7446_v21  ;;  %5108 = vmatpush1.bf16.msra.mxu1 %v7449_v22  ;;  %v7538_v21 = vld [vmem:[#allocation5 + $0x12e4] ss:$16 sps:$4 sm:$0xff]   ;;  %v7541_v22 = vld [vmem:[#allocation5 + $0x12ec] ss:$16 sps:$4 sm:$0xff]  }
 0x2a3   :  { %4636 = vmatprep.subr.bf16.mxu0 %v7454_v23  ;;  %5109 = vmatprep.subr.bf16.mxu1 %v7457_v24  ;;  %v7536_v23 = vld [vmem:[#allocation5 + $0x12e0] ss:$16 sps:$4 sm:$0xff]   ;;  %v7539_v24 = vld [vmem:[#allocation5 + $0x12e8] ss:$16 sps:$4 sm:$0xff]  }
 0x2a6   :  { %4637 = vmatpush1.bf16.msra.mxu0 %v7452_v25  ;;  %5110 = vmatpush1.bf16.msra.mxu1 %v7455_v26  ;;  %v7544_v25 = vld [vmem:[#allocation5 + $0x1304] ss:$16 sps:$4 sm:$0xff]   ;;  %v7547_v26 = vld [vmem:[#allocation5 + $0x130c] ss:$16 sps:$4 sm:$0xff]  }
 0x2a7   :  { %4638 = vmatprep.subr.bf16.mxu0 %v7460_v27  ;;  %5111 = vmatprep.subr.bf16.mxu1 %v7463_v28  ;;  %v7542_v27 = vld [vmem:[#allocation5 + $0x1300] ss:$16 sps:$4 sm:$0xff]   ;;  %v7545_v28 = vld [vmem:[#allocation5 + $0x1308] ss:$16 sps:$4 sm:$0xff]  }
 0x2aa   :  { %4639 = vmatpush1.bf16.msra.mxu0 %v7458_v29  ;;  %5112 = vmatpush1.bf16.msra.mxu1 %v7461_v30  ;;  %v7550_v29 = vld [vmem:[#allocation5 + $0x1324] ss:$16 sps:$4 sm:$0xff]   ;;  %v7553_v30 = vld [vmem:[#allocation5 + $0x132c] ss:$16 sps:$4 sm:$0xff]  }
 0x2ab   :  { %4640 = vmatprep.subr.bf16.mxu0 %v7466_v31  ;;  %5113 = vmatprep.subr.bf16.mxu1 %v7469_v32  ;;  %v7548_v31 = vld [vmem:[#allocation5 + $0x1320] ss:$16 sps:$4 sm:$0xff]   ;;  %v7551_v32 = vld [vmem:[#allocation5 + $0x1328] ss:$16 sps:$4 sm:$0xff]  }
 0x2ae   :  { %4641 = vmatpush1.bf16.msra.mxu0 %v7464_v33  ;;  %5114 = vmatpush1.bf16.msra.mxu1 %v7467_v34  ;;  %v7556_v33 = vld [vmem:[#allocation5 + $0x1344] ss:$16 sps:$4 sm:$0xff]   ;;  %v7559_v34 = vld [vmem:[#allocation5 + $0x134c] ss:$16 sps:$4 sm:$0xff]  }
 0x2af   :  { %4642 = vmatprep.subr.bf16.mxu0 %v7472_v35  ;;  %5115 = vmatprep.subr.bf16.mxu1 %v7475_v36  ;;  %v7554_v35 = vld [vmem:[#allocation5 + $0x1340] ss:$16 sps:$4 sm:$0xff]   ;;  %v7557_v36 = vld [vmem:[#allocation5 + $0x1348] ss:$16 sps:$4 sm:$0xff]  }
 0x2b2   :  { %4643 = vmatpush1.bf16.msra.mxu0 %v7470_v37  ;;  %5116 = vmatpush1.bf16.msra.mxu1 %v7473_v38  ;;  %v7562_v37 = vld [vmem:[#allocation5 + $0x1364] ss:$16 sps:$4 sm:$0xff]   ;;  %v7565_v38 = vld [vmem:[#allocation5 + $0x136c] ss:$16 sps:$4 sm:$0xff]  }
 0x2b3   :  { %4644 = vmatprep.subr.bf16.mxu0 %v7478_v39  ;;  %5117 = vmatprep.subr.bf16.mxu1 %v7481_v40  ;;  %v7560_v39 = vld [vmem:[#allocation5 + $0x1360] ss:$16 sps:$4 sm:$0xff]   ;;  %v7563_v40 = vld [vmem:[#allocation5 + $0x1368] ss:$16 sps:$4 sm:$0xff]  }
 0x2b6   :  { %4645 = vmatpush1.bf16.msra.mxu0 %v7476_v41  ;;  %5118 = vmatpush1.bf16.msra.mxu1 %v7479_v42  ;;  %v7568_v41 = vld [vmem:[#allocation5 + $0x1384] ss:$16 sps:$4 sm:$0xff]   ;;  %v7571_v42 = vld [vmem:[#allocation5 + $0x138c] ss:$16 sps:$4 sm:$0xff]  }
 0x2b7   :  { %4646 = vmatprep.subr.bf16.mxu0 %v7484_v43  ;;  %5119 = vmatprep.subr.bf16.mxu1 %v7487_v44  ;;  %v7566_v43 = vld [vmem:[#allocation5 + $0x1380] ss:$16 sps:$4 sm:$0xff]   ;;  %v7569_v44 = vld [vmem:[#allocation5 + $0x1388] ss:$16 sps:$4 sm:$0xff]  }
 0x2ba   :  { %4647 = vmatpush1.bf16.msra.mxu0 %v7482_v45  ;;  %5120 = vmatpush1.bf16.msra.mxu1 %v7485_v46  ;;  %v7574_v45 = vld [vmem:[#allocation5 + $0x13a4] ss:$16 sps:$4 sm:$0xff]   ;;  %v7577_v46 = vld [vmem:[#allocation5 + $0x13ac] ss:$16 sps:$4 sm:$0xff]  }
 0x2bb   :  { %4648 = vmatprep.subr.bf16.mxu0 %v7490_v47  ;;  %5121 = vmatprep.subr.bf16.mxu1 %v7493_v48  ;;  %v7572_v47 = vld [vmem:[#allocation5 + $0x13a0] ss:$16 sps:$4 sm:$0xff]   ;;  %v7575_v48 = vld [vmem:[#allocation5 + $0x13a8] ss:$16 sps:$4 sm:$0xff]  }
 0x2be   :  { %4649 = vmatpush1.bf16.msra.mxu0 %v7488_v49  ;;  %5122 = vmatpush1.bf16.msra.mxu1 %v7491_v50  ;;  %v7580_v49 = vld [vmem:[#allocation5 + $0x13c4] ss:$16 sps:$4 sm:$0xff]   ;;  %v7583_v50 = vld [vmem:[#allocation5 + $0x13cc] ss:$16 sps:$4 sm:$0xff]  }
 0x2bf   :  { %4661 = vmatprep.subr.bf16.mxu0 %v7496_v53  ;;  %5134 = vmatprep.subr.bf16.mxu1 %v7499_v54  ;;  %v7586_v53 = vld [vmem:[#allocation5 + $0x13e4] ss:$16 sps:$4 sm:$0xff]   ;;  %v7589_v54 = vld [vmem:[#allocation5 + $0x13ec] ss:$16 sps:$4 sm:$0xff]  }
 0x2c1   :  { %4651 = vmatmul.mubr.bf16.vlgmr.msra.gmra.mrb[0].mxu0 %v177_v55  ;;  %5124 = vmatmul.mubr.bf16.vlgmr.msra.gmra.mrb[0].mxu1 %v177_v55  ;;  %v7584_v55 = vld [vmem:[#allocation5 + $0x13e0] ss:$16 sps:$4 sm:$0xff]  }
 0x2c2   :  { %4662 = vmatpush1.bf16.msra.mxu0 %v7494_v58  ;;  %5135 = vmatpush1.bf16.msra.mxu1 %v7497_v59  ;;  %v157_v58 = vld [vmem:[#allocation2 + $0x140] sm:$0xff] }
 0x2c3   :  { %4663 = vmatprep.subr.bf16.mxu0 %v7502_v60  ;;  %5136 = vmatprep.subr.bf16.mxu1 %v7505_v61  ;;  %v7592_v59 = vld [vmem:[#allocation5 + $0x1404] ss:$16 sps:$4 sm:$0xff]   ;;  %v7595_v60 = vld [vmem:[#allocation5 + $0x140c] ss:$16 sps:$4 sm:$0xff]   ;;  %v179_v61 = vpack.c.bf16 %v157_v58, %v135_v57 }
 0x2c4   :  { %4693 = vmatprep.mubr.bf16.mxu0 %v180_v62  ;;  %5166 = vmatprep.mubr.bf16.mxu1 %v180_v62  ;;  %v138_v62 = vld [vmem:[#allocation2 + $0xa8] sm:$0xff] }
 0x2c5   :  { %v7661_v57 = vld [vmem:[#allocation8 + $0xe0] sm:$0xff]  }
 0x2c6   :  { %4664 = vmatpush1.bf16.msra.mxu0 %v7500_v63  ;;  %5137 = vmatpush1.bf16.msra.mxu1 %v7503_v0  ;;  %v160_v63 = vld [vmem:[#allocation2 + $0x158] sm:$0xff]  ;;  %v7590_v0 = vld [vmem:[#allocation5 + $0x1400] ss:$16 sps:$4 sm:$0xff]   ;;  %v7662_v58 = vld [vmem:[#allocation8 + $0x20] sm:$0xff]  }
 0x2c7   :  { %4665 = vmatprep.subr.bf16.mxu0 %v7508_v1  ;;  %5138 = vmatprep.subr.bf16.mxu1 %v7511_v2  ;;  %v7593_v1 = vld [vmem:[#allocation5 + $0x1408] ss:$16 sps:$4 sm:$0xff]   ;;  %v7598_v2 = vld [vmem:[#allocation5 + $0x1424] ss:$16 sps:$4 sm:$0xff]  }
 0x2ca   :  { %4666 = vmatpush1.bf16.msra.mxu0 %v7506_v3  ;;  %5139 = vmatpush1.bf16.msra.mxu1 %v7509_v4  ;;  %v7601_v3 = vld [vmem:[#allocation5 + $0x142c] ss:$16 sps:$4 sm:$0xff]   ;;  %v182_v4 = vpack.c.bf16 %v160_v63, %v138_v62 }
 0x2cb   :  { %4667 = vmatprep.subr.bf16.mxu0 %v7514_v5  ;;  %5140 = vmatprep.subr.bf16.mxu1 %v7517_v6  ;;  %v7596_v5 = vld [vmem:[#allocation5 + $0x1420] ss:$16 sps:$4 sm:$0xff]   ;;  %v7599_v6 = vld [vmem:[#allocation5 + $0x1428] ss:$16 sps:$4 sm:$0xff]  }
 0x2cc   :  { %v7666_v62 = vld [vmem:[#allocation8 + $0x28] sm:$0xff]  }
 0x2cd   :  { %v7667_v63 = vld [vmem:[#allocation8 + $0xa8] sm:$0xff]  }
 0x2ce   :  { %4668 = vmatpush1.bf16.msra.mxu0 %v7512_v7  ;;  %5141 = vmatpush1.bf16.msra.mxu1 %v7515_v8  ;;  %v7604_v7 = vld [vmem:[#allocation5 + $0x1444] ss:$16 sps:$4 sm:$0xff]   ;;  %v7607_v8 = vld [vmem:[#allocation5 + $0x144c] ss:$16 sps:$4 sm:$0xff]  }
 0x2cf   :  { %4669 = vmatprep.subr.bf16.mxu0 %v7520_v9  ;;  %5142 = vmatprep.subr.bf16.mxu1 %v7523_v10  ;;  %v7602_v9 = vld [vmem:[#allocation5 + $0x1440] ss:$16 sps:$4 sm:$0xff]   ;;  %v7605_v10 = vld [vmem:[#allocation5 + $0x1448] ss:$16 sps:$4 sm:$0xff]  }
 0x2d2   :  { %4670 = vmatpush1.bf16.msra.mxu0 %v7518_v11  ;;  %5143 = vmatpush1.bf16.msra.mxu1 %v7521_v12  ;;  %v7610_v11 = vld [vmem:[#allocation5 + $0x1464] ss:$16 sps:$4 sm:$0xff]   ;;  %v7613_v12 = vld [vmem:[#allocation5 + $0x146c] ss:$16 sps:$4 sm:$0xff]  }
 0x2d3   :  { %4671 = vmatprep.subr.bf16.mxu0 %v7526_v13  ;;  %5144 = vmatprep.subr.bf16.mxu1 %v7529_v14  ;;  %v7608_v13 = vld [vmem:[#allocation5 + $0x1460] ss:$16 sps:$4 sm:$0xff]   ;;  %v7611_v14 = vld [vmem:[#allocation5 + $0x1468] ss:$16 sps:$4 sm:$0xff]  }
 0x2d6   :  { %4672 = vmatpush1.bf16.msra.mxu0 %v7524_v15  ;;  %5145 = vmatpush1.bf16.msra.mxu1 %v7527_v16  ;;  %v7616_v15 = vld [vmem:[#allocation5 + $0x1484] ss:$16 sps:$4 sm:$0xff]   ;;  %v7619_v16 = vld [vmem:[#allocation5 + $0x148c] ss:$16 sps:$4 sm:$0xff]  }
 0x2d7   :  { %4673 = vmatprep.subr.bf16.mxu0 %v7532_v17  ;;  %5146 = vmatprep.subr.bf16.mxu1 %v7535_v18  ;;  %v7614_v17 = vld [vmem:[#allocation5 + $0x1480] ss:$16 sps:$4 sm:$0xff]   ;;  %v7617_v18 = vld [vmem:[#allocation5 + $0x1488] ss:$16 sps:$4 sm:$0xff]  }
 0x2da   :  { %4674 = vmatpush1.bf16.msra.mxu0 %v7530_v19  ;;  %5147 = vmatpush1.bf16.msra.mxu1 %v7533_v20  ;;  %v7622_v19 = vld [vmem:[#allocation5 + $0x14a4] ss:$16 sps:$4 sm:$0xff]   ;;  %v7625_v20 = vld [vmem:[#allocation5 + $0x14ac] ss:$16 sps:$4 sm:$0xff]  }
 0x2db   :  { %4675 = vmatprep.subr.bf16.mxu0 %v7538_v21  ;;  %5148 = vmatprep.subr.bf16.mxu1 %v7541_v22  ;;  %v7620_v21 = vld [vmem:[#allocation5 + $0x14a0] ss:$16 sps:$4 sm:$0xff]   ;;  %v7623_v22 = vld [vmem:[#allocation5 + $0x14a8] ss:$16 sps:$4 sm:$0xff]  }
 0x2de   :  { %4676 = vmatpush1.bf16.msra.mxu0 %v7536_v23  ;;  %5149 = vmatpush1.bf16.msra.mxu1 %v7539_v24  ;;  %v7628_v23 = vld [vmem:[#allocation5 + $0x14c4] ss:$16 sps:$4 sm:$0xff]   ;;  %v7631_v24 = vld [vmem:[#allocation5 + $0x14cc] ss:$16 sps:$4 sm:$0xff]  }
 0x2df   :  { %4677 = vmatprep.subr.bf16.mxu0 %v7544_v25  ;;  %5150 = vmatprep.subr.bf16.mxu1 %v7547_v26  ;;  %v7626_v25 = vld [vmem:[#allocation5 + $0x14c0] ss:$16 sps:$4 sm:$0xff]   ;;  %v7629_v26 = vld [vmem:[#allocation5 + $0x14c8] ss:$16 sps:$4 sm:$0xff]  }
 0x2e2   :  { %4678 = vmatpush1.bf16.msra.mxu0 %v7542_v27  ;;  %5151 = vmatpush1.bf16.msra.mxu1 %v7545_v28  ;;  %v7634_v27 = vld [vmem:[#allocation5 + $0x14e4] ss:$16 sps:$4 sm:$0xff]   ;;  %v7637_v28 = vld [vmem:[#allocation5 + $0x14ec] ss:$16 sps:$4 sm:$0xff]  }
 0x2e3   :  { %4679 = vmatprep.subr.bf16.mxu0 %v7550_v29  ;;  %5152 = vmatprep.subr.bf16.mxu1 %v7553_v30  ;;  %v7632_v29 = vld [vmem:[#allocation5 + $0x14e0] ss:$16 sps:$4 sm:$0xff]   ;;  %v7635_v30 = vld [vmem:[#allocation5 + $0x14e8] ss:$16 sps:$4 sm:$0xff]  }
 0x2e6   :  { %4680 = vmatpush1.bf16.msra.mxu0 %v7548_v31  ;;  %5153 = vmatpush1.bf16.msra.mxu1 %v7551_v32  ;;  %v7638_v31 = vld [vmem:[#allocation5 + $0x1504] ss:$16 sps:$4 sm:$0x3f]   ;;  %v7640_v32 = vld [vmem:[#allocation5 + $0x150c] ss:$16 sps:$4 sm:$0x3f]  }
 0x2e7   :  { %4681 = vmatprep.subr.bf16.mxu0 %v7556_v33  ;;  %5154 = vmatprep.subr.bf16.mxu1 %v7559_v34  ;;  %v7642_v33 = vld [vmem:[#allocation5 + $0x1500] ss:$16 sps:$4 sm:$0x3f]   ;;  %v7643_v34 = vld [vmem:[#allocation5 + $0x1508] ss:$16 sps:$4 sm:$0x3f]  }
 0x2ea   :  { %4682 = vmatpush1.bf16.msra.mxu0 %v7554_v35  ;;  %5155 = vmatpush1.bf16.msra.mxu1 %v7557_v36  ;;  %v137_v35 = vld [vmem:[#allocation2 + $0xa0] sm:$0xff]  ;;  %v159_v36 = vld [vmem:[#allocation2 + $0x150] sm:$0xff] }
 0x2eb   :  { %4683 = vmatprep.subr.bf16.mxu0 %v7562_v37  ;;  %5156 = vmatprep.subr.bf16.mxu1 %v7565_v38  ;;  %v4263_v37 = vsel %vm4261_vm1, %v7642_v33, 0  ;;  %v4269_v38 = vsel %vm4261_vm1, %v7643_v34, 0 }
 0x2ee   :  { %4684 = vmatpush1.bf16.msra.mxu0 %v7560_v39  ;;  %5157 = vmatpush1.bf16.msra.mxu1 %v7563_v40  ;;  %v7644_v39 = vld [vmem:[#allocation8 + $0x40] sm:$0xff]  }
 0x2ef   :  { %4685 = vmatprep.subr.bf16.mxu0 %v7568_v41  ;;  %5158 = vmatprep.subr.bf16.mxu1 %v7571_v42  ;;  %v7645_v40 = vld [vmem:[#allocation8 + $0xc0] sm:$0xff]   ;;  %v181_v41 = vpack.c.bf16 %v159_v36, %v137_v35 }
 0x2f0   :  { %v7646_v42 = vld [vmem:[#allocation8] sm:$0xff]  }
 0x2f2   :  { %4686 = vmatpush1.bf16.msra.mxu0 %v7566_v43  ;;  %5159 = vmatpush1.bf16.msra.mxu1 %v7569_v44  ;;  %v7647_v43 = vld [vmem:[#allocation8 + $0x80] sm:$0xff]   ;;  %v7648_v44 = vld [vmem:[#allocation8 + $0x48] sm:$0xff]  }
 0x2f3   :  { %4687 = vmatprep.subr.bf16.mxu0 %v7574_v45  ;;  %5160 = vmatprep.subr.bf16.mxu1 %v7577_v46  ;;  %v7649_v45 = vld [vmem:[#allocation8 + $0xc8] sm:$0xff]  }
 0x2f4   :  { %v7650_v46 = vld [vmem:[#allocation8 + $0x8] sm:$0xff]  }
 0x2f6   :  { %4688 = vmatpush1.bf16.msra.mxu0 %v7572_v47  ;;  %5161 = vmatpush1.bf16.msra.mxu1 %v7575_v48  ;;  %v7651_v47 = vld [vmem:[#allocation8 + $0x88] sm:$0xff]   ;;  %v7652_v48 = vld [vmem:[#allocation8 + $0x50] sm:$0xff]  }
 0x2f7   :  { %4689 = vmatprep.subr.bf16.mxu0 %v7580_v49  ;;  %5162 = vmatprep.subr.bf16.mxu1 %v7583_v50  ;;  %v7653_v49 = vld [vmem:[#allocation8 + $0xd0] sm:$0xff]  }
 0x2f8   :  { %v7654_v50 = vld [vmem:[#allocation8 + $0x10] sm:$0xff]  }
 0x2fa   :  { %4690 = vmatpush1.bf16.msra.mxu0 %v7578_v51  ;;  %5163 = vmatpush1.bf16.msra.mxu1 %v7581_v52  ;;  %v7655_v51 = vld [vmem:[#allocation8 + $0x90] sm:$0xff]   ;;  %v7656_v52 = vld [vmem:[#allocation8 + $0x58] sm:$0xff]  }
 0x2fb   :  { %4691 = vmatprep.subr.bf16.mxu0 %v7586_v53  ;;  %5164 = vmatprep.subr.bf16.mxu1 %v7589_v54  ;;  %v7657_v53 = vld [vmem:[#allocation8 + $0xd8] sm:$0xff]  }
 0x2fc   :  { %v7658_v54 = vld [vmem:[#allocation8 + $0x18] sm:$0xff]  }
 0x2fe   :  { %4692 = vmatpush1.bf16.msra.mxu0 %v7584_v55  ;;  %5165 = vmatpush1.bf16.msra.mxu1 %v7587_v56  ;;  %v7659_v55 = vld [vmem:[#allocation8 + $0x98] sm:$0xff]   ;;  %v7660_v56 = vld [vmem:[#allocation8 + $0x60] sm:$0xff]  }
 0x2ff   :  { %4704 = vmatprep.subr.bf16.mxu0 %v7592_v59  ;;  %5177 = vmatprep.subr.bf16.mxu1 %v7595_v60  ;;  %v7663_v59 = vld [vmem:[#allocation8 + $0xa0] sm:$0xff]   ;;  %v7664_v60 = vld [vmem:[#allocation8 + $0x68] sm:$0xff]  }
 0x301   :  { %4694 = vmatmul.mubr.bf16.vlgmr.msra.gmra.mrb[0].mxu0 %v179_v61  ;;  %5167 = vmatmul.mubr.bf16.vlgmr.msra.gmra.mrb[0].mxu1 %v179_v61  ;;  %v7665_v61 = vld [vmem:[#allocation8 + $0xe8] sm:$0xff]  }
 0x302   :  { %4705 = vmatpush1.bf16.msra.mxu0 %v7590_v0  ;;  %5178 = vmatpush1.bf16.msra.mxu1 %v7593_v1  ;;  %v7668_v0 = vld [vmem:[#allocation8 + $0x70] sm:$0xff]  }
 0x303   :  { %4706 = vmatprep.subr.bf16.mxu0 %v7598_v2  ;;  %5179 = vmatprep.subr.bf16.mxu1 %v7601_v3  ;;  %v7669_v1 = vld [vmem:[#allocation8 + $0xf0] sm:$0xff]  }
 0x304   :  { %6399 = vmatprep.mubr.msk.bf16.mxu0 %vm4257_vm0, %v182_v4  ;;  %6401 = vmatprep.mubr.msk.bf16.mxu1 %vm4257_vm0, %v182_v4  ;;  %v7670_v2 = vld [vmem:[#allocation8 + $0x30] sm:$0xff]   ;;  %v7672_v4 = vld [vmem:[#allocation8 + $0x78] sm:$0xff]  }
 0x305   :  { %v7671_v3 = vld [vmem:[#allocation8 + $0xb0] sm:$0xff]  }
 0x306   :  { %4707 = vmatpush1.bf16.msra.mxu0 %v7596_v5  ;;  %5180 = vmatpush1.bf16.msra.mxu1 %v7599_v6  ;;  %v7673_v5 = vld [vmem:[#allocation8 + $0xf8] sm:$0xff]  }
 0x307   :  { %4708 = vmatprep.subr.bf16.mxu0 %v7604_v7  ;;  %5181 = vmatprep.subr.bf16.mxu1 %v7607_v8  ;;  %v7674_v6 = vld [vmem:[#allocation8 + $0x38] sm:$0xff]   ;;  %v7883_v8 = vmov 0.0  }
 0x308   :  { %v7675_v7 = vld [vmem:[#allocation8 + $0xb8] sm:$0xff]  }
 0x30a   :  { %4709 = vmatpush1.bf16.msra.mxu0 %v7602_v9  ;;  %5182 = vmatpush1.bf16.msra.mxu1 %v7605_v10  ;;  %v861_v9 = vlaneseq }
 0x30b   :  { %4710 = vmatprep.subr.bf16.mxu0 %v7610_v11  ;;  %5183 = vmatprep.subr.bf16.mxu1 %v7613_v12 }
 0x30c   :  { %v862_v10 = vshrl.u32 %v861_v9, 7 }
 0x30e   :  { %4711 = vmatpush1.bf16.msra.mxu0 %v7608_v13  ;;  %5184 = vmatpush1.bf16.msra.mxu1 %v7611_v14  ;;  %v863_v11 = vsub.s32 0, %v862_v10  ;;  %v871_v12 = vsub.s32 2, %v862_v10  ;;  %v859_v13 = vld [vmem:[#allocation7] sm:$0xf]  ;;  %v867_v14 = vsub.s32 1, %v862_v10 }
 0x30f   :  { %4712 = vmatprep.subr.bf16.mxu0 %v7616_v15  ;;  %5185 = vmatprep.subr.bf16.mxu1 %v7619_v16  ;;  %v875_v15 = vsub.s32 3, %v862_v10 }
 0x310   :  { %v864_v16 = vrot.slane %v859_v13, %v863_v11 }
 0x312   :  { %4713 = vmatpush1.bf16.msra.mxu0 %v7614_v17  ;;  %5186 = vmatpush1.bf16.msra.mxu1 %v7617_v18  ;;  %v872_v17 = vrot.slane %v859_v13, %v871_v12  ;;  %v868_v18 = vrot.slane %v859_v13, %v867_v14  ;;  %v6435_v12 = vld [vmem:[#allocation13] ss:$0 sm:$0xff] }
 0x313   :  { %4714 = vmatprep.subr.bf16.mxu0 %v7622_v19  ;;  %5187 = vmatprep.subr.bf16.mxu1 %v7625_v20  ;;  %v876_v19 = vrot.slane %v859_v13, %v875_v15 }
 0x316   :  { %4715 = vmatpush1.bf16.msra.mxu0 %v7620_v21  ;;  %5188 = vmatpush1.bf16.msra.mxu1 %v7623_v22 }
 0x317   :  { %4716 = vmatprep.subr.bf16.mxu0 %v7628_v23  ;;  %5189 = vmatprep.subr.bf16.mxu1 %v7631_v24 }
 0x31a   :  { %4717 = vmatpush1.bf16.msra.mxu0 %v7626_v25  ;;  %5190 = vmatpush1.bf16.msra.mxu1 %v7629_v26 }
 0x31b   :  { %4718 = vmatprep.subr.bf16.mxu0 %v7634_v27  ;;  %5191 = vmatprep.subr.bf16.mxu1 %v7637_v28 }
 0x31e   :  { %4719 = vmatpush1.bf16.msra.mxu0 %v7632_v29  ;;  %5192 = vmatpush1.bf16.msra.mxu1 %v7635_v30 }
 0x31f   :  { %6398 = vmatprep.subr.msk.bf16.mxu0 %vm4261_vm1, %v7638_v31  ;;  %6400 = vmatprep.subr.msk.bf16.mxu1 %vm4261_vm1, %v7640_v32 }
 0x322   :  { %4721 = vmatpush1.bf16.msra.mxu0 %v4263_v37  ;;  %5194 = vmatpush1.bf16.msra.mxu1 %v4269_v38 }
 0x323   :  { %6453 = vmatprep.subr.bf16.mxu0 %v7644_v39  ;;  %6475 = vmatprep.subr.bf16.mxu1 %v7645_v40 }
 0x325   :  { %4737 = vmatmul.mubr.bf16.vlgmr.msra.gmra.mrb[0].mxu0 %v181_v41  ;;  %5210 = vmatmul.mubr.bf16.vlgmr.msra.gmra.mrb[0].mxu1 %v181_v41 }
 0x326   :  { %6454 = vmatpush3.bf16.msra.mxu0 %v7646_v42  ;;  %6476 = vmatpush3.bf16.msra.mxu1 %v7647_v43 }
 0x327   :  { %6455 = vmatprep.subr.bf16.mxu0 %v7648_v44  ;;  %6477 = vmatprep.subr.bf16.mxu1 %v7649_v45 }
 0x32a   :  { %6456 = vmatpush3.bf16.msra.mxu0 %v7650_v46  ;;  %6478 = vmatpush3.bf16.msra.mxu1 %v7651_v47 }
 0x32b   :  { %6457 = vmatprep.subr.bf16.mxu0 %v7652_v48  ;;  %6479 = vmatprep.subr.bf16.mxu1 %v7653_v49  ;;  %v7676_v48 = vld [vmem:[#allocation11] sm:$0xff]   ;;  %v7677_v49 = vld [vmem:[#allocation11 + $0x8] sm:$0xff]  }
 0x32e   :  { %6458 = vmatpush3.bf16.msra.mxu0 %v7654_v50  ;;  %6480 = vmatpush3.bf16.msra.mxu1 %v7655_v51  ;;  %v7678_v50 = vld [vmem:[#allocation11 + $0x10] sm:$0xff]   ;;  %v7679_v51 = vld [vmem:[#allocation11 + $0x18] sm:$0xff]  }
 0x32f   :  { %6459 = vmatprep.subr.bf16.mxu0 %v7656_v52  ;;  %6481 = vmatprep.subr.bf16.mxu1 %v7657_v53  ;;  %v7680_v52 = vld [vmem:[#allocation11 + $0x20] sm:$0xff]   ;;  %v7681_v53 = vld [vmem:[#allocation11 + $0x28] sm:$0xff]  }
 0x332   :  { %6460 = vmatpush3.bf16.msra.mxu0 %v7658_v54  ;;  %6482 = vmatpush3.bf16.msra.mxu1 %v7659_v55  ;;  %v7682_v54 = vld [vmem:[#allocation11 + $0x30] sm:$0xff]   ;;  %v7683_v55 = vld [vmem:[#allocation11 + $0x38] sm:$0xff]  }
 0x333   :  { %6461 = vmatprep.subr.bf16.mxu0 %v7660_v56  ;;  %6483 = vmatprep.subr.bf16.mxu1 %v7661_v57 }
 0x336   :  { %6462 = vmatpush3.bf16.msra.mxu0 %v7662_v58  ;;  %6484 = vmatpush3.bf16.msra.mxu1 %v7663_v59  ;;  %v6402_v58 = vld [vmem:[#allocation10] ss:$0 sm:$0xff] }
 0x337   :  { %6463 = vmatprep.subr.bf16.mxu0 %v7664_v60  ;;  %6485 = vmatprep.subr.bf16.mxu1 %v7665_v61 }
 0x33a   :  { %6464 = vmatpush3.bf16.msra.mxu0 %v7666_v62  ;;  %6486 = vmatpush3.bf16.msra.mxu1 %v7667_v63 }
 0x33b   :  { %6465 = vmatprep.subr.bf16.mxu0 %v7668_v0  ;;  %6487 = vmatprep.subr.bf16.mxu1 %v7669_v1 }
 0x33e   :  { %6466 = vmatpush3.bf16.msra.mxu0 %v7670_v2  ;;  %6488 = vmatpush3.bf16.msra.mxu1 %v7671_v3 }
 0x33f   :  { %6467 = vmatprep.subr.bf16.mxu0 %v7672_v4  ;;  %6489 = vmatprep.subr.bf16.mxu1 %v7673_v5 }
 0x342   :  { %6468 = vmatpush3.bf16.msra.mxu0 %v7674_v6  ;;  %6490 = vmatpush3.bf16.msra.mxu1 %v7675_v7 }
 0x343   :  { %6506 = vmatprep.subr.bf16.mxu0 %v7883_v8 }
 0x3f8   :  { %v4738_v20 = vpop.f32.mrb[0].mxu0  ;;  %v5211_v21 = vpop.f32.mrb[0].mxu1 }
 0x3f9   :  { %v6526_v22 = vadd.f32 %v4738_v20, %v864_v16  ;;  %v6530_v23 = vadd.f32 %v5211_v21, %v872_v17  ;;  %v4740_v24 = vpop.f32.mrb[1].mxu0  ;;  %v5213_v25 = vpop.f32.mrb[1].mxu1 }
 0x3fa   :  { %v6527_v26 = vadd.f32 %v4740_v24, %v868_v18  ;;  %v6531_v27 = vadd.f32 %v5213_v25, %v876_v19  ;;  %v4742_v28 = vpop.f32.mrb[2].mxu0  ;;  %v5215_v29 = vpop.f32.mrb[2].mxu1 }
 0x3fb   :  { %v6528_v30 = vadd.f32 %v4742_v28, %v864_v16  ;;  %v6532_v31 = vadd.f32 %v5215_v29, %v872_v17  ;;  %v4744_v32 = vpop.f32.mrb[3].mxu0  ;;  %v5217_v33 = vpop.f32.mrb[3].mxu1  ;;  %v5220_v36 = vmax.f32 %v6526_v22, 0.0  ;;  %v5222_v37 = vmax.f32 %v6530_v23, 0.0 }
 0x3fc   :  { %v6529_v34 = vadd.f32 %v4744_v32, %v868_v18  ;;  %v6533_v35 = vadd.f32 %v5217_v33, %v876_v19  ;;  %v5221_v40 = vmax.f32 %v6527_v26, 0.0  ;;  %v5223_v41 = vmax.f32 %v6531_v27, 0.0 }
 0x3fd   :  { %v5224_v38 = vmax.f32 %v6528_v30, 0.0  ;;  %v5226_v39 = vmax.f32 %v6532_v31, 0.0 }
 0x3fe   :  { %v5225_v42 = vmax.f32 %v6529_v34, 0.0  ;;  %v5227_v43 = vmax.f32 %v6533_v35, 0.0 }
 0x3ff   :  { %v5228_v44 = vpack.c.bf16 %v5224_v38, %v5220_v36  ;;  %v5230_v45 = vpack.c.bf16 %v5226_v39, %v5222_v37 }
 0x400   :  { %v5229_v46 = vpack.c.bf16 %v5225_v42, %v5221_v40  ;;  %v5231_v47 = vpack.c.bf16 %v5227_v43, %v5223_v41 }
 0x402   :  { %5527 = vmatprep.mubr.bf16.mxu0 %v5229_v46  ;;  %5568 = vmatprep.mubr.bf16.mxu1 %v5231_v47 }
 0x403   :  { %5528 = vmatmul.mubr.bf16.vlgmr.msra.gmra.mrb[4].mxu0 %v5228_v44  ;;  %5569 = vmatmul.mubr.bf16.vlgmr.msra.gmra.mrb[4].mxu1 %v5230_v45 }
 0x404   :  { %6507 = vmatpush3.bf16.msra.mxu0 %v7676_v48  ;;  %6522 = vmatprep.mubr.msk.bf16.mxu0 %vm7884_vm2, %v7883_v8 }
 0x405   :  { %6508 = vmatprep.subr.bf16.mxu0 %v7883_v8 }
 0x408   :  { %6509 = vmatpush3.bf16.msra.mxu0 %v7677_v49 }
 0x409   :  { %6510 = vmatprep.subr.bf16.mxu0 %v7883_v8 }
 0x40c   :  { %6511 = vmatpush3.bf16.msra.mxu0 %v7678_v50 }
 0x40d   :  { %6512 = vmatprep.subr.bf16.mxu0 %v7883_v8 }
 0x410   :  { %6513 = vmatpush3.bf16.msra.mxu0 %v7679_v51 }
 0x411   :  { %6514 = vmatprep.subr.bf16.mxu0 %v7883_v8 }
 0x414   :  { %6515 = vmatpush3.bf16.msra.mxu0 %v7680_v52 }
 0x415   :  { %6516 = vmatprep.subr.bf16.mxu0 %v7883_v8 }
 0x418   :  { %6517 = vmatpush3.bf16.msra.mxu0 %v7681_v53 }
 0x419   :  { %6518 = vmatprep.subr.bf16.mxu0 %v7883_v8 }
 0x41c   :  { %6519 = vmatpush3.bf16.msra.mxu0 %v7682_v54 }
 0x41d   :  { %6520 = vmatprep.subr.bf16.mxu0 %v7883_v8 }
 0x420   :  { %6521 = vmatpush3.bf16.msra.mxu0 %v7683_v55 }
 0x4d6   :  { %v6469_v56 = vpop.f32.mrb[4].mxu0  ;;  %v6491_v57 = vpop.f32.mrb[4].mxu1 }
 0x4d7   :  { %v6470_v59 = vpop.f32.mrb[5].mxu0  ;;  %v6492_v60 = vpop.f32.mrb[5].mxu1 }
 0x4d8   :  { %v6471_v61 = vadd.f32 %v6470_v59, %v6469_v56  ;;  %v6493_v62 = vadd.f32 %v6492_v60, %v6491_v57  ;;  %v6472_v63 = vpop.f32.mrb[6].mxu0  ;;  %v6494_v0 = vpop.f32.mrb[6].mxu1 }
 0x4d9   :  { %v6473_v1 = vpop.f32.mrb[7].mxu0  ;;  %v6495_v2 = vpop.f32.mrb[7].mxu1 }
 0x4da   :  { %v5530_v3 = vadd.f32 %v6471_v61, %v6402_v58  ;;  %v6474_v4 = vadd.f32 %v6473_v1, %v6472_v63  ;;  %v6496_v5 = vadd.f32 %v6495_v2, %v6494_v0 }
 0x4dc   :  { %v5571_v6 = vadd.f32 %v6493_v62, %v5530_v3  ;;  %v5533_v7 = vadd.f32 %v6474_v4, %v6402_v58 }
 0x4de   :  { %v5574_v9 = vadd.f32 %v6496_v5, %v5533_v7  ;;  %v5577_v10 = vmax.f32 %v5571_v6, 0.0 }
 0x4e0   :  { %v5578_v11 = vmax.f32 %v5574_v9, 0.0 }
 0x4e2   :  { %v5579_v8 = vpack.c.bf16 %v5578_v11, %v5577_v10 }
 0x4e4   :  { %6523 = vmatmul.mubr.bf16.vlgmr.msra.gmra.mrb[8].mxu0 %v5579_v8 }
 0x5b7   :  { %v5685_v13 = vpop.f32.mrb[8].mxu0 }
 0x5b8   :  { %v6524_v14 = vpop.f32.mrb[9].mxu0  ;;  %v5686_v16 = vadd.f32 %v6435_v12, %v5685_v13 }
 0x5b9   :  { %v5688_v15 = vpop.f32.mrb[10].mxu0 }
 0x5ba   :  { %v5689_v17 = vadd.f32 %v6435_v12, %v5688_v15  ;;  %v6525_v18 = vpop.f32.mrb[11].mxu0 }
 0x5bc   :  { %v6451_v19 = vpack.c.bf16 %v5689_v17, %v5686_v16 }
 0x5be   :  { %6452 = vst [vmem:[#allocation14] sm:$0xff] %v6451_v19  }
 0x5bf   :  { %7849 = shalt.err (!%p7846_p4)
}
 0x5c0   :  { %s7850_s20 = scalar_lea.hbm %s8054_s7, 128 }
 0x5c1   :  { %p7851_p5 = scmp.ne.s32.totalorder %s8054_s7, %s7850_s20  ;;  %p7854_p6 = scmp.lt.u32.totalorder %s7850_s20, %s8054_s7 }
 0x5c3   :  { %p7856_p7 = pnand %p7854_p6, %p7851_p5 }
 0x5c5   :  { %7859 = shalt.err (!%p7856_p7)
}
 0x5c6   :  { %5713 = dma.vmem_to_hbm [thread:$0]  %s5708_s0, 128, %s8054_s7, [#allocation4], %s7874_s1, %s7874_s1, %s7875_s25  }
 0x5c7   :  { %7868 = dma.done.wait [#allocation4], 128  }
 0x5c8   :  { %7869 = vsyncadd [#allocation4], 4294967168 }
 0x5c9   :  { %5717 = vsyncpa [#allocation3], 1 }
 0x5ca   :  { %5718 = vsyncpa [#allocation6], 1 }
 0x5cb   :  { %5719 = vsyncpa [#allocation9], 1 }
 0x5cc   :  { %5720 = vsyncpa [#allocation12], 1 }
 0x5cd   :  { %5721 = vsyncpa [#allocation4], 1 }

</bundles_post_ra>
